<compile_context>
chip_gen: v7x
topology: tpu7x:2x2x1
jax: 0.10.0
libtpu: 0.0.40
codegen_flags: <defaults>
</compile_context>

<pallas_src>
import jax
import jax.numpy as jnp
from jax import lax
from jax.experimental import pallas as pl
from jax.experimental.pallas import tpu as pltpu


def _round_up(x, m):
    return ((x + m - 1) // m) * m


# ------------------------------ in-kernel helpers ------------------------------

def _inorm_lrelu(y, groups, count):
    """InstanceNorm (affine=False, eps=1e-5) + LeakyReLU(0.2) on packed activations.

    y: (J, B, groups*C); logical length = J*groups (row j, lane block g = position
    groups*j + g).  Normalizes each (sample, channel) over the full length, i.e.
    over the J rows and the `groups` lane blocks.
    """
    J, B, GC = y.shape
    C = GC // groups
    s = jnp.sum(y, axis=0)                                    # (B, groups*C)
    m = s[:, 0:C]
    for g in range(1, groups):
        m = m + s[:, g * C:(g + 1) * C]
    mean = m * (1.0 / count)                                  # (B, C)
    mean_t = jnp.concatenate([mean] * groups, axis=-1) if groups > 1 else mean
    c = y - mean_t[None]                                      # centered (J, B, groups*C)
    s2 = jnp.sum(c * c, axis=0)
    v = s2[:, 0:C]
    for g in range(1, groups):
        v = v + s2[:, g * C:(g + 1) * C]
    var = v * (1.0 / count)                                   # biased variance
    inv = lax.rsqrt(var + 1e-5)
    inv_t = jnp.concatenate([inv] * groups, axis=-1) if groups > 1 else inv
    yn = c * inv_t[None]
    return jnp.where(yn >= 0, yn, 0.2 * yn)                   # LeakyReLU(0.2)


# ------------------------------ fused forward kernel ------------------------------

def _disc_kernel(x_ref, ext_ref, w1_ref, b1_ref, w2_ref, b2_ref, w3_ref, b3_ref,
                 w5_ref, b5_ref, wh_ref, whd_ref, o_ref):
    f32 = jnp.float32
    X = x_ref[...]                                            # (12, B, 8): x[b, 8j+m] at [j,b,m]
    B = X.shape[1]

    # ---- block1: Conv1d(1->64, k4, s2, p1) on the VPU + InstanceNorm + LeakyReLU ----
    z8 = jnp.zeros((1, B, 8), f32)
    Xz = jnp.concatenate([z8, X, z8], axis=0)                 # (14, B, 8), zero conv padding
    # Win[j, b, m] = x_padded[b, 8j - 1 + m], m = 0..9  (covers all 4 windows of row j)
    Win = jnp.concatenate([Xz[0:12, :, 7:8], Xz[1:13, :, :], Xz[2:14, :, 0:1]], axis=2)
    parts = []
    for i in range(4):                                        # output position 4j + i
        acc = Win[:, :, 2 * i:2 * i + 1] * w1_ref[0]
        for k in range(1, 4):
            acc = acc + Win[:, :, 2 * i + k:2 * i + k + 1] * w1_ref[k]
        parts.append(acc)                                     # (12, B, 64)
    a1 = jnp.concatenate(parts, axis=-1) + b1_ref[...]        # (12, B, 256), packed-4
    a1 = _inorm_lrelu(a1, groups=4, count=48.0)

    # ---- block2: Conv1d(64->128, k4, s2, p1) + InstanceNorm + LeakyReLU ----
    z256 = jnp.zeros((1, B, 256), f32)
    a1z = jnp.concatenate([z256, a1, z256], axis=0)           # (14, B, 256)
    # window for even outputs a2[2j]  = a1[4j-1 .. 4j+2]
    win_e = jnp.concatenate([a1z[0:12, :, 192:256], a1z[1:13, :, 0:192]], axis=-1)
    # window for odd  outputs a2[2j+1] = a1[4j+1 .. 4j+4]
    win_o = jnp.concatenate([a1z[1:13, :, 64:256], a1z[2:14, :, 0:64]], axis=-1)
    rows2 = jnp.concatenate([win_e.reshape(12 * B, 256),
                             win_o.reshape(12 * B, 256)], axis=0)          # (24B, 256)
    y2 = jnp.dot(rows2, w2_ref[...], preferred_element_type=f32)           # (24B, 128)
    a2 = jnp.concatenate([y2[0:12 * B].reshape(12, B, 128),
                          y2[12 * B:].reshape(12, B, 128)], axis=-1) + b2_ref[...]
    a2 = _inorm_lrelu(a2, groups=2, count=24.0)               # (12, B, 256), packed-2

    # ---- block3: Conv1d(128->256, k4, s2, p1) + InstanceNorm + LeakyReLU ----
    a2z = jnp.concatenate([z256, a2, z256], axis=0)           # (14, B, 256)
    win3 = jnp.concatenate([a2z[0:12, :, 128:256], a2z[1:13, :, :],
                            a2z[2:14, :, 0:128]], axis=-1)                 # (12, B, 512)
    y3 = jnp.dot(win3.reshape(12 * B, 512), w3_ref[...], preferred_element_type=f32)
    a3 = y3.reshape(12, B, 256) + b3_ref[...]
    a3 = _inorm_lrelu(a3, groups=1, count=12.0)               # (12, B, 256), packed-1

    # ---- block5: Conv1d(256->64, k4, s1, p0), no norm / activation ----
    win5 = jnp.concatenate([a3[0:9], a3[1:10], a3[2:11], a3[3:12]], axis=-1)   # (9, B, 1024)
    y5 = jnp.dot(win5.reshape(9 * B, 1024), w5_ref[...], preferred_element_type=f32) + b5_ref[...]
    y5 = y5.reshape(9, B, 64)                                 # y5[l, b, c] == torch out[b, c, l]

    # ---- head: trapezoid / diff / Linear(577 -> 1) / sigmoid ----
    # feat @ w_feat as a VPU reduction (wh[l, c] = w_src[0, c*9 + l] matches out.view(N,-1))
    zfeat = jnp.sum(jnp.sum(y5 * wh_ref[...][:, None, :], axis=0), axis=-1, keepdims=True)  # (B,1)
    total = jnp.sum(jnp.sum(X, axis=0), axis=-1, keepdims=True)                             # (B,1)
    trap = 0.25 * (total - 0.5 * (X[0, :, 0:1] + X[11, :, 7:8]))   # torch.trapezoid(dx=1/4)
    sums = trap / 10.0
    ext = ext_ref[...]                                        # (B, 1)
    diff = jnp.abs(ext - sums) / jnp.abs(ext)                 # faithful: no eps
    z = zfeat + diff * whd_ref[0] + whd_ref[1]                # + diff*W[:,576] + bias
    src = jax.nn.sigmoid(z)                                   # (B, 1)
    o_ref[...] = jnp.broadcast_to(src, (B, 128))              # lane-dense store


# ------------------------------ JAX wrapper ------------------------------

def discriminator_forward(params, inp, extreme, batch_tile=32):
    N, C, L = inp.shape
    assert C == 1, "Discriminator forward requires in_channels == 1"
    assert L == 96, "Linear(64*9+1, 1) forces an input length of 96"

    B = min(batch_tile, _round_up(N, 8))                      # batch tile, multiple of 8
    n_pad = _round_up(N, B)
    T = n_pad // B

    # Input prep (one-time XLA transforms, not inter-layer glue):
    x = inp.reshape(N, L).astype(jnp.float32)
    x = jnp.pad(x, ((0, n_pad - N), (0, 0)))
    xin = jnp.transpose(x.reshape(n_pad, 12, 8), (1, 0, 2))   # (12, n_pad, 8) length-major
    ext = extreme.reshape(N, 1).astype(jnp.float32)
    ext = jnp.pad(ext, ((0, n_pad - N), (0, 0)), constant_values=1.0)  # keep padded rows finite

    # Weights rearranged to the packed, position-major layouts the kernel expects.
    w1v = jnp.transpose(params["w1"][:, 0, :]).astype(jnp.float32)              # (4, 64)
    b1p = jnp.tile(params["b1"], 4).reshape(1, 256).astype(jnp.float32)
    w2pm = jnp.transpose(params["w2"], (2, 1, 0)).reshape(256, 128).astype(jnp.float32)
    b2p = jnp.tile(params["b2"], 2).reshape(1, 256).astype(jnp.float32)
    w3pm = jnp.transpose(params["w3"], (2, 1, 0)).reshape(512, 256).astype(jnp.float32)
    b3p = params["b3"].reshape(1, 256).astype(jnp.float32)
    w5pm = jnp.transpose(params["w5"], (2, 1, 0)).reshape(1024, 64).astype(jnp.float32)
    b5p = params["b5"].reshape(1, 64).astype(jnp.float32)
    wh = jnp.transpose(params["w_src"][0, :576].reshape(64, 9)).astype(jnp.float32)  # (9, 64)
    whd = jnp.stack([params["w_src"][0, 576], params["b_src"][0]]).astype(jnp.float32)  # (2,)

    def const_spec(shape):
        # Constant index_map -> loaded once, VMEM-resident across all grid steps.
        return pl.BlockSpec(shape, lambda n: (0,) * len(shape))

    out = pl.pallas_call(
        _disc_kernel,
        out_shape=jax.ShapeDtypeStruct((n_pad, 128), jnp.float32),
        grid=(T,),
        in_specs=[
            pl.BlockSpec((12, B, 8), lambda n: (0, n, 0)),    # input batch tile
            pl.BlockSpec((B, 1), lambda n: (n, 0)),           # extreme batch tile
            const_spec((4, 64)),                              # w1 (VPU taps)
            const_spec((1, 256)),                             # b1 (tiled x4)
            const_spec((256, 128)),                           # w2 position-major
            const_spec((1, 256)),                             # b2 (tiled x2)
            const_spec((512, 256)),                           # w3 position-major
            const_spec((1, 256)),                             # b3
            const_spec((1024, 64)),                           # w5 position-major
            const_spec((1, 64)),                              # b5
            const_spec((9, 64)),                              # head feature weights
            pl.BlockSpec(memory_space=pltpu.MemorySpace.SMEM),  # [w_diff, bias] scalars
        ],
        out_specs=pl.BlockSpec((B, 128), lambda n: (n, 0)),
        compiler_params=pltpu.CompilerParams(dimension_semantics=("parallel",)),
    )(xin, ext, w1v, b1p, w2pm, b2p, w3pm, b3p, w5pm, b5p, wh, whd)

    return out[:N, 0:1]


# ------------------------------ params / demo ------------------------------

def init_params(key, in_channels=1):
    ks = jax.random.split(key, 10)

    def conv_w(k, cout, cin, K):
        return 0.05 * jax.random.normal(k, (cout, cin, K), jnp.float32)

    def bias(k, cout):
        return 0.01 * jax.random.normal(k, (cout,), jnp.float32)

    return {
        "w1": conv_w(ks[0], 64, in_channels, 4), "b1": bias(ks[1], 64),
        "w2": conv_w(ks[2], 128, 64, 4),         "b2": bias(ks[3], 128),
        "w3": conv_w(ks[4], 256, 128, 4),        "b3": bias(ks[5], 256),
        "w5": conv_w(ks[6], 64, 256, 4),         "b5": bias(ks[7], 64),
        "w_src": 0.05 * jax.random.normal(ks[8], (1, 64 * 9 + 1), jnp.float32),
        "b_src": 0.01 * jax.random.normal(ks[9], (1,), jnp.float32),
    }


if __name__ == "__main__":
    key = jax.random.PRNGKey(0)
    kp, ki, ke = jax.random.split(key, 3)
    params = init_params(kp, in_channels=1)

    N, C, L = 2, 1, 96  # L = 96 required so flattened features = 64 * 9 = 576
    inp = jax.random.normal(ki, (N, C, L), jnp.float32)
    extreme = 1.0 + jax.random.uniform(ke, (N, 1), dtype=jnp.float32)  # nonzero divisor

    out = jax.jit(discriminator_forward)(params, inp, extreme)
    out = jax.block_until_ready(out)
    assert out.shape == (N, 1) and out.dtype == jnp.float32
    assert bool(jnp.all(jnp.isfinite(out)))
    print("KERNEL_OK")
</pallas_src>

<mosaic_0001>
module attributes {stable_mosaic.version = 11 : i64} {
  func.func @_disc_kernel(%arg0: i32, %arg1: memref<12x8x8xf32, #tpu.memory_space<vmem>>, %arg2: memref<8x1xf32, #tpu.memory_space<vmem>>, %arg3: memref<4x64xf32, #tpu.memory_space<vmem>>, %arg4: memref<1x256xf32, #tpu.memory_space<vmem>>, %arg5: memref<256x128xf32, #tpu.memory_space<vmem>>, %arg6: memref<1x256xf32, #tpu.memory_space<vmem>>, %arg7: memref<512x256xf32, #tpu.memory_space<vmem>>, %arg8: memref<1x256xf32, #tpu.memory_space<vmem>>, %arg9: memref<1024x64xf32, #tpu.memory_space<vmem>>, %arg10: memref<1x64xf32, #tpu.memory_space<vmem>>, %arg11: memref<9x64xf32, #tpu.memory_space<vmem>>, %arg12: memref<2xf32, #tpu.memory_space<smem>>, %arg13: memref<8x128xf32, #tpu.memory_space<vmem>>) attributes {dimension_semantics = [#tpu.dimension_semantics<parallel>], iteration_bounds = array<i64: 1>, scalar_prefetch = 0 : i64, scratch_operands = 0 : i64, tpu.core_type = #tpu.core_type<tc>, window_params = [{transform_indices = @transform_0, window_bounds = array<i64: 12, 8, 8>}, {transform_indices = @transform_1, window_bounds = array<i64: 8, 1>}, {pipeline_mode = #tpu.pipeline_mode<synchronous>, transform_indices = @transform_2, window_bounds = array<i64: 4, 64>}, {pipeline_mode = #tpu.pipeline_mode<synchronous>, transform_indices = @transform_3, window_bounds = array<i64: 1, 256>}, {pipeline_mode = #tpu.pipeline_mode<synchronous>, transform_indices = @transform_4, window_bounds = array<i64: 256, 128>}, {pipeline_mode = #tpu.pipeline_mode<synchronous>, transform_indices = @transform_5, window_bounds = array<i64: 1, 256>}, {pipeline_mode = #tpu.pipeline_mode<synchronous>, transform_indices = @transform_6, window_bounds = array<i64: 512, 256>}, {pipeline_mode = #tpu.pipeline_mode<synchronous>, transform_indices = @transform_7, window_bounds = array<i64: 1, 256>}, {pipeline_mode = #tpu.pipeline_mode<synchronous>, transform_indices = @transform_8, window_bounds = array<i64: 1024, 64>}, {pipeline_mode = #tpu.pipeline_mode<synchronous>, transform_indices = @transform_9, window_bounds = array<i64: 1, 64>}, {pipeline_mode = #tpu.pipeline_mode<synchronous>, transform_indices = @transform_10, window_bounds = array<i64: 9, 64>}, {transform_indices = @transform_11, window_bounds = array<i64: 2>}, {transform_indices = @transform_12, window_bounds = array<i64: 8, 128>}]} {
    %c0 = arith.constant 0 : index
    %c0_0 = arith.constant 0 : index
    %c0_1 = arith.constant 0 : index
    %0 = vector.load %arg1[%c0, %c0_0, %c0_1] : memref<12x8x8xf32, #tpu.memory_space<vmem>>, vector<12x8x8xf32>
    %cst = arith.constant 0.000000e+00 : f32
    %1 = vector.broadcast %cst : f32 to vector<1x8x8xf32>
    %2 = tpu.concatenate %1, %0, %1 in 0 : vector<1x8x8xf32>, vector<12x8x8xf32>, vector<1x8x8xf32> -> vector<14x8x8xf32>
    %3 = vector.extract_strided_slice %2 {offsets = [0, 0, 7], sizes = [12, 8, 1], strides = [1, 1, 1]} : vector<14x8x8xf32> to vector<12x8x1xf32>
    %4 = vector.extract_strided_slice %2 {offsets = [1, 0, 0], sizes = [12, 8, 8], strides = [1, 1, 1]} : vector<14x8x8xf32> to vector<12x8x8xf32>
    %5 = vector.extract_strided_slice %2 {offsets = [2, 0, 0], sizes = [12, 8, 1], strides = [1, 1, 1]} : vector<14x8x8xf32> to vector<12x8x1xf32>
    %6 = tpu.concatenate %3, %4, %5 in 2 : vector<12x8x1xf32>, vector<12x8x8xf32>, vector<12x8x1xf32> -> vector<12x8x10xf32>
    %7 = vector.extract_strided_slice %6 {offsets = [0, 0, 0], sizes = [12, 8, 1], strides = [1, 1, 1]} : vector<12x8x10xf32> to vector<12x8x1xf32>
    %c0_2 = arith.constant 0 : index
    %c0_3 = arith.constant 0 : index
    %8 = vector.load %arg3[%c0_2, %c0_3] : memref<4x64xf32, #tpu.memory_space<vmem>>, vector<1x64xf32>
    %9 = vector.shape_cast %8 : vector<1x64xf32> to vector<64xf32>
    %10 = vector.shape_cast %9 : vector<64xf32> to vector<1x1x64xf32>
    %11 = vector.broadcast %7 : vector<12x8x1xf32> to vector<12x8x64xf32>
    %12 = vector.broadcast %10 : vector<1x1x64xf32> to vector<12x8x64xf32>
    %13 = arith.mulf %11, %12 : vector<12x8x64xf32>
    %14 = vector.extract_strided_slice %6 {offsets = [0, 0, 1], sizes = [12, 8, 1], strides = [1, 1, 1]} : vector<12x8x10xf32> to vector<12x8x1xf32>
    %c1 = arith.constant 1 : index
    %c0_4 = arith.constant 0 : index
    %15 = vector.load %arg3[%c1, %c0_4] : memref<4x64xf32, #tpu.memory_space<vmem>>, vector<1x64xf32>
    %16 = vector.shape_cast %15 : vector<1x64xf32> to vector<64xf32>
    %17 = vector.shape_cast %16 : vector<64xf32> to vector<1x1x64xf32>
    %18 = vector.broadcast %14 : vector<12x8x1xf32> to vector<12x8x64xf32>
    %19 = vector.broadcast %17 : vector<1x1x64xf32> to vector<12x8x64xf32>
    %20 = arith.mulf %18, %19 : vector<12x8x64xf32>
    %21 = arith.addf %13, %20 : vector<12x8x64xf32>
    %22 = vector.extract_strided_slice %6 {offsets = [0, 0, 2], sizes = [12, 8, 1], strides = [1, 1, 1]} : vector<12x8x10xf32> to vector<12x8x1xf32>
    %c2 = arith.constant 2 : index
    %c0_5 = arith.constant 0 : index
    %23 = vector.load %arg3[%c2, %c0_5] : memref<4x64xf32, #tpu.memory_space<vmem>>, vector<1x64xf32>
    %24 = vector.shape_cast %23 : vector<1x64xf32> to vector<64xf32>
    %25 = vector.shape_cast %24 : vector<64xf32> to vector<1x1x64xf32>
    %26 = vector.broadcast %22 : vector<12x8x1xf32> to vector<12x8x64xf32>
    %27 = vector.broadcast %25 : vector<1x1x64xf32> to vector<12x8x64xf32>
    %28 = arith.mulf %26, %27 : vector<12x8x64xf32>
    %29 = arith.addf %21, %28 : vector<12x8x64xf32>
    %30 = vector.extract_strided_slice %6 {offsets = [0, 0, 3], sizes = [12, 8, 1], strides = [1, 1, 1]} : vector<12x8x10xf32> to vector<12x8x1xf32>
    %c3 = arith.constant 3 : index
    %c0_6 = arith.constant 0 : index
    %31 = vector.load %arg3[%c3, %c0_6] : memref<4x64xf32, #tpu.memory_space<vmem>>, vector<1x64xf32>
    %32 = vector.shape_cast %31 : vector<1x64xf32> to vector<64xf32>
    %33 = vector.shape_cast %32 : vector<64xf32> to vector<1x1x64xf32>
    %34 = vector.broadcast %30 : vector<12x8x1xf32> to vector<12x8x64xf32>
    %35 = vector.broadcast %33 : vector<1x1x64xf32> to vector<12x8x64xf32>
    %36 = arith.mulf %34, %35 : vector<12x8x64xf32>
    %37 = arith.addf %29, %36 : vector<12x8x64xf32>
    %38 = vector.extract_strided_slice %6 {offsets = [0, 0, 2], sizes = [12, 8, 1], strides = [1, 1, 1]} : vector<12x8x10xf32> to vector<12x8x1xf32>
    %c0_7 = arith.constant 0 : index
    %c0_8 = arith.constant 0 : index
    %39 = vector.load %arg3[%c0_7, %c0_8] : memref<4x64xf32, #tpu.memory_space<vmem>>, vector<1x64xf32>
    %40 = vector.shape_cast %39 : vector<1x64xf32> to vector<64xf32>
    %41 = vector.shape_cast %40 : vector<64xf32> to vector<1x1x64xf32>
    %42 = vector.broadcast %38 : vector<12x8x1xf32> to vector<12x8x64xf32>
    %43 = vector.broadcast %41 : vector<1x1x64xf32> to vector<12x8x64xf32>
    %44 = arith.mulf %42, %43 : vector<12x8x64xf32>
    %45 = vector.extract_strided_slice %6 {offsets = [0, 0, 3], sizes = [12, 8, 1], strides = [1, 1, 1]} : vector<12x8x10xf32> to vector<12x8x1xf32>
    %c1_9 = arith.constant 1 : index
    %c0_10 = arith.constant 0 : index
    %46 = vector.load %arg3[%c1_9, %c0_10] : memref<4x64xf32, #tpu.memory_space<vmem>>, vector<1x64xf32>
    %47 = vector.shape_cast %46 : vector<1x64xf32> to vector<64xf32>
    %48 = vector.shape_cast %47 : vector<64xf32> to vector<1x1x64xf32>
    %49 = vector.broadcast %45 : vector<12x8x1xf32> to vector<12x8x64xf32>
    %50 = vector.broadcast %48 : vector<1x1x64xf32> to vector<12x8x64xf32>
    %51 = arith.mulf %49, %50 : vector<12x8x64xf32>
    %52 = arith.addf %44, %51 : vector<12x8x64xf32>
    %53 = vector.extract_strided_slice %6 {offsets = [0, 0, 4], sizes = [12, 8, 1], strides = [1, 1, 1]} : vector<12x8x10xf32> to vector<12x8x1xf32>
    %c2_11 = arith.constant 2 : index
    %c0_12 = arith.constant 0 : index
    %54 = vector.load %arg3[%c2_11, %c0_12] : memref<4x64xf32, #tpu.memory_space<vmem>>, vector<1x64xf32>
    %55 = vector.shape_cast %54 : vector<1x64xf32> to vector<64xf32>
    %56 = vector.shape_cast %55 : vector<64xf32> to vector<1x1x64xf32>
    %57 = vector.broadcast %53 : vector<12x8x1xf32> to vector<12x8x64xf32>
    %58 = vector.broadcast %56 : vector<1x1x64xf32> to vector<12x8x64xf32>
    %59 = arith.mulf %57, %58 : vector<12x8x64xf32>
    %60 = arith.addf %52, %59 : vector<12x8x64xf32>
    %61 = vector.extract_strided_slice %6 {offsets = [0, 0, 5], sizes = [12, 8, 1], strides = [1, 1, 1]} : vector<12x8x10xf32> to vector<12x8x1xf32>
    %c3_13 = arith.constant 3 : index
    %c0_14 = arith.constant 0 : index
    %62 = vector.load %arg3[%c3_13, %c0_14] : memref<4x64xf32, #tpu.memory_space<vmem>>, vector<1x64xf32>
    %63 = vector.shape_cast %62 : vector<1x64xf32> to vector<64xf32>
    %64 = vector.shape_cast %63 : vector<64xf32> to vector<1x1x64xf32>
    %65 = vector.broadcast %61 : vector<12x8x1xf32> to vector<12x8x64xf32>
    %66 = vector.broadcast %64 : vector<1x1x64xf32> to vector<12x8x64xf32>
    %67 = arith.mulf %65, %66 : vector<12x8x64xf32>
    %68 = arith.addf %60, %67 : vector<12x8x64xf32>
    %69 = vector.extract_strided_slice %6 {offsets = [0, 0, 4], sizes = [12, 8, 1], strides = [1, 1, 1]} : vector<12x8x10xf32> to vector<12x8x1xf32>
    %c0_15 = arith.constant 0 : index
    %c0_16 = arith.constant 0 : index
    %70 = vector.load %arg3[%c0_15, %c0_16] : memref<4x64xf32, #tpu.memory_space<vmem>>, vector<1x64xf32>
    %71 = vector.shape_cast %70 : vector<1x64xf32> to vector<64xf32>
    %72 = vector.shape_cast %71 : vector<64xf32> to vector<1x1x64xf32>
    %73 = vector.broadcast %69 : vector<12x8x1xf32> to vector<12x8x64xf32>
    %74 = vector.broadcast %72 : vector<1x1x64xf32> to vector<12x8x64xf32>
    %75 = arith.mulf %73, %74 : vector<12x8x64xf32>
    %76 = vector.extract_strided_slice %6 {offsets = [0, 0, 5], sizes = [12, 8, 1], strides = [1, 1, 1]} : vector<12x8x10xf32> to vector<12x8x1xf32>
    %c1_17 = arith.constant 1 : index
    %c0_18 = arith.constant 0 : index
    %77 = vector.load %arg3[%c1_17, %c0_18] : memref<4x64xf32, #tpu.memory_space<vmem>>, vector<1x64xf32>
    %78 = vector.shape_cast %77 : vector<1x64xf32> to vector<64xf32>
    %79 = vector.shape_cast %78 : vector<64xf32> to vector<1x1x64xf32>
    %80 = vector.broadcast %76 : vector<12x8x1xf32> to vector<12x8x64xf32>
    %81 = vector.broadcast %79 : vector<1x1x64xf32> to vector<12x8x64xf32>
    %82 = arith.mulf %80, %81 : vector<12x8x64xf32>
    %83 = arith.addf %75, %82 : vector<12x8x64xf32>
    %84 = vector.extract_strided_slice %6 {offsets = [0, 0, 6], sizes = [12, 8, 1], strides = [1, 1, 1]} : vector<12x8x10xf32> to vector<12x8x1xf32>
    %c2_19 = arith.constant 2 : index
    %c0_20 = arith.constant 0 : index
    %85 = vector.load %arg3[%c2_19, %c0_20] : memref<4x64xf32, #tpu.memory_space<vmem>>, vector<1x64xf32>
    %86 = vector.shape_cast %85 : vector<1x64xf32> to vector<64xf32>
    %87 = vector.shape_cast %86 : vector<64xf32> to vector<1x1x64xf32>
    %88 = vector.broadcast %84 : vector<12x8x1xf32> to vector<12x8x64xf32>
    %89 = vector.broadcast %87 : vector<1x1x64xf32> to vector<12x8x64xf32>
    %90 = arith.mulf %88, %89 : vector<12x8x64xf32>
    %91 = arith.addf %83, %90 : vector<12x8x64xf32>
    %92 = vector.extract_strided_slice %6 {offsets = [0, 0, 7], sizes = [12, 8, 1], strides = [1, 1, 1]} : vector<12x8x10xf32> to vector<12x8x1xf32>
    %c3_21 = arith.constant 3 : index
    %c0_22 = arith.constant 0 : index
    %93 = vector.load %arg3[%c3_21, %c0_22] : memref<4x64xf32, #tpu.memory_space<vmem>>, vector<1x64xf32>
    %94 = vector.shape_cast %93 : vector<1x64xf32> to vector<64xf32>
    %95 = vector.shape_cast %94 : vector<64xf32> to vector<1x1x64xf32>
    %96 = vector.broadcast %92 : vector<12x8x1xf32> to vector<12x8x64xf32>
    %97 = vector.broadcast %95 : vector<1x1x64xf32> to vector<12x8x64xf32>
    %98 = arith.mulf %96, %97 : vector<12x8x64xf32>
    %99 = arith.addf %91, %98 : vector<12x8x64xf32>
    %100 = vector.extract_strided_slice %6 {offsets = [0, 0, 6], sizes = [12, 8, 1], strides = [1, 1, 1]} : vector<12x8x10xf32> to vector<12x8x1xf32>
    %c0_23 = arith.constant 0 : index
    %c0_24 = arith.constant 0 : index
    %101 = vector.load %arg3[%c0_23, %c0_24] : memref<4x64xf32, #tpu.memory_space<vmem>>, vector<1x64xf32>
    %102 = vector.shape_cast %101 : vector<1x64xf32> to vector<64xf32>
    %103 = vector.shape_cast %102 : vector<64xf32> to vector<1x1x64xf32>
    %104 = vector.broadcast %100 : vector<12x8x1xf32> to vector<12x8x64xf32>
    %105 = vector.broadcast %103 : vector<1x1x64xf32> to vector<12x8x64xf32>
    %106 = arith.mulf %104, %105 : vector<12x8x64xf32>
    %107 = vector.extract_strided_slice %6 {offsets = [0, 0, 7], sizes = [12, 8, 1], strides = [1, 1, 1]} : vector<12x8x10xf32> to vector<12x8x1xf32>
    %c1_25 = arith.constant 1 : index
    %c0_26 = arith.constant 0 : index
    %108 = vector.load %arg3[%c1_25, %c0_26] : memref<4x64xf32, #tpu.memory_space<vmem>>, vector<1x64xf32>
    %109 = vector.shape_cast %108 : vector<1x64xf32> to vector<64xf32>
    %110 = vector.shape_cast %109 : vector<64xf32> to vector<1x1x64xf32>
    %111 = vector.broadcast %107 : vector<12x8x1xf32> to vector<12x8x64xf32>
    %112 = vector.broadcast %110 : vector<1x1x64xf32> to vector<12x8x64xf32>
    %113 = arith.mulf %111, %112 : vector<12x8x64xf32>
    %114 = arith.addf %106, %113 : vector<12x8x64xf32>
    %115 = vector.extract_strided_slice %6 {offsets = [0, 0, 8], sizes = [12, 8, 1], strides = [1, 1, 1]} : vector<12x8x10xf32> to vector<12x8x1xf32>
    %c2_27 = arith.constant 2 : index
    %c0_28 = arith.constant 0 : index
    %116 = vector.load %arg3[%c2_27, %c0_28] : memref<4x64xf32, #tpu.memory_space<vmem>>, vector<1x64xf32>
    %117 = vector.shape_cast %116 : vector<1x64xf32> to vector<64xf32>
    %118 = vector.shape_cast %117 : vector<64xf32> to vector<1x1x64xf32>
    %119 = vector.broadcast %115 : vector<12x8x1xf32> to vector<12x8x64xf32>
    %120 = vector.broadcast %118 : vector<1x1x64xf32> to vector<12x8x64xf32>
    %121 = arith.mulf %119, %120 : vector<12x8x64xf32>
    %122 = arith.addf %114, %121 : vector<12x8x64xf32>
    %123 = vector.extract_strided_slice %6 {offsets = [0, 0, 9], sizes = [12, 8, 1], strides = [1, 1, 1]} : vector<12x8x10xf32> to vector<12x8x1xf32>
    %c3_29 = arith.constant 3 : index
    %c0_30 = arith.constant 0 : index
    %124 = vector.load %arg3[%c3_29, %c0_30] : memref<4x64xf32, #tpu.memory_space<vmem>>, vector<1x64xf32>
    %125 = vector.shape_cast %124 : vector<1x64xf32> to vector<64xf32>
    %126 = vector.shape_cast %125 : vector<64xf32> to vector<1x1x64xf32>
    %127 = vector.broadcast %123 : vector<12x8x1xf32> to vector<12x8x64xf32>
    %128 = vector.broadcast %126 : vector<1x1x64xf32> to vector<12x8x64xf32>
    %129 = arith.mulf %127, %128 : vector<12x8x64xf32>
    %130 = arith.addf %122, %129 : vector<12x8x64xf32>
    %131 = tpu.concatenate %37, %68, %99, %130 in 2 : vector<12x8x64xf32>, vector<12x8x64xf32>, vector<12x8x64xf32>, vector<12x8x64xf32> -> vector<12x8x256xf32>
    %c0_31 = arith.constant 0 : index
    %c0_32 = arith.constant 0 : index
    %132 = vector.load %arg4[%c0_31, %c0_32] : memref<1x256xf32, #tpu.memory_space<vmem>>, vector<1x256xf32>
    %133 = vector.shape_cast %132 : vector<1x256xf32> to vector<1x1x256xf32>
    %134 = vector.broadcast %133 : vector<1x1x256xf32> to vector<12x8x256xf32>
    %135 = arith.addf %131, %134 : vector<12x8x256xf32>
    %cst_33 = arith.constant dense<0.000000e+00> : vector<8x256xf32>
    %136 = vector.multi_reduction <add>, %135, %cst_33 [0] : vector<12x8x256xf32> to vector<8x256xf32>
    %137 = vector.extract_strided_slice %136 {offsets = [0, 0], sizes = [8, 64], strides = [1, 1]} : vector<8x256xf32> to vector<8x64xf32>
    %138 = vector.extract_strided_slice %136 {offsets = [0, 64], sizes = [8, 64], strides = [1, 1]} : vector<8x256xf32> to vector<8x64xf32>
    %139 = arith.addf %137, %138 : vector<8x64xf32>
    %140 = vector.extract_strided_slice %136 {offsets = [0, 128], sizes = [8, 64], strides = [1, 1]} : vector<8x256xf32> to vector<8x64xf32>
    %141 = arith.addf %139, %140 : vector<8x64xf32>
    %142 = vector.extract_strided_slice %136 {offsets = [0, 192], sizes = [8, 64], strides = [1, 1]} : vector<8x256xf32> to vector<8x64xf32>
    %143 = arith.addf %141, %142 : vector<8x64xf32>
    %cst_34 = arith.constant 0.020833334 : f32
    %144 = vector.broadcast %cst_34 : f32 to vector<8x64xf32>
    %145 = arith.mulf %143, %144 : vector<8x64xf32>
    %146 = tpu.concatenate %145, %145, %145, %145 in 1 : vector<8x64xf32>, vector<8x64xf32>, vector<8x64xf32>, vector<8x64xf32> -> vector<8x256xf32>
    %147 = vector.shape_cast %146 : vector<8x256xf32> to vector<1x8x256xf32>
    %148 = vector.broadcast %147 : vector<1x8x256xf32> to vector<12x8x256xf32>
    %149 = arith.subf %135, %148 : vector<12x8x256xf32>
    %150 = arith.mulf %149, %149 : vector<12x8x256xf32>
    %cst_35 = arith.constant dense<0.000000e+00> : vector<8x256xf32>
    %151 = vector.multi_reduction <add>, %150, %cst_35 [0] : vector<12x8x256xf32> to vector<8x256xf32>
    %152 = vector.extract_strided_slice %151 {offsets = [0, 0], sizes = [8, 64], strides = [1, 1]} : vector<8x256xf32> to vector<8x64xf32>
    %153 = vector.extract_strided_slice %151 {offsets = [0, 64], sizes = [8, 64], strides = [1, 1]} : vector<8x256xf32> to vector<8x64xf32>
    %154 = arith.addf %152, %153 : vector<8x64xf32>
    %155 = vector.extract_strided_slice %151 {offsets = [0, 128], sizes = [8, 64], strides = [1, 1]} : vector<8x256xf32> to vector<8x64xf32>
    %156 = arith.addf %154, %155 : vector<8x64xf32>
    %157 = vector.extract_strided_slice %151 {offsets = [0, 192], sizes = [8, 64], strides = [1, 1]} : vector<8x256xf32> to vector<8x64xf32>
    %158 = arith.addf %156, %157 : vector<8x64xf32>
    %cst_36 = arith.constant 0.020833334 : f32
    %159 = vector.broadcast %cst_36 : f32 to vector<8x64xf32>
    %160 = arith.mulf %158, %159 : vector<8x64xf32>
    %cst_37 = arith.constant 9.99999974E-6 : f32
    %161 = vector.broadcast %cst_37 : f32 to vector<8x64xf32>
    %162 = arith.addf %160, %161 : vector<8x64xf32>
    %163 = math.rsqrt %162 : vector<8x64xf32>
    %164 = tpu.concatenate %163, %163, %163, %163 in 1 : vector<8x64xf32>, vector<8x64xf32>, vector<8x64xf32>, vector<8x64xf32> -> vector<8x256xf32>
    %165 = vector.shape_cast %164 : vector<8x256xf32> to vector<1x8x256xf32>
    %166 = vector.broadcast %165 : vector<1x8x256xf32> to vector<12x8x256xf32>
    %167 = arith.mulf %149, %166 : vector<12x8x256xf32>
    %cst_38 = arith.constant 0.000000e+00 : f32
    %168 = vector.broadcast %cst_38 : f32 to vector<12x8x256xf32>
    %169 = arith.cmpf oge, %167, %168 : vector<12x8x256xf32>
    %cst_39 = arith.constant 2.000000e-01 : f32
    %170 = vector.broadcast %cst_39 : f32 to vector<12x8x256xf32>
    %171 = arith.mulf %170, %167 : vector<12x8x256xf32>
    %172 = arith.select %169, %167, %171 : vector<12x8x256xi1>, vector<12x8x256xf32>
    %cst_40 = arith.constant 0.000000e+00 : f32
    %173 = vector.broadcast %cst_40 : f32 to vector<1x8x256xf32>
    %174 = tpu.concatenate %173, %172, %173 in 0 : vector<1x8x256xf32>, vector<12x8x256xf32>, vector<1x8x256xf32> -> vector<14x8x256xf32>
    %175 = vector.extract_strided_slice %174 {offsets = [0, 0, 192], sizes = [12, 8, 64], strides = [1, 1, 1]} : vector<14x8x256xf32> to vector<12x8x64xf32>
    %176 = vector.extract_strided_slice %174 {offsets = [1, 0, 0], sizes = [12, 8, 192], strides = [1, 1, 1]} : vector<14x8x256xf32> to vector<12x8x192xf32>
    %177 = tpu.concatenate %175, %176 in 2 : vector<12x8x64xf32>, vector<12x8x192xf32> -> vector<12x8x256xf32>
    %178 = vector.extract_strided_slice %174 {offsets = [1, 0, 64], sizes = [12, 8, 192], strides = [1, 1, 1]} : vector<14x8x256xf32> to vector<12x8x192xf32>
    %179 = vector.extract_strided_slice %174 {offsets = [2, 0, 0], sizes = [12, 8, 64], strides = [1, 1, 1]} : vector<14x8x256xf32> to vector<12x8x64xf32>
    %180 = tpu.concatenate %178, %179 in 2 : vector<12x8x192xf32>, vector<12x8x64xf32> -> vector<12x8x256xf32>
    %181 = vector.shape_cast %177 : vector<12x8x256xf32> to vector<96x256xf32>
    %182 = vector.shape_cast %180 : vector<12x8x256xf32> to vector<96x256xf32>
    %183 = tpu.concatenate %181, %182 in 0 : vector<96x256xf32>, vector<96x256xf32> -> vector<192x256xf32>
    %c0_41 = arith.constant 0 : index
    %c0_42 = arith.constant 0 : index
    %184 = vector.load %arg5[%c0_41, %c0_42] : memref<256x128xf32, #tpu.memory_space<vmem>>, vector<256x128xf32>
    %cst_43 = arith.constant dense<0.000000e+00> : vector<192x128xf32>
    %185 = tpu.matmul %183, %184, %cst_43 {dimension_numbers = #tpu.dot_dimension_numbers<[1], [0], [0], [1], [0, 0, 1, 1], [], []>} : vector<192x256xf32>, vector<256x128xf32>, vector<192x128xf32> -> vector<192x128xf32>
    %186 = vector.extract_strided_slice %185 {offsets = [0, 0], sizes = [96, 128], strides = [1, 1]} : vector<192x128xf32> to vector<96x128xf32>
    %187 = vector.shape_cast %186 : vector<96x128xf32> to vector<12x8x128xf32>
    %188 = vector.extract_strided_slice %185 {offsets = [96, 0], sizes = [96, 128], strides = [1, 1]} : vector<192x128xf32> to vector<96x128xf32>
    %189 = vector.shape_cast %188 : vector<96x128xf32> to vector<12x8x128xf32>
    %190 = tpu.concatenate %187, %189 in 2 : vector<12x8x128xf32>, vector<12x8x128xf32> -> vector<12x8x256xf32>
    %c0_44 = arith.constant 0 : index
    %c0_45 = arith.constant 0 : index
    %191 = vector.load %arg6[%c0_44, %c0_45] : memref<1x256xf32, #tpu.memory_space<vmem>>, vector<1x256xf32>
    %192 = vector.shape_cast %191 : vector<1x256xf32> to vector<1x1x256xf32>
    %193 = vector.broadcast %192 : vector<1x1x256xf32> to vector<12x8x256xf32>
    %194 = arith.addf %190, %193 : vector<12x8x256xf32>
    %cst_46 = arith.constant dense<0.000000e+00> : vector<8x256xf32>
    %195 = vector.multi_reduction <add>, %194, %cst_46 [0] : vector<12x8x256xf32> to vector<8x256xf32>
    %196 = vector.extract_strided_slice %195 {offsets = [0, 0], sizes = [8, 128], strides = [1, 1]} : vector<8x256xf32> to vector<8x128xf32>
    %197 = vector.extract_strided_slice %195 {offsets = [0, 128], sizes = [8, 128], strides = [1, 1]} : vector<8x256xf32> to vector<8x128xf32>
    %198 = arith.addf %196, %197 : vector<8x128xf32>
    %cst_47 = arith.constant 0.0416666679 : f32
    %199 = vector.broadcast %cst_47 : f32 to vector<8x128xf32>
    %200 = arith.mulf %198, %199 : vector<8x128xf32>
    %201 = tpu.concatenate %200, %200 in 1 : vector<8x128xf32>, vector<8x128xf32> -> vector<8x256xf32>
    %202 = vector.shape_cast %201 : vector<8x256xf32> to vector<1x8x256xf32>
    %203 = vector.broadcast %202 : vector<1x8x256xf32> to vector<12x8x256xf32>
    %204 = arith.subf %194, %203 : vector<12x8x256xf32>
    %205 = arith.mulf %204, %204 : vector<12x8x256xf32>
    %cst_48 = arith.constant dense<0.000000e+00> : vector<8x256xf32>
    %206 = vector.multi_reduction <add>, %205, %cst_48 [0] : vector<12x8x256xf32> to vector<8x256xf32>
    %207 = vector.extract_strided_slice %206 {offsets = [0, 0], sizes = [8, 128], strides = [1, 1]} : vector<8x256xf32> to vector<8x128xf32>
    %208 = vector.extract_strided_slice %206 {offsets = [0, 128], sizes = [8, 128], strides = [1, 1]} : vector<8x256xf32> to vector<8x128xf32>
    %209 = arith.addf %207, %208 : vector<8x128xf32>
    %cst_49 = arith.constant 0.0416666679 : f32
    %210 = vector.broadcast %cst_49 : f32 to vector<8x128xf32>
    %211 = arith.mulf %209, %210 : vector<8x128xf32>
    %cst_50 = arith.constant 9.99999974E-6 : f32
    %212 = vector.broadcast %cst_50 : f32 to vector<8x128xf32>
    %213 = arith.addf %211, %212 : vector<8x128xf32>
    %214 = math.rsqrt %213 : vector<8x128xf32>
    %215 = tpu.concatenate %214, %214 in 1 : vector<8x128xf32>, vector<8x128xf32> -> vector<8x256xf32>
    %216 = vector.shape_cast %215 : vector<8x256xf32> to vector<1x8x256xf32>
    %217 = vector.broadcast %216 : vector<1x8x256xf32> to vector<12x8x256xf32>
    %218 = arith.mulf %204, %217 : vector<12x8x256xf32>
    %cst_51 = arith.constant 0.000000e+00 : f32
    %219 = vector.broadcast %cst_51 : f32 to vector<12x8x256xf32>
    %220 = arith.cmpf oge, %218, %219 : vector<12x8x256xf32>
    %cst_52 = arith.constant 2.000000e-01 : f32
    %221 = vector.broadcast %cst_52 : f32 to vector<12x8x256xf32>
    %222 = arith.mulf %221, %218 : vector<12x8x256xf32>
    %223 = arith.select %220, %218, %222 : vector<12x8x256xi1>, vector<12x8x256xf32>
    %224 = tpu.concatenate %173, %223, %173 in 0 : vector<1x8x256xf32>, vector<12x8x256xf32>, vector<1x8x256xf32> -> vector<14x8x256xf32>
    %225 = vector.extract_strided_slice %224 {offsets = [0, 0, 128], sizes = [12, 8, 128], strides = [1, 1, 1]} : vector<14x8x256xf32> to vector<12x8x128xf32>
    %226 = vector.extract_strided_slice %224 {offsets = [1, 0, 0], sizes = [12, 8, 256], strides = [1, 1, 1]} : vector<14x8x256xf32> to vector<12x8x256xf32>
    %227 = vector.extract_strided_slice %224 {offsets = [2, 0, 0], sizes = [12, 8, 128], strides = [1, 1, 1]} : vector<14x8x256xf32> to vector<12x8x128xf32>
    %228 = tpu.concatenate %225, %226, %227 in 2 : vector<12x8x128xf32>, vector<12x8x256xf32>, vector<12x8x128xf32> -> vector<12x8x512xf32>
    %229 = vector.shape_cast %228 : vector<12x8x512xf32> to vector<96x512xf32>
    %c0_53 = arith.constant 0 : index
    %c0_54 = arith.constant 0 : index
    %230 = vector.load %arg7[%c0_53, %c0_54] : memref<512x256xf32, #tpu.memory_space<vmem>>, vector<512x256xf32>
    %cst_55 = arith.constant dense<0.000000e+00> : vector<96x256xf32>
    %231 = tpu.matmul %229, %230, %cst_55 {dimension_numbers = #tpu.dot_dimension_numbers<[1], [0], [0], [1], [0, 0, 1, 1], [], []>} : vector<96x512xf32>, vector<512x256xf32>, vector<96x256xf32> -> vector<96x256xf32>
    %232 = vector.shape_cast %231 : vector<96x256xf32> to vector<12x8x256xf32>
    %c0_56 = arith.constant 0 : index
    %c0_57 = arith.constant 0 : index
    %233 = vector.load %arg8[%c0_56, %c0_57] : memref<1x256xf32, #tpu.memory_space<vmem>>, vector<1x256xf32>
    %234 = vector.shape_cast %233 : vector<1x256xf32> to vector<1x1x256xf32>
    %235 = vector.broadcast %234 : vector<1x1x256xf32> to vector<12x8x256xf32>
    %236 = arith.addf %232, %235 : vector<12x8x256xf32>
    %cst_58 = arith.constant dense<0.000000e+00> : vector<8x256xf32>
    %237 = vector.multi_reduction <add>, %236, %cst_58 [0] : vector<12x8x256xf32> to vector<8x256xf32>
    %cst_59 = arith.constant 0.0833333358 : f32
    %238 = vector.broadcast %cst_59 : f32 to vector<8x256xf32>
    %239 = arith.mulf %237, %238 : vector<8x256xf32>
    %240 = vector.shape_cast %239 : vector<8x256xf32> to vector<1x8x256xf32>
    %241 = vector.broadcast %240 : vector<1x8x256xf32> to vector<12x8x256xf32>
    %242 = arith.subf %236, %241 : vector<12x8x256xf32>
    %243 = arith.mulf %242, %242 : vector<12x8x256xf32>
    %cst_60 = arith.constant dense<0.000000e+00> : vector<8x256xf32>
    %244 = vector.multi_reduction <add>, %243, %cst_60 [0] : vector<12x8x256xf32> to vector<8x256xf32>
    %cst_61 = arith.constant 0.0833333358 : f32
    %245 = vector.broadcast %cst_61 : f32 to vector<8x256xf32>
    %246 = arith.mulf %244, %245 : vector<8x256xf32>
    %cst_62 = arith.constant 9.99999974E-6 : f32
    %247 = vector.broadcast %cst_62 : f32 to vector<8x256xf32>
    %248 = arith.addf %246, %247 : vector<8x256xf32>
    %249 = math.rsqrt %248 : vector<8x256xf32>
    %250 = vector.shape_cast %249 : vector<8x256xf32> to vector<1x8x256xf32>
    %251 = vector.broadcast %250 : vector<1x8x256xf32> to vector<12x8x256xf32>
    %252 = arith.mulf %242, %251 : vector<12x8x256xf32>
    %cst_63 = arith.constant 0.000000e+00 : f32
    %253 = vector.broadcast %cst_63 : f32 to vector<12x8x256xf32>
    %254 = arith.cmpf oge, %252, %253 : vector<12x8x256xf32>
    %cst_64 = arith.constant 2.000000e-01 : f32
    %255 = vector.broadcast %cst_64 : f32 to vector<12x8x256xf32>
    %256 = arith.mulf %255, %252 : vector<12x8x256xf32>
    %257 = arith.select %254, %252, %256 : vector<12x8x256xi1>, vector<12x8x256xf32>
    %258 = vector.extract_strided_slice %257 {offsets = [0, 0, 0], sizes = [9, 8, 256], strides = [1, 1, 1]} : vector<12x8x256xf32> to vector<9x8x256xf32>
    %259 = vector.extract_strided_slice %257 {offsets = [1, 0, 0], sizes = [9, 8, 256], strides = [1, 1, 1]} : vector<12x8x256xf32> to vector<9x8x256xf32>
    %260 = vector.extract_strided_slice %257 {offsets = [2, 0, 0], sizes = [9, 8, 256], strides = [1, 1, 1]} : vector<12x8x256xf32> to vector<9x8x256xf32>
    %261 = vector.extract_strided_slice %257 {offsets = [3, 0, 0], sizes = [9, 8, 256], strides = [1, 1, 1]} : vector<12x8x256xf32> to vector<9x8x256xf32>
    %262 = tpu.concatenate %258, %259, %260, %261 in 2 : vector<9x8x256xf32>, vector<9x8x256xf32>, vector<9x8x256xf32>, vector<9x8x256xf32> -> vector<9x8x1024xf32>
    %263 = vector.shape_cast %262 : vector<9x8x1024xf32> to vector<72x1024xf32>
    %c0_65 = arith.constant 0 : index
    %c0_66 = arith.constant 0 : index
    %264 = vector.load %arg9[%c0_65, %c0_66] : memref<1024x64xf32, #tpu.memory_space<vmem>>, vector<1024x64xf32>
    %cst_67 = arith.constant dense<0.000000e+00> : vector<72x64xf32>
    %265 = tpu.matmul %263, %264, %cst_67 {dimension_numbers = #tpu.dot_dimension_numbers<[1], [0], [0], [1], [0, 0, 1, 1], [], []>} : vector<72x1024xf32>, vector<1024x64xf32>, vector<72x64xf32> -> vector<72x64xf32>
    %c0_68 = arith.constant 0 : index
    %c0_69 = arith.constant 0 : index
    %266 = vector.load %arg10[%c0_68, %c0_69] : memref<1x64xf32, #tpu.memory_space<vmem>>, vector<1x64xf32>
    %267 = vector.broadcast %266 : vector<1x64xf32> to vector<72x64xf32>
    %268 = arith.addf %265, %267 : vector<72x64xf32>
    %269 = vector.shape_cast %268 : vector<72x64xf32> to vector<9x8x64xf32>
    %c0_70 = arith.constant 0 : index
    %c0_71 = arith.constant 0 : index
    %270 = vector.load %arg11[%c0_70, %c0_71] : memref<9x64xf32, #tpu.memory_space<vmem>>, vector<9x64xf32>
    %271 = vector.shape_cast %270 : vector<9x64xf32> to vector<9x1x64xf32>
    %272 = vector.broadcast %271 : vector<9x1x64xf32> to vector<9x8x64xf32>
    %273 = arith.mulf %269, %272 : vector<9x8x64xf32>
    %cst_72 = arith.constant dense<0.000000e+00> : vector<8x64xf32>
    %274 = vector.multi_reduction <add>, %273, %cst_72 [0] : vector<9x8x64xf32> to vector<8x64xf32>
    %cst_73 = arith.constant dense<0.000000e+00> : vector<8xf32>
    %275 = vector.multi_reduction <add>, %274, %cst_73 [1] : vector<8x64xf32> to vector<8xf32>
    %276 = vector.shape_cast %275 : vector<8xf32> to vector<8x1xf32>
    %cst_74 = arith.constant dense<0.000000e+00> : vector<8x8xf32>
    %277 = vector.multi_reduction <add>, %0, %cst_74 [0] : vector<12x8x8xf32> to vector<8x8xf32>
    %cst_75 = arith.constant dense<0.000000e+00> : vector<8xf32>
    %278 = vector.multi_reduction <add>, %277, %cst_75 [1] : vector<8x8xf32> to vector<8xf32>
    %279 = vector.shape_cast %278 : vector<8xf32> to vector<8x1xf32>
    %280 = vector.extract_strided_slice %0 {offsets = [0, 0, 0], sizes = [1, 8, 1], strides = [1, 1, 1]} : vector<12x8x8xf32> to vector<1x8x1xf32>
    %281 = vector.shape_cast %280 : vector<1x8x1xf32> to vector<8x1xf32>
    %282 = vector.extract_strided_slice %0 {offsets = [11, 0, 7], sizes = [1, 8, 1], strides = [1, 1, 1]} : vector<12x8x8xf32> to vector<1x8x1xf32>
    %283 = vector.shape_cast %282 : vector<1x8x1xf32> to vector<8x1xf32>
    %284 = arith.addf %281, %283 : vector<8x1xf32>
    %cst_76 = arith.constant 5.000000e-01 : f32
    %285 = vector.broadcast %cst_76 : f32 to vector<8x1xf32>
    %286 = arith.mulf %285, %284 : vector<8x1xf32>
    %287 = arith.subf %279, %286 : vector<8x1xf32>
    %cst_77 = arith.constant 2.500000e-01 : f32
    %288 = vector.broadcast %cst_77 : f32 to vector<8x1xf32>
    %289 = arith.mulf %288, %287 : vector<8x1xf32>
    %cst_78 = arith.constant 1.000000e+01 : f32
    %290 = vector.broadcast %cst_78 : f32 to vector<8x1xf32>
    %291 = arith.divf %289, %290 : vector<8x1xf32>
    %c0_79 = arith.constant 0 : index
    %c0_80 = arith.constant 0 : index
    %292 = vector.load %arg2[%c0_79, %c0_80] : memref<8x1xf32, #tpu.memory_space<vmem>>, vector<8x1xf32>
    %293 = arith.subf %292, %291 : vector<8x1xf32>
    %294 = math.absf %293 : vector<8x1xf32>
    %295 = math.absf %292 : vector<8x1xf32>
    %296 = arith.divf %294, %295 : vector<8x1xf32>
    %c0_81 = arith.constant 0 : index
    %297 = memref.load %arg12[%c0_81] : memref<2xf32, #tpu.memory_space<smem>>
    %298 = vector.broadcast %297 : f32 to vector<8x1xf32>
    %299 = arith.mulf %296, %298 : vector<8x1xf32>
    %300 = arith.addf %276, %299 : vector<8x1xf32>
    %c1_82 = arith.constant 1 : index
    %301 = memref.load %arg12[%c1_82] : memref<2xf32, #tpu.memory_space<smem>>
    %302 = vector.broadcast %301 : f32 to vector<8x1xf32>
    %303 = arith.addf %300, %302 : vector<8x1xf32>
    %304 = arith.negf %303 : vector<8x1xf32>
    %305 = math.exp %304 : vector<8x1xf32>
    %cst_83 = arith.constant 1.000000e+00 : f32
    %306 = vector.broadcast %cst_83 : f32 to vector<8x1xf32>
    %307 = arith.addf %306, %305 : vector<8x1xf32>
    %308 = arith.divf %306, %307 : vector<8x1xf32>
    %309 = vector.shape_cast %308 : vector<8x1xf32> to vector<8x1xf32>
    %310 = vector.broadcast %309 : vector<8x1xf32> to vector<8x128xf32>
    %c0_84 = arith.constant 0 : index
    %c0_85 = arith.constant 0 : index
    %311 = vector.load %arg13[%c0_84, %c0_85] : memref<8x128xf32, #tpu.memory_space<vmem>>, vector<8x128xf32>
    tpu.vector_store %arg13[%c0_84, %c0_85], %310 {strides = array<i32>} : memref<8x128xf32, #tpu.memory_space<vmem>>, vector<8x128xf32>,
    return
  }
  func.func @transform_0(%arg0: i32) -> (i32, i32, i32) {
    %c0_i32 = arith.constant 0 : i32
    %c0_i32_0 = arith.constant 0 : i32
    %c0_i32_1 = arith.constant 0 : i32
    return %c0_i32, %arg0, %c0_i32_0 : i32, i32, i32
  }
  func.func @transform_1(%arg0: i32) -> (i32, i32) {
    %c0_i32 = arith.constant 0 : i32
    %c0_i32_0 = arith.constant 0 : i32
    return %arg0, %c0_i32 : i32, i32
  }
  func.func @transform_2(%arg0: i32) -> (i32, i32) {
    %c0_i32 = arith.constant 0 : i32
    %c0_i32_0 = arith.constant 0 : i32
    %c0_i32_1 = arith.constant 0 : i32
    return %c0_i32, %c0_i32_0 : i32, i32
  }
  func.func @transform_3(%arg0: i32) -> (i32, i32) {
    %c0_i32 = arith.constant 0 : i32
    %c0_i32_0 = arith.constant 0 : i32
    %c0_i32_1 = arith.constant 0 : i32
    return %c0_i32, %c0_i32_0 : i32, i32
  }
  func.func @transform_4(%arg0: i32) -> (i32, i32) {
    %c0_i32 = arith.constant 0 : i32
    %c0_i32_0 = arith.constant 0 : i32
    %c0_i32_1 = arith.constant 0 : i32
    return %c0_i32, %c0_i32_0 : i32, i32
  }
  func.func @transform_5(%arg0: i32) -> (i32, i32) {
    %c0_i32 = arith.constant 0 : i32
    %c0_i32_0 = arith.constant 0 : i32
    %c0_i32_1 = arith.constant 0 : i32
    return %c0_i32, %c0_i32_0 : i32, i32
  }
  func.func @transform_6(%arg0: i32) -> (i32, i32) {
    %c0_i32 = arith.constant 0 : i32
    %c0_i32_0 = arith.constant 0 : i32
    %c0_i32_1 = arith.constant 0 : i32
    return %c0_i32, %c0_i32_0 : i32, i32
  }
  func.func @transform_7(%arg0: i32) -> (i32, i32) {
    %c0_i32 = arith.constant 0 : i32
    %c0_i32_0 = arith.constant 0 : i32
    %c0_i32_1 = arith.constant 0 : i32
    return %c0_i32, %c0_i32_0 : i32, i32
  }
  func.func @transform_8(%arg0: i32) -> (i32, i32) {
    %c0_i32 = arith.constant 0 : i32
    %c0_i32_0 = arith.constant 0 : i32
    %c0_i32_1 = arith.constant 0 : i32
    return %c0_i32, %c0_i32_0 : i32, i32
  }
  func.func @transform_9(%arg0: i32) -> (i32, i32) {
    %c0_i32 = arith.constant 0 : i32
    %c0_i32_0 = arith.constant 0 : i32
    %c0_i32_1 = arith.constant 0 : i32
    return %c0_i32, %c0_i32_0 : i32, i32
  }
  func.func @transform_10(%arg0: i32) -> (i32, i32) {
    %c0_i32 = arith.constant 0 : i32
    %c0_i32_0 = arith.constant 0 : i32
    %c0_i32_1 = arith.constant 0 : i32
    return %c0_i32, %c0_i32_0 : i32, i32
  }
  func.func @transform_11(%arg0: i32) -> i32 {
    %c0_i32 = arith.constant 0 : i32
    %c0_i32_0 = arith.constant 0 : i32
    return %c0_i32 : i32
  }
  func.func @transform_12(%arg0: i32) -> (i32, i32) {
    %c0_i32 = arith.constant 0 : i32
    %c0_i32_0 = arith.constant 0 : i32
    return %arg0, %c0_i32 : i32, i32
  }
}

</mosaic_0001>

<bundles_post_ra>
// kernel: tile.18
= control target key start
LH: loop header
LB: loop body
LE: loop exit
PB: predicated region body
PF: predicated region fallthrough
CT: control target
= control target key end

     0   :  { %2 = vsyncpa [#allocation1], 0  ;;  %s44_s6 = smov [#allocation0]   ;;  %s70_s0 = inlined_call_operand.hbm [shape: f32[128], index: 0, kind: input, shape index: {}]   ;;  %s71_s1 = inlined_call_operand.vmem [shape: f32[2,128], index: 1, kind: output, shape index: {}]  }
   0x1   :  { %s9_s7 = sshll.u32 %s44_s6, 4  ;;  %s20_s10 = scalar_lea.hbm %s70_s0, 16  ;;  %s10_s7 = int_to_ptr.vmem [resolvable:$true] %s9_s7 }
   0x2   :  { %p21_p0 = scmp.ne.s32.totalorder %s70_s0, %s20_s10  ;;  %p24_p1 = scmp.lt.u32.totalorder %s20_s10, %s70_s0 }
   0x4   :  { %p26_p2 = pnand %p24_p1, %p21_p0 }
   0x6   :  { %29 = shalt.err (!%p26_p2)
}
   0x7   :  { %s30_s15 = scalar_lea.vmem %s10_s7, 16  ;;  %s34_s16 = scalar_lea.vmem %s10_s7, 32 }
   0x8   :  { %p31_p3 = scmp.ne.s32.totalorder %s10_s7, %s30_s15  ;;  %p35_p4 = scmp.lt.s32.totalorder %s10_s7, %s10_s7 }
   0x9   :  { %p36_p5 = scmp.lt.s32.totalorder %s34_s16, %s30_s15 }
   0xb   :  { %p37_p6 = por %p36_p5, %p35_p4 }
   0xd   :  { %p38_p7 = pnand %p37_p6, %p31_p3 }
   0xf   :  { %41 = shalt.err (!%p38_p7)
}
  0x10   :  { %12 = dma.hbm_to_vmem [thread:$0]  %s70_s0, 16, %s10_s7, [#allocation1]  }
  0x11   :  { %42 = dma.done.wait [#allocation1], 16  }
  0x12   :  { %43 = vsyncadd [#allocation1], 4294967280  ;;  %v16_v0 = vld [vmem:[#allocation0] ss:$0 sm:$0xff] }
  0x13   :  { %17 = vst [vmem:[%s71_s1] sm:$0x3] %v16_v0 }
  0x14   :  { %18 = vsyncpa [#allocation1], 1 }

// kernel: tile.13
= control target key start
LH: loop header
LB: loop body
LE: loop exit
PB: predicated region body
PF: predicated region fallthrough
CT: control target
= control target key end

     0   :  { %2 = vsyncpa [#allocation1], 0  ;;  %s44_s6 = smov [#allocation0]   ;;  %s70_s0 = inlined_call_operand.hbm [shape: f32[64], index: 0, kind: input, shape index: {}]   ;;  %s71_s1 = inlined_call_operand.vmem [shape: f32[4,64], index: 1, kind: output, shape index: {}]  }
   0x1   :  { %s9_s7 = sshll.u32 %s44_s6, 4  ;;  %s20_s10 = scalar_lea.hbm %s70_s0, 16  ;;  %s10_s7 = int_to_ptr.vmem [resolvable:$true] %s9_s7 }
   0x2   :  { %p21_p0 = scmp.ne.s32.totalorder %s70_s0, %s20_s10  ;;  %p24_p1 = scmp.lt.u32.totalorder %s20_s10, %s70_s0 }
   0x4   :  { %p26_p2 = pnand %p24_p1, %p21_p0 }
   0x6   :  { %29 = shalt.err (!%p26_p2)
}
   0x7   :  { %s30_s15 = scalar_lea.vmem %s10_s7, 16  ;;  %s34_s16 = scalar_lea.vmem %s10_s7, 32 }
   0x8   :  { %p31_p3 = scmp.ne.s32.totalorder %s10_s7, %s30_s15  ;;  %p35_p4 = scmp.lt.s32.totalorder %s10_s7, %s10_s7 }
   0x9   :  { %p36_p5 = scmp.lt.s32.totalorder %s34_s16, %s30_s15 }
   0xb   :  { %p37_p6 = por %p36_p5, %p35_p4 }
   0xd   :  { %p38_p7 = pnand %p37_p6, %p31_p3 }
   0xf   :  { %41 = shalt.err (!%p38_p7)
}
  0x10   :  { %12 = dma.hbm_to_vmem [thread:$0]  %s70_s0, 16, %s10_s7, [#allocation1]  }
  0x11   :  { %42 = dma.done.wait [#allocation1], 16  }
  0x12   :  { %43 = vsyncadd [#allocation1], 4294967280  ;;  %v16_v0 = vld [vmem:[#allocation0] ss:$0 sm:$0xff] }
  0x13   :  { %17 = vst [vmem:[%s71_s1] sm:$0xf] %v16_v0 }
  0x14   :  { %18 = vsyncpa [#allocation1], 1 }

// kernel: tile.14
= control target key start
LH: loop header
LB: loop body
LE: loop exit
PB: predicated region body
PF: predicated region fallthrough
CT: control target
= control target key end

     0   :  { %s6_s8 = smov 3  ;;  %vm8_vm0 = vcmask 523264   ;;  %s30_s9 = smov 64   ;;  %vm15_vm1 = vcmask 1048064   ;;  %s50_s0 = inlined_call_operand.vmem [shape: f32[4,64], index: 0, kind: input, shape index: {}]   ;;  %s51_s1 = inlined_call_operand.vmem [shape: f32[1,256], index: 1, kind: output, shape index: {}]  }
   0x1   :  { %v4_v0 = vld [vmem:[%s50_s0] sm:$0xf]  ;;  %s11_s0 = smov 3 }
   0x2   :  { %5 = vst [vmem:[#allocation1] sm:$0xf] %v4_v0 }
   0x9   :  { %v12_v1 = vld [vmem:[#allocation1 + $0x1] ss:$2 sm:%s11_s0]   ;;  %v7_v2 = vld [vmem:[#allocation1] ss:$2 sm:%s6_s8]  }
   0xa   :  { %13 = vrot.lane.b32.xlu0 %v12_v1, %s30_s9  ;;  %9 = vst.msk [vmem:[#allocation0] ss:$8 sm:$0x3] %vm8_vm0, %v7_v2  }
  0x7c   :  { %v14_v3 = vpop.permute.xlu0 %13  }
  0x7d   :  { %16 = vst.msk [vmem:[#allocation0] ss:$8 sm:$0x3] %vm15_vm1, %v14_v3  }
  0x84   :  { %v20_v4 = vld [vmem:[#allocation0] sm:$0x1]  ;;  %v24_v5 = vld [vmem:[#allocation0 + $0x8] sm:$0x1] }
  0x85   :  { %22 = vst [vmem:[%s51_s1] sm:$0x1] %v20_v4  ;;  %28 = vst [vmem:[%s51_s1 + $0x1] sm:$0x1] %v24_v5 }

// kernel: squeeze.4
= control target key start
LH: loop header
LB: loop body
LE: loop exit
PB: predicated region body
PF: predicated region fallthrough
CT: control target
= control target key end

     0   :  { %s643_s10 = smov 127   ;;  %s644_s11 = smov 123   ;;  %vm409_vm0 = vcmask 982016   ;;  %vm423_vm1 = vcmask 998400   ;;  %vm437_vm2 = vcmask 1014784   ;;  %vm450_vm3 = vcmask 1031168   ;;  %s1184_s0 = inlined_call_operand.vmem [shape: f32[576], index: 0, kind: input, shape index: {}]   ;;  %s1185_s1 = inlined_call_operand.vmem [shape: f32[64,9], index: 1, kind: output, shape index: {}]  }
   0x1   :  { %v460_v0 = vld [vmem:[%s1184_s0 + $0x4] sm:$0x1]   ;;  %v464_v1 = vld [vmem:[%s1184_s0 + $0x2] sm:$0x1]   ;;  %v462_v2 = vld [vmem:[%s1184_s0 + $0x3] sm:$0x1]  }
   0x2   :  { %7 = vrot.lane.b32.xlu0 %v460_v0, %s643_s10  ;;  %21 = vrot.lane.b32.xlu1 %v464_v1, %s644_s11  ;;  %v466_v3 = vld [vmem:[%s1184_s0 + $0x1] sm:$0x1]   ;;  %s645_s16 = smov 125   ;;  %s646_s17 = smov 121   ;;  %v33_v4 = vld [vmem:[%s1184_s0] sm:$0x1]  }
   0x3   :  { %v469_v5 = vld [vmem:[%s1184_s0 + $0x4] sm:$0x1]   ;;  %s647_s22 = smov 119   ;;  %s648_s23 = smov 118   ;;  %v471_v6 = vld [vmem:[%s1184_s0 + $0x3] sm:$0x1]  }
   0x4   :  { %v473_v7 = vld [vmem:[%s1184_s0 + $0x2] sm:$0x1]   ;;  %s649_s28 = smov 116   ;;  %s650_s29 = smov 114   ;;  %v475_v8 = vld [vmem:[%s1184_s0 + $0x1] sm:$0x1]  }
   0x5   :  { %v67_v9 = vld [vmem:[%s1184_s0] sm:$0x1]   ;;  %s651_s5 = smov 112   ;;  %s652_s6 = smov 110   ;;  %v478_v10 = vld [vmem:[%s1184_s0 + $0x4] sm:$0x1]  }
   0x6   :  { %14 = vrot.lane.b32.xlu0 %v462_v2, %s645_s16  ;;  %28 = vrot.lane.b32.xlu1 %v466_v3, %s646_s17  ;;  %v480_v11 = vld [vmem:[%s1184_s0 + $0x3] sm:$0x1]   ;;  %s653_s11 = smov 109   ;;  %s654_s12 = smov 107   ;;  %v482_v12 = vld [vmem:[%s1184_s0 + $0x2] sm:$0x1]  }
   0x7   :  { %v484_v13 = vld [vmem:[%s1184_s0 + $0x1] sm:$0x1]   ;;  %s655_s17 = smov 105   ;;  %s656_s18 = smov 103   ;;  %v101_v14 = vld [vmem:[%s1184_s0] sm:$0x1]  }
   0x8   :  { %v487_v15 = vld [vmem:[%s1184_s0 + $0x4] sm:$0x1]   ;;  %s658_s24 = smov 100   ;;  %v489_v16 = vld [vmem:[%s1184_s0 + $0x3] sm:$0x1]   ;;  %s660_s30 = smov 96  }
   0x9   :  { %v491_v17 = vld [vmem:[%s1184_s0 + $0x2] sm:$0x1]   ;;  %v493_v18 = vld [vmem:[%s1184_s0 + $0x1] sm:$0x1]   ;;  %v135_v19 = vld [vmem:[%s1184_s0] sm:$0x1]  }
   0xa   :  { %34 = vrot.lane.b32.xlu0 %v33_v4, %s647_s22  ;;  %41 = vrot.lane.b32.xlu1 %v469_v5, %s648_s23  ;;  %s657_s23 = smov 101   ;;  %s662_s7 = smov 92   ;;  %v496_v20 = vld [vmem:[%s1184_s0 + $0x4] sm:$0x1]   ;;  %v498_v21 = vld [vmem:[%s1184_s0 + $0x3] sm:$0x1]  }
   0xb   :  { %s664_s13 = smov 89   ;;  %v500_v22 = vld [vmem:[%s1184_s0 + $0x2] sm:$0x1]   ;;  %v502_v23 = vld [vmem:[%s1184_s0 + $0x1] sm:$0x1]   ;;  %s666_s19 = smov 85  }
   0xc   :  { %v169_v24 = vld [vmem:[%s1184_s0] sm:$0x1]   ;;  %v505_v25 = vld [vmem:[%s1184_s0 + $0x4] sm:$0x1]   ;;  %s668_s25 = smov 82   ;;  %s670_s2 = smov 78  }
   0xd   :  { %v507_v26 = vld [vmem:[%s1184_s0 + $0x3] sm:$0x1]   ;;  %v509_v27 = vld [vmem:[%s1184_s0 + $0x2] sm:$0x1]   ;;  %v511_v28 = vld [vmem:[%s1184_s0 + $0x1] sm:$0x1]  }
   0xe   :  { %48 = vrot.lane.b32.xlu0 %v471_v6, %s649_s28  ;;  %55 = vrot.lane.b32.xlu1 %v473_v7, %s650_s29  ;;  %s659_s29 = smov 98   ;;  %v203_v29 = vld [vmem:[%s1184_s0] sm:$0x1]   ;;  %s672_s8 = smov 74   ;;  %v514_v30 = vld [vmem:[%s1184_s0 + $0x4] sm:$0x1]  }
   0xf   :  { %v516_v31 = vld [vmem:[%s1184_s0 + $0x3] sm:$0x1]   ;;  %s674_s14 = smov 71   ;;  %v518_v32 = vld [vmem:[%s1184_s0 + $0x2] sm:$0x1]   ;;  %s675_s27 = smov 69  }
  0x10   :  { %v520_v33 = vld [vmem:[%s1184_s0 + $0x1] sm:$0x1]   ;;  %v565_v34 = vld [vmem:[%s1184_s0 + $0x3] sm:$0x1]   ;;  %v566_v35 = vld [vmem:[%s1184_s0 + $0x4] sm:$0x1]  }
  0x11   :  { %v569_v36 = vld [vmem:[%s1184_s0 + $0x2] sm:$0x1]   ;;  %v570_v37 = vld [vmem:[%s1184_s0 + $0x3] sm:$0x1]   ;;  %s676_s28 = smov 67   ;;  %v410_v38 = vsel %vm409_vm0, %v566_v35, %v565_v34  ;;  %s678_s9 = smov 6  }
  0x12   :  { %62 = vrot.lane.b32.xlu0 %v475_v8, %s651_s5  ;;  %68 = vrot.lane.b32.xlu1 %v67_v9, %s652_s6  ;;  %s661_s6 = smov 94   ;;  %v424_v39 = vsel %vm423_vm1, %v570_v37, %v569_v36  ;;  %v573_v40 = vld [vmem:[%s1184_s0 + $0x1] sm:$0x1]   ;;  %v574_v41 = vld [vmem:[%s1184_s0 + $0x2] sm:$0x1]   ;;  %s679_s10 = smov 4  }
  0x13   :  { %v447_v42 = vld [vmem:[%s1184_s0] sm:$0x1]   ;;  %v577_v43 = vld [vmem:[%s1184_s0 + $0x1] sm:$0x1]   ;;  %v438_v44 = vsel %vm437_vm2, %v574_v41, %v573_v40  ;;  %v523_v47 = vld [vmem:[%s1184_s0 + $0x3] sm:$0x1]  }
  0x14   :  { %v451_v45 = vsel %vm450_vm3, %v577_v43, %v447_v42  ;;  %v237_v46 = vld [vmem:[%s1184_s0] sm:$0x1]   ;;  %s681_s16 = smov 65   ;;  %v525_v48 = vld [vmem:[%s1184_s0 + $0x2] sm:$0x1]   ;;  %s683_s22 = smov 60  }
  0x15   :  { %v527_v49 = vld [vmem:[%s1184_s0 + $0x1] sm:$0x1]   ;;  %v264_v50 = vld [vmem:[%s1184_s0] sm:$0x1]   ;;  %v530_v51 = vld [vmem:[%s1184_s0 + $0x3] sm:$0x1]  }
  0x16   :  { %75 = vrot.lane.b32.xlu0 %v478_v10, %s653_s11  ;;  %82 = vrot.lane.b32.xlu1 %v480_v11, %s654_s12  ;;  %s663_s12 = smov 91   ;;  %s680_s11 = smov 2   ;;  %v532_v52 = vld [vmem:[%s1184_s0 + $0x2] sm:$0x1]   ;;  %v534_v53 = vld [vmem:[%s1184_s0 + $0x1] sm:$0x1]  }
  0x17   :  { %s687_s5 = smov 51   ;;  %v291_v54 = vld [vmem:[%s1184_s0] sm:$0x1]   ;;  %v537_v55 = vld [vmem:[%s1184_s0 + $0x3] sm:$0x1]   ;;  %vm3_vm4 = vcmask 72704  }
  0x18   :  { %v539_v56 = vld [vmem:[%s1184_s0 + $0x2] sm:$0x1]   ;;  %v541_v57 = vld [vmem:[%s1184_s0 + $0x1] sm:$0x1]   ;;  %v318_v58 = vld [vmem:[%s1184_s0] sm:$0x1]  }
  0x19   :  { %v544_v59 = vld [vmem:[%s1184_s0 + $0x3] sm:$0x1]   ;;  %v546_v60 = vld [vmem:[%s1184_s0 + $0x2] sm:$0x1]   ;;  %v548_v61 = vld [vmem:[%s1184_s0 + $0x1] sm:$0x1]  }
  0x1a   :  { %89 = vrot.lane.b32.xlu0 %v482_v12, %s655_s17  ;;  %96 = vrot.lane.b32.xlu1 %v484_v13, %s656_s18  ;;  %s665_s18 = smov 87   ;;  %s682_s17 = smov 62   ;;  %v345_v62 = vld [vmem:[%s1184_s0] sm:$0x1]   ;;  %v551_v63 = vld [vmem:[%s1184_s0 + $0x3] sm:$0x1]  }
  0x1b   :  { %v553_v0 = vld [vmem:[%s1184_s0 + $0x2] sm:$0x1]   ;;  %v555_v1 = vld [vmem:[%s1184_s0 + $0x1] sm:$0x1]   ;;  %v2_v2 = vld [vmem:[%s1184_s0] sm:$0x1]  }
  0x1c   :  { %4 = vst.msk [vmem:[%s1185_s1] sm:$0x1] %vm3_vm4, %v2_v2   ;;  %v372_v3 = vld [vmem:[%s1184_s0] sm:$0x1]   ;;  %v558_v4 = vld [vmem:[%s1184_s0 + $0x3] sm:$0x1]  }
  0x1d   :  { %s701_s26 = smov 20   ;;  %v560_v7 = vld [vmem:[%s1184_s0 + $0x2] sm:$0x1]   ;;  %v562_v8 = vld [vmem:[%s1184_s0 + $0x1] sm:$0x1]   ;;  %vm413_vm5 = vcmask 64512  }
  0x1e   :  { %102 = vrot.lane.b32.xlu0 %v101_v14, %s657_s23  ;;  %109 = vrot.lane.b32.xlu1 %v487_v15, %s658_s24  ;;  %s667_s24 = smov 83   ;;  %s684_s23 = smov 58   ;;  %v399_v11 = vld [vmem:[%s1184_s0] sm:$0x1]   ;;  %vm427_vm6 = vcmask 48128   ;;  %vm416_vm7 = vcmask 72768  }
  0x1f   :  { %vm430_vm8 = vcmask 72752   ;;  %vm441_vm9 = vcmask 31744   ;;  %vm454_vm10 = vcmask 15360   ;;  %vm444_vm11 = vcmask 72736  }
  0x20   :  { %vm457_vm12 = vcmask 72720  }
  0x22   :  { %116 = vrot.lane.b32.xlu0 %v489_v16, %s659_s29  ;;  %123 = vrot.lane.b32.xlu1 %v491_v17, %s660_s30  ;;  %s669_s30 = smov 80   ;;  %s686_s29 = smov 53  }
  0x26   :  { %130 = vrot.lane.b32.xlu0 %v493_v18, %s661_s6  ;;  %136 = vrot.lane.b32.xlu1 %v135_v19, %s662_s7  ;;  %s671_s7 = smov 76   ;;  %s688_s6 = smov 49  }
  0x2a   :  { %143 = vrot.lane.b32.xlu0 %v496_v20, %s663_s12  ;;  %150 = vrot.lane.b32.xlu1 %v498_v21, %s664_s13  ;;  %s673_s13 = smov 73   ;;  %s690_s12 = smov 44  }
  0x2e   :  { %157 = vrot.lane.b32.xlu0 %v500_v22, %s665_s18  ;;  %164 = vrot.lane.b32.xlu1 %v502_v23, %s666_s19  ;;  %s692_s18 = smov 40  }
  0x32   :  { %170 = vrot.lane.b32.xlu0 %v169_v24, %s667_s24  ;;  %177 = vrot.lane.b32.xlu1 %v505_v25, %s668_s25  ;;  %s694_s24 = smov 35  }
  0x36   :  { %184 = vrot.lane.b32.xlu0 %v507_v26, %s669_s30  ;;  %191 = vrot.lane.b32.xlu1 %v509_v27, %s670_s2  ;;  %s696_s30 = smov 31  }
  0x3a   :  { %198 = vrot.lane.b32.xlu0 %v511_v28, %s671_s7  ;;  %204 = vrot.lane.b32.xlu1 %v203_v29, %s672_s8  ;;  %s677_s8 = smov 8   ;;  %s698_s7 = smov 26  }
  0x3e   :  { %211 = vrot.lane.b32.xlu0 %v514_v30, %s673_s13  ;;  %218 = vrot.lane.b32.xlu1 %v516_v31, %s674_s14  ;;  %s705_s14 = smov 11  }
  0x42   :  { %225 = vrot.lane.b32.xlu0 %v518_v32, %s675_s27  ;;  %232 = vrot.lane.b32.xlu1 %v520_v33, %s676_s28  ;;  %s685_s28 = smov 56   ;;  %s702_s27 = smov 17  }
  0x46   :  { %411 = vrot.lane.b32.xlu0 %v410_v38, %s677_s8  ;;  %425 = vrot.lane.b32.xlu1 %v424_v39, %s678_s9  ;;  %s704_s8 = smov 13  }
  0x4a   :  { %439 = vrot.lane.b32.xlu0 %v438_v44, %s679_s10  ;;  %452 = vrot.lane.b32.xlu1 %v451_v45, %s680_s11  ;;  %s689_s11 = smov 47  }
  0x4e   :  { %238 = vrot.lane.b32.xlu0 %v237_v46, %s681_s16  ;;  %245 = vrot.lane.b32.xlu1 %v523_v47, %s682_s17  ;;  %s691_s17 = smov 42   ;;  %s699_s16 = smov 24  }
  0x52   :  { %252 = vrot.lane.b32.xlu0 %v525_v48, %s683_s22  ;;  %259 = vrot.lane.b32.xlu1 %v527_v49, %s684_s23  ;;  %s693_s23 = smov 38  }
  0x56   :  { %265 = vrot.lane.b32.xlu0 %v264_v50, %s685_s28  ;;  %272 = vrot.lane.b32.xlu1 %v530_v51, %s686_s29  ;;  %s695_s29 = smov 33  }
  0x5a   :  { %279 = vrot.lane.b32.xlu0 %v532_v52, %s687_s5  ;;  %286 = vrot.lane.b32.xlu1 %v534_v53, %s688_s6  ;;  %s697_s6 = smov 29  }
  0x5e   :  { %292 = vrot.lane.b32.xlu0 %v291_v54, %s689_s11  ;;  %299 = vrot.lane.b32.xlu1 %v537_v55, %s690_s12 }
  0x62   :  { %306 = vrot.lane.b32.xlu0 %v539_v56, %s691_s17  ;;  %313 = vrot.lane.b32.xlu1 %v541_v57, %s692_s18  ;;  %s700_s17 = smov 22  }
  0x66   :  { %319 = vrot.lane.b32.xlu0 %v318_v58, %s693_s23  ;;  %326 = vrot.lane.b32.xlu1 %v544_v59, %s694_s24 }
  0x6a   :  { %333 = vrot.lane.b32.xlu0 %v546_v60, %s695_s29  ;;  %340 = vrot.lane.b32.xlu1 %v548_v61, %s696_s30 }
  0x6e   :  { %346 = vrot.lane.b32.xlu0 %v345_v62, %s697_s6  ;;  %353 = vrot.lane.b32.xlu1 %v551_v63, %s698_s7  ;;  %s703_s7 = smov 15  }
  0x72   :  { %360 = vrot.lane.b32.xlu0 %v553_v0, %s699_s16  ;;  %367 = vrot.lane.b32.xlu1 %v555_v1, %s700_s17 }
  0x74   :  { %v8_v5 = vpop.permute.xlu0 %7   ;;  %v22_v6 = vpop.permute.xlu1 %21  }
  0x75   :  { %461 = vst.msk [vmem:[%s1185_s1 + $0x39] sm:$0x1] %vm3_vm4, %v8_v5   ;;  %465 = vst.msk [vmem:[%s1185_s1 + $0x1d] sm:$0x1] %vm3_vm4, %v22_v6  }
  0x76   :  { %373 = vrot.lane.b32.xlu0 %v372_v3, %s701_s26  ;;  %380 = vrot.lane.b32.xlu1 %v558_v4, %s702_s27 }
  0x78   :  { %v15_v9 = vpop.permute.xlu0 %14   ;;  %v29_v10 = vpop.permute.xlu1 %28  }
  0x79   :  { %463 = vst.msk [vmem:[%s1185_s1 + $0x2b] sm:$0x1] %vm3_vm4, %v15_v9   ;;  %467 = vst.msk [vmem:[%s1185_s1 + $0xf] sm:$0x1] %vm3_vm4, %v29_v10  }
  0x7a   :  { %387 = vrot.lane.b32.xlu0 %v560_v7, %s703_s7  ;;  %394 = vrot.lane.b32.xlu1 %v562_v8, %s704_s8 }
  0x7c   :  { %v35_v12 = vpop.permute.xlu0 %34   ;;  %v42_v13 = vpop.permute.xlu1 %41  }
  0x7d   :  { %468 = vst.msk [vmem:[%s1185_s1 + $0x1] sm:$0x1] %vm3_vm4, %v35_v12   ;;  %470 = vst.msk [vmem:[%s1185_s1 + $0x3a] sm:$0x1] %vm3_vm4, %v42_v13  }
  0x7e   :  { %400 = vrot.lane.b32.xlu0 %v399_v11, %s705_s14 }
  0x80   :  { %v49_v14 = vpop.permute.xlu0 %48   ;;  %v56_v15 = vpop.permute.xlu1 %55  }
  0x81   :  { %472 = vst.msk [vmem:[%s1185_s1 + $0x2c] sm:$0x1] %vm3_vm4, %v49_v14   ;;  %474 = vst.msk [vmem:[%s1185_s1 + $0x1e] sm:$0x1] %vm3_vm4, %v56_v15  }
  0x84   :  { %v63_v16 = vpop.permute.xlu0 %62   ;;  %v69_v17 = vpop.permute.xlu1 %68  }
  0x85   :  { %476 = vst.msk [vmem:[%s1185_s1 + $0x10] sm:$0x1] %vm3_vm4, %v63_v16   ;;  %477 = vst.msk [vmem:[%s1185_s1 + $0x2] sm:$0x1] %vm3_vm4, %v69_v17  }
  0x88   :  { %v76_v18 = vpop.permute.xlu0 %75   ;;  %v83_v19 = vpop.permute.xlu1 %82  }
  0x89   :  { %479 = vst.msk [vmem:[%s1185_s1 + $0x3b] sm:$0x1] %vm3_vm4, %v76_v18   ;;  %481 = vst.msk [vmem:[%s1185_s1 + $0x2d] sm:$0x1] %vm3_vm4, %v83_v19  }
  0x8c   :  { %v90_v20 = vpop.permute.xlu0 %89   ;;  %v97_v21 = vpop.permute.xlu1 %96  }
  0x8d   :  { %483 = vst.msk [vmem:[%s1185_s1 + $0x1f] sm:$0x1] %vm3_vm4, %v90_v20   ;;  %485 = vst.msk [vmem:[%s1185_s1 + $0x11] sm:$0x1] %vm3_vm4, %v97_v21  }
  0x90   :  { %v103_v22 = vpop.permute.xlu0 %102   ;;  %v110_v23 = vpop.permute.xlu1 %109  }
  0x91   :  { %486 = vst.msk [vmem:[%s1185_s1 + $0x3] sm:$0x1] %vm3_vm4, %v103_v22   ;;  %488 = vst.msk [vmem:[%s1185_s1 + $0x3c] sm:$0x1] %vm3_vm4, %v110_v23  }
  0x94   :  { %v117_v24 = vpop.permute.xlu0 %116   ;;  %v124_v25 = vpop.permute.xlu1 %123  }
  0x95   :  { %490 = vst.msk [vmem:[%s1185_s1 + $0x2e] sm:$0x1] %vm3_vm4, %v117_v24   ;;  %492 = vst.msk [vmem:[%s1185_s1 + $0x20] sm:$0x1] %vm3_vm4, %v124_v25  }
  0x98   :  { %v131_v26 = vpop.permute.xlu0 %130   ;;  %v137_v27 = vpop.permute.xlu1 %136  }
  0x99   :  { %494 = vst.msk [vmem:[%s1185_s1 + $0x12] sm:$0x1] %vm3_vm4, %v131_v26   ;;  %495 = vst.msk [vmem:[%s1185_s1 + $0x4] sm:$0x1] %vm3_vm4, %v137_v27  }
  0x9c   :  { %v144_v28 = vpop.permute.xlu0 %143   ;;  %v151_v29 = vpop.permute.xlu1 %150  }
  0x9d   :  { %497 = vst.msk [vmem:[%s1185_s1 + $0x3d] sm:$0x1] %vm3_vm4, %v144_v28   ;;  %499 = vst.msk [vmem:[%s1185_s1 + $0x2f] sm:$0x1] %vm3_vm4, %v151_v29  }
  0xa0   :  { %v158_v30 = vpop.permute.xlu0 %157   ;;  %v165_v31 = vpop.permute.xlu1 %164  }
  0xa1   :  { %501 = vst.msk [vmem:[%s1185_s1 + $0x21] sm:$0x1] %vm3_vm4, %v158_v30   ;;  %503 = vst.msk [vmem:[%s1185_s1 + $0x13] sm:$0x1] %vm3_vm4, %v165_v31  }
  0xa4   :  { %v171_v32 = vpop.permute.xlu0 %170   ;;  %v178_v33 = vpop.permute.xlu1 %177  }
  0xa5   :  { %504 = vst.msk [vmem:[%s1185_s1 + $0x5] sm:$0x1] %vm3_vm4, %v171_v32   ;;  %506 = vst.msk [vmem:[%s1185_s1 + $0x3e] sm:$0x1] %vm3_vm4, %v178_v33  }
  0xa8   :  { %v185_v34 = vpop.permute.xlu0 %184   ;;  %v192_v35 = vpop.permute.xlu1 %191  }
  0xa9   :  { %508 = vst.msk [vmem:[%s1185_s1 + $0x30] sm:$0x1] %vm3_vm4, %v185_v34   ;;  %510 = vst.msk [vmem:[%s1185_s1 + $0x22] sm:$0x1] %vm3_vm4, %v192_v35  }
  0xac   :  { %v199_v36 = vpop.permute.xlu0 %198   ;;  %v205_v37 = vpop.permute.xlu1 %204  }
  0xad   :  { %512 = vst.msk [vmem:[%s1185_s1 + $0x14] sm:$0x1] %vm3_vm4, %v199_v36   ;;  %513 = vst.msk [vmem:[%s1185_s1 + $0x6] sm:$0x1] %vm3_vm4, %v205_v37  }
  0xb0   :  { %v212_v38 = vpop.permute.xlu0 %211   ;;  %v219_v39 = vpop.permute.xlu1 %218  }
  0xb1   :  { %515 = vst.msk [vmem:[%s1185_s1 + $0x3f] sm:$0x1] %vm3_vm4, %v212_v38   ;;  %517 = vst.msk [vmem:[%s1185_s1 + $0x31] sm:$0x1] %vm3_vm4, %v219_v39  }
  0xb4   :  { %v226_v40 = vpop.permute.xlu0 %225   ;;  %v233_v41 = vpop.permute.xlu1 %232  }
  0xb5   :  { %519 = vst.msk [vmem:[%s1185_s1 + $0x23] sm:$0x1] %vm3_vm4, %v226_v40   ;;  %521 = vst.msk [vmem:[%s1185_s1 + $0x15] sm:$0x1] %vm3_vm4, %v233_v41  }
  0xb8   :  { %v412_v42 = vpop.permute.xlu0 %411   ;;  %v426_v43 = vpop.permute.xlu1 %425  }
  0xb9   :  { %567 = vst.msk [vmem:[%s1185_s1 + $0x38] sm:$0x1] %vm413_vm5, %v412_v42  }
  0xba   :  { %571 = vst.msk [vmem:[%s1185_s1 + $0x2a] sm:$0x1] %vm427_vm6, %v426_v43  }
  0xbb   :  { %568 = vst.msk [vmem:[%s1185_s1 + $0x38] sm:$0x1] %vm416_vm7, %v412_v42  }
  0xbc   :  { %572 = vst.msk [vmem:[%s1185_s1 + $0x2a] sm:$0x1] %vm430_vm8, %v426_v43   ;;  %v440_v44 = vpop.permute.xlu0 %439   ;;  %v453_v45 = vpop.permute.xlu1 %452  }
  0xbd   :  { %575 = vst.msk [vmem:[%s1185_s1 + $0x1c] sm:$0x1] %vm441_vm9, %v440_v44  }
  0xbe   :  { %578 = vst.msk [vmem:[%s1185_s1 + $0xe] sm:$0x1] %vm454_vm10, %v453_v45  }
  0xbf   :  { %576 = vst.msk [vmem:[%s1185_s1 + $0x1c] sm:$0x1] %vm444_vm11, %v440_v44  }
  0xc0   :  { %579 = vst.msk [vmem:[%s1185_s1 + $0xe] sm:$0x1] %vm457_vm12, %v453_v45   ;;  %v239_v46 = vpop.permute.xlu0 %238   ;;  %v246_v47 = vpop.permute.xlu1 %245  }
  0xc1   :  { %522 = vst.msk [vmem:[%s1185_s1 + $0x7] sm:$0x1] %vm3_vm4, %v239_v46   ;;  %524 = vst.msk [vmem:[%s1185_s1 + $0x32] sm:$0x1] %vm3_vm4, %v246_v47  }
  0xc4   :  { %v253_v48 = vpop.permute.xlu0 %252   ;;  %v260_v49 = vpop.permute.xlu1 %259  }
  0xc5   :  { %526 = vst.msk [vmem:[%s1185_s1 + $0x24] sm:$0x1] %vm3_vm4, %v253_v48   ;;  %528 = vst.msk [vmem:[%s1185_s1 + $0x16] sm:$0x1] %vm3_vm4, %v260_v49  }
  0xc8   :  { %v266_v50 = vpop.permute.xlu0 %265   ;;  %v273_v51 = vpop.permute.xlu1 %272  }
  0xc9   :  { %529 = vst.msk [vmem:[%s1185_s1 + $0x8] sm:$0x1] %vm3_vm4, %v266_v50   ;;  %531 = vst.msk [vmem:[%s1185_s1 + $0x33] sm:$0x1] %vm3_vm4, %v273_v51  }
  0xcc   :  { %v280_v52 = vpop.permute.xlu0 %279   ;;  %v287_v53 = vpop.permute.xlu1 %286  }
  0xcd   :  { %533 = vst.msk [vmem:[%s1185_s1 + $0x25] sm:$0x1] %vm3_vm4, %v280_v52   ;;  %535 = vst.msk [vmem:[%s1185_s1 + $0x17] sm:$0x1] %vm3_vm4, %v287_v53  }
  0xd0   :  { %v293_v54 = vpop.permute.xlu0 %292   ;;  %v300_v55 = vpop.permute.xlu1 %299  }
  0xd1   :  { %536 = vst.msk [vmem:[%s1185_s1 + $0x9] sm:$0x1] %vm3_vm4, %v293_v54   ;;  %538 = vst.msk [vmem:[%s1185_s1 + $0x34] sm:$0x1] %vm3_vm4, %v300_v55  }
  0xd4   :  { %v307_v56 = vpop.permute.xlu0 %306   ;;  %v314_v57 = vpop.permute.xlu1 %313  }
  0xd5   :  { %540 = vst.msk [vmem:[%s1185_s1 + $0x26] sm:$0x1] %vm3_vm4, %v307_v56   ;;  %542 = vst.msk [vmem:[%s1185_s1 + $0x18] sm:$0x1] %vm3_vm4, %v314_v57  }
  0xd8   :  { %v320_v58 = vpop.permute.xlu0 %319   ;;  %v327_v59 = vpop.permute.xlu1 %326  }
  0xd9   :  { %543 = vst.msk [vmem:[%s1185_s1 + $0xa] sm:$0x1] %vm3_vm4, %v320_v58   ;;  %545 = vst.msk [vmem:[%s1185_s1 + $0x35] sm:$0x1] %vm3_vm4, %v327_v59  }
  0xdc   :  { %v334_v60 = vpop.permute.xlu0 %333   ;;  %v341_v61 = vpop.permute.xlu1 %340  }
  0xdd   :  { %547 = vst.msk [vmem:[%s1185_s1 + $0x27] sm:$0x1] %vm3_vm4, %v334_v60   ;;  %549 = vst.msk [vmem:[%s1185_s1 + $0x19] sm:$0x1] %vm3_vm4, %v341_v61  }
  0xe0   :  { %v347_v62 = vpop.permute.xlu0 %346   ;;  %v354_v63 = vpop.permute.xlu1 %353  }
  0xe1   :  { %550 = vst.msk [vmem:[%s1185_s1 + $0xb] sm:$0x1] %vm3_vm4, %v347_v62   ;;  %552 = vst.msk [vmem:[%s1185_s1 + $0x36] sm:$0x1] %vm3_vm4, %v354_v63  }
  0xe4   :  { %v361_v0 = vpop.permute.xlu0 %360   ;;  %v368_v1 = vpop.permute.xlu1 %367  }
  0xe5   :  { %554 = vst.msk [vmem:[%s1185_s1 + $0x28] sm:$0x1] %vm3_vm4, %v361_v0   ;;  %556 = vst.msk [vmem:[%s1185_s1 + $0x1a] sm:$0x1] %vm3_vm4, %v368_v1  }
  0xe8   :  { %v374_v2 = vpop.permute.xlu0 %373   ;;  %v381_v3 = vpop.permute.xlu1 %380  }
  0xe9   :  { %557 = vst.msk [vmem:[%s1185_s1 + $0xc] sm:$0x1] %vm3_vm4, %v374_v2   ;;  %559 = vst.msk [vmem:[%s1185_s1 + $0x37] sm:$0x1] %vm3_vm4, %v381_v3  }
  0xec   :  { %v388_v4 = vpop.permute.xlu0 %387   ;;  %v395_v5 = vpop.permute.xlu1 %394  }
  0xed   :  { %561 = vst.msk [vmem:[%s1185_s1 + $0x29] sm:$0x1] %vm3_vm4, %v388_v4   ;;  %563 = vst.msk [vmem:[%s1185_s1 + $0x1b] sm:$0x1] %vm3_vm4, %v395_v5  }
  0xf0   :  { %v401_v6 = vpop.permute.xlu0 %400  }
  0xf1   :  { %564 = vst.msk [vmem:[%s1185_s1 + $0xd] sm:$0x1] %vm3_vm4, %v401_v6  }

// kernel: discriminator_forward.1
= control target key start
LH: loop header
LB: loop body
LE: loop exit
PB: predicated region body
PF: predicated region fallthrough
CT: control target
= control target key end

     0   :  { %17 = vsyncpa [#allocation3], 0  ;;  %s7543_s0 = inlined_call_operand.vmem [shape: f32[12,8,8], index: 0, kind: input, shape index: {}]   ;;  %s7544_s1 = inlined_call_operand.vmem [shape: f32[8,1], index: 1, kind: input, shape index: {}]   ;;  %s7545_s2 = inlined_call_operand.vmem [shape: f32[4,64], index: 2, kind: input, shape index: {}]   ;;  %s7546_s3 = inlined_call_operand.vmem [shape: f32[1,256], index: 3, kind: input, shape index: {}]   ;;  %s7547_s4 = inlined_call_operand.vmem [shape: f32[256,128], index: 4, kind: input, shape index: {}]   ;;  %s7548_s5 = inlined_call_operand.vmem [shape: f32[1,256], index: 5, kind: input, shape index: {}]   ;;  %s7549_s6 = inlined_call_operand.vmem [shape: f32[512,256], index: 6, kind: input, shape index: {}]   ;;  %s7550_s7 = inlined_call_operand.vmem [shape: f32[1,256], index: 7, kind: input, shape index: {}]   ;;  %s7551_s8 = inlined_call_operand.vmem [shape: f32[1024,64], index: 8, kind: input, shape index: {}]   ;;  %s7552_s9 = inlined_call_operand.vmem [shape: f32[1,64], index: 9, kind: input, shape index: {}]   ;;  %s7553_s10 = inlined_call_operand.vmem [shape: f32[9,64], index: 10, kind: input, shape index: {}]   ;;  %s7554_s11 = inlined_call_operand.vmem [shape: f32[2], index: 11, kind: input, shape index: {}]   ;;  %s7555_s12 = inlined_call_operand.vmem [shape: f32[8,128], index: 12, kind: output, shape index: {}]  }
   0x1   :  { %s46_s23 = sshll.u32 %s7554_s11, 4  ;;  %s47_s23 = int_to_ptr.vmem [resolvable:$true] %s46_s23 }
   0x2   :  { %s4215_s24 = scalar_lea.vmem %s47_s23, 16  ;;  %p4220_p1 = scmp.lt.s32.totalorder %s47_s23, %s47_s23 }
   0x3   :  { %p4216_p0 = scmp.ne.s32.totalorder %s47_s23, %s4215_s24  ;;  %p4221_p2 = scmp.lt.s32.totalorder %s4215_s24, %s4215_s24 }
   0x5   :  { %p4222_p3 = por %p4221_p2, %p4220_p1 }
   0x7   :  { %p4223_p4 = pnand %p4222_p3, %p4216_p0 }
   0x9   :  { %4226 = shalt.err (!%p4223_p4)
}
   0xa   :  { %s4229_s25 = smov [#allocation2]  }
   0xb   :  { %49 = dma.vmem_to_smem %s47_s23, 16, %s4229_s25, [#allocation3]  }
   0xc   :  { %4227 = dma.done.wait [#allocation3], 16  }
   0xd   :  { %4228 = vsyncadd [#allocation3], 4294967280 }
   0xe   :  { %53 = sfence }
   0xf   :  { %v54_v0 = vld [vmem:[%s7543_s0] sm:$0xff]  ;;  %vm3375_vm0 = vcmask 64512   ;;  %v55_v1 = vld [vmem:[%s7543_s0 + $0x8] sm:$0xff]  ;;  %v7556_v2 = vmov 0.0   ;;  %s4231_s29 = smov 121   ;;  %s4232_s30 = smov 1  }
  0x10   :  { %78 = vrot.lane.b32.xlu0 %v7556_v2, %s4231_s29  ;;  %115 = vrot.lane.b32.xlu1 %v54_v0, %s4232_s30  ;;  %v3376_v3 = vsel %vm3375_vm0, %v54_v0, 0.0  ;;  %v3377_v4 = vsel %vm3375_vm0, %v55_v1, 0.0  ;;  %v56_v5 = vld [vmem:[%s7543_s0 + $0x10] sm:$0xff]  ;;  %v57_v8 = vld [vmem:[%s7543_s0 + $0x18] sm:$0xff]  ;;  %v4233_v15 = vmov 2   ;;  %s4234_s23 = smov 9  }
  0x11   :  { %v3378_v6 = vadd.f32 %v3377_v4, %v3376_v3  ;;  %v3379_v7 = vsel %vm3375_vm0, %v56_v5, 0.0  ;;  %v3381_v9 = vsel %vm3375_vm0, %v57_v8, 0.0  ;;  %v58_v11 = vld [vmem:[%s7543_s0 + $0x20] sm:$0xff]  ;;  %v59_v14 = vld [vmem:[%s7543_s0 + $0x28] sm:$0xff]  ;;  %4048 = vset.pattern.permute.xlu1 %v4233_v15  ;;  %4047 = vset.pattern.permute.xlu0 %v4233_v15  ;;  %v60_v18 = vld [vmem:[%s7543_s0 + $0x30] sm:$0xff]  ;;  %vm187_vm1 = vcmask 7168  }
  0x12   :  { %v3383_v12 = vsel %vm3375_vm0, %v58_v11, 0.0  ;;  %v3385_v16 = vsel %vm3375_vm0, %v59_v14, 0.0  ;;  %v3387_v19 = vsel %vm3375_vm0, %v60_v18, 0.0  ;;  %v61_v21 = vld [vmem:[%s7543_s0 + $0x38] sm:$0xff]  ;;  %v62_v24 = vld [vmem:[%s7543_s0 + $0x40] sm:$0xff]  ;;  %v63_v28 = vld [vmem:[%s7543_s0 + $0x48] sm:$0xff] }
  0x13   :  { %v3380_v10 = vadd.f32 %v3379_v7, %v3378_v6  ;;  %v3389_v22 = vsel %vm3375_vm0, %v61_v21, 0.0  ;;  %v3391_v25 = vsel %vm3375_vm0, %v62_v24, 0.0  ;;  %v64_v29 = vld [vmem:[%s7543_s0 + $0x50] sm:$0xff]  ;;  %v65_v30 = vld [vmem:[%s7543_s0 + $0x58] sm:$0xff]  ;;  %vm200_vm2 = vcmask 72704   ;;  %s4243_s24 = smov 64  }
  0x14   :  { %117 = vrot.lane.b32.xlu1 %v55_v1, %s4232_s30  ;;  %80 = vrot.lane.b32.xlu0 %v54_v0, %s4231_s29  ;;  %v4235_v43 = vmov 3   ;;  %v7566_v44 = vmov 4   ;;  %v7564_v4 = vmov 5   ;;  %vm1157_vm3 = vcmask 523264   ;;  %s3417_s28 = sld [smem:[#allocation2]]  ;;  %s3447_s11 = sld [smem:[#allocation2 + $0x1]] }
  0x15   :  { %v3382_v13 = vadd.f32 %v3381_v9, %v3380_v10 }
  0x17   :  { %v3384_v17 = vadd.f32 %v3383_v12, %v3382_v13 }
  0x18   :  { %153 = vrot.lane.b32.xlu1 %v56_v5, %s4234_s23  ;;  %151 = vrot.lane.b32.xlu0 %v55_v1, %s4234_s23 }
  0x19   :  { %v3386_v20 = vadd.f32 %v3385_v16, %v3384_v17 }
  0x1b   :  { %v3388_v23 = vadd.f32 %v3387_v19, %v3386_v20  ;;  %v7570_v19 = vmov 7  }
  0x1c   :  { %82 = vrot.lane.b32.xlu0 %v55_v1, %s4231_s29  ;;  %119 = vrot.lane.b32.xlu1 %v56_v5, %s4232_s30 }
  0x1d   :  { %v3390_v26 = vadd.f32 %v3389_v22, %v3388_v23 }
  0x1f   :  { %v4362_v27 = vadd.f32 %v3391_v25, %v3390_v26  ;;  %v7562_v25 = vmov 8  }
  0x20   :  { %155 = vrot.lane.b32.xlu0 %v57_v8, %s4234_s23  ;;  %84 = vrot.lane.b32.xlu1 %v56_v5, %s4231_s29 }
  0x21   :  { %7618 = vst [vmem:[#allocation5_spill] sm:$0xff] %v4362_v27 }
  0x24   :  { %121 = vrot.lane.b32.xlu0 %v57_v8, %s4232_s30  ;;  %157 = vrot.lane.b32.xlu1 %v58_v11, %s4234_s23 }
  0x28   :  { %86 = vrot.lane.b32.xlu0 %v57_v8, %s4231_s29  ;;  %123 = vrot.lane.b32.xlu1 %v58_v11, %s4232_s30 }
  0x2c   :  { %159 = vrot.lane.b32.xlu0 %v59_v14, %s4234_s23  ;;  %88 = vrot.lane.b32.xlu1 %v58_v11, %s4231_s29  ;;  %v7568_v11 = vmov 6  }
  0x30   :  { %125 = vrot.lane.b32.xlu0 %v59_v14, %s4232_s30  ;;  %161 = vrot.lane.b32.xlu1 %v60_v18, %s4234_s23 }
  0x34   :  { %90 = vrot.lane.b32.xlu0 %v59_v14, %s4231_s29  ;;  %127 = vrot.lane.b32.xlu1 %v60_v18, %s4232_s30 }
  0x38   :  { %163 = vrot.lane.b32.xlu0 %v61_v21, %s4234_s23  ;;  %92 = vrot.lane.b32.xlu1 %v60_v18, %s4231_s29 }
  0x3c   :  { %129 = vrot.lane.b32.xlu0 %v61_v21, %s4232_s30  ;;  %165 = vrot.lane.b32.xlu1 %v62_v24, %s4234_s23 }
  0x40   :  { %94 = vrot.lane.b32.xlu0 %v61_v21, %s4231_s29  ;;  %131 = vrot.lane.b32.xlu1 %v62_v24, %s4232_s30 }
  0x44   :  { %167 = vrot.lane.b32.xlu0 %v63_v28, %s4234_s23  ;;  %96 = vrot.lane.b32.xlu1 %v62_v24, %s4231_s29 }
  0x48   :  { %133 = vrot.lane.b32.xlu0 %v63_v28, %s4232_s30  ;;  %169 = vrot.lane.b32.xlu1 %v64_v29, %s4234_s23 }
  0x4c   :  { %98 = vrot.lane.b32.xlu0 %v63_v28, %s4231_s29  ;;  %135 = vrot.lane.b32.xlu1 %v64_v29, %s4232_s30 }
  0x50   :  { %171 = vrot.lane.b32.xlu0 %v65_v30, %s4234_s23  ;;  %100 = vrot.lane.b32.xlu1 %v64_v29, %s4231_s29 }
  0x54   :  { %137 = vrot.lane.b32.xlu0 %v65_v30, %s4232_s30  ;;  %173 = vrot.lane.b32.xlu1 %v7556_v2, %s4234_s23 }
  0x82   :  { %v79_v31 = vpop.permute.xlu0 %78  ;;  %v116_v32 = vpop.permute.xlu1 %115 }
  0x83   :  { %v188_v35 = vsel %vm187_vm1, %v79_v31, %v116_v32 }
  0x86   :  { %v118_v33 = vpop.permute.xlu1 %117  ;;  %v81_v34 = vpop.permute.xlu0 %80 }
  0x87   :  { %v189_v36 = vsel %vm187_vm1, %v81_v34, %v118_v33 }
  0x8a   :  { %v154_v37 = vpop.permute.xlu1 %153  ;;  %v152_v38 = vpop.permute.xlu0 %151 }
  0x8b   :  { %v4405_v39 = vsel %vm200_vm2, %v189_v36, %v154_v37  ;;  %v4408_v40 = vsel %vm200_vm2, %v188_v35, %v152_v38  ;;  %v7574_v36 = vmov 9  }
  0x8c   :  { %373 = vperm.xlu1 %4048, %v4405_v39   ;;  %369 = vperm.xlu0 %4047, %v4408_v40  }
  0x8e   :  { %v83_v41 = vpop.permute.xlu0 %82  ;;  %v120_v42 = vpop.permute.xlu1 %119 }
  0x8f   :  { %v190_v45 = vsel %vm187_vm1, %v83_v41, %v120_v42 }
  0x90   :  { %4049 = vset.pattern.permute.xlu1 %v4235_v43  ;;  %4052 = vset.pattern.permute.xlu0 %v7566_v44 }
  0x91   :  { %446 = vperm.xlu1 %4049, %v4408_v40   ;;  %558 = vperm.xlu0 %4052, %v4408_v40  }
  0x92   :  { %v156_v46 = vpop.permute.xlu0 %155  ;;  %v85_v47 = vpop.permute.xlu1 %84 }
  0x93   :  { %v4418_v48 = vsel %vm200_vm2, %v190_v45, %v156_v46 }
  0x95   :  { %4050 = vset.pattern.permute.xlu1 %v4233_v15 }
  0x96   :  { %377 = vperm.xlu1 %4050, %v4418_v48   ;;  %v122_v49 = vpop.permute.xlu0 %121  ;;  %v158_v50 = vpop.permute.xlu1 %157 }
  0x97   :  { %v191_v57 = vsel %vm187_vm1, %v85_v47, %v122_v49 }
  0x98   :  { %v4434_v61 = vsel %vm200_vm2, %v191_v57, %v158_v50  ;;  %v7560_v57 = vmov 0  }
  0x9a   :  { %4051 = vset.pattern.permute.xlu1 %v4235_v43  ;;  %v87_v51 = vpop.permute.xlu0 %86  ;;  %v124_v52 = vpop.permute.xlu1 %123 }
  0x9b   :  { %454 = vperm.xlu1 %4051, %v4418_v48   ;;  %v192_v53 = vsel %vm187_vm1, %v87_v51, %v124_v52 }
  0x9e   :  { %v160_v54 = vpop.permute.xlu0 %159  ;;  %v89_v55 = vpop.permute.xlu1 %88 }
  0x9f   :  { %v4426_v56 = vsel %vm200_vm2, %v192_v53, %v160_v54  ;;  %4053 = vset.pattern.permute.xlu1 %v7566_v44  ;;  %v4592_v53 = vld [vmem:[%s7545_s2 + $0x1] ss:$0 sm:$0xff] }
  0xa0   :  { %562 = vperm.xlu1 %4053, %v4405_v39   ;;  %574 = vperm.xlu0 %4052, %v4426_v56  }
  0xa2   :  { %v126_v58 = vpop.permute.xlu0 %125  ;;  %v162_v59 = vpop.permute.xlu1 %161 }
  0xa3   :  { %v193_v60 = vsel %vm187_vm1, %v89_v55, %v126_v58  ;;  %v4599_v55 = vld [vmem:[%s7545_s2] ss:$0 sm:$0xff] }
  0xa4   :  { %4054 = vset.pattern.permute.xlu1 %v4233_v15  ;;  %v4438_v62 = vsel %vm200_vm2, %v193_v60, %v162_v59 }
  0xa5   :  { %381 = vperm.xlu1 %4054, %v4434_v61   ;;  %578 = vperm.xlu0 %4052, %v4438_v62  }
  0xa6   :  { %v4442_v63 = vpop.permute.xlu0 %90  ;;  %v4444_v0 = vpop.permute.xlu1 %127 }
  0xa7   :  { %v194_v32 = vsel %vm187_vm1, %v4442_v63, %v4444_v0 }
  0xa9   :  { %4055 = vset.pattern.permute.xlu1 %v7566_v44  ;;  %4076 = vset.pattern.permute.xlu0 %v4233_v15 }
  0xaa   :  { %566 = vperm.xlu1 %4055, %v4418_v48   ;;  %v4449_v1 = vpop.permute.xlu0 %163  ;;  %v93_v3 = vpop.permute.xlu1 %92 }
  0xab   :  { %v4514_v33 = vsel %vm200_vm2, %v194_v32, %v4449_v1 }
  0xae   :  { %4056 = vset.pattern.permute.xlu1 %v7564_v4  ;;  %v130_v5 = vpop.permute.xlu0 %129  ;;  %v166_v6 = vpop.permute.xlu1 %165 }
  0xaf   :  { %v195_v7 = vsel %vm187_vm1, %v93_v3, %v130_v5  ;;  %630 = vperm.xlu1 %4056, %v4408_v40   ;;  %v4619_v3 = vld [vmem:[%s7545_s2 + $0x2] ss:$0 sm:$0xff]  ;;  %v4624_v5 = vld [vmem:[%s7545_s2 + $0x3] ss:$0 sm:$0xff] }
  0xb0   :  { %v4455_v8 = vsel %vm200_vm2, %v195_v7, %v166_v6 }
  0xb1   :  { %397 = vperm.xlu0 %4076, %v4455_v8  }
  0xb2   :  { %v95_v9 = vpop.permute.xlu0 %94  ;;  %v132_v10 = vpop.permute.xlu1 %131 }
  0xb3   :  { %4057 = vset.pattern.permute.xlu1 %v7568_v11  ;;  %v196_v12 = vsel %vm187_vm1, %v95_v9, %v132_v10 }
  0xb4   :  { %738 = vperm.xlu1 %4057, %v4408_v40  }
  0xb5   :  { %4089 = vset.pattern.permute.xlu0 %v7566_v44 }
  0xb6   :  { %v168_v13 = vpop.permute.xlu0 %167  ;;  %v97_v14 = vpop.permute.xlu1 %96 }
  0xb7   :  { %v4463_v16 = vsel %vm200_vm2, %v196_v12, %v168_v13 }
  0xb8   :  { %742 = vperm.xlu1 %4057, %v4405_v39   ;;  %590 = vperm.xlu0 %4089, %v4463_v16  }
  0xba   :  { %v134_v17 = vpop.permute.xlu0 %133  ;;  %v170_v18 = vpop.permute.xlu1 %169 }
  0xbb   :  { %v197_v34 = vsel %vm187_vm1, %v97_v14, %v134_v17 }
  0xbc   :  { %4058 = vset.pattern.permute.xlu1 %v7570_v19  ;;  %4094 = vset.pattern.permute.xlu0 %v4233_v15  ;;  %v4521_v35 = vsel %vm200_vm2, %v197_v34, %v170_v18 }
  0xbd   :  { %814 = vperm.xlu1 %4058, %v4405_v39  }
  0xbe   :  { %v99_v20 = vpop.permute.xlu0 %98  ;;  %v136_v21 = vpop.permute.xlu1 %135 }
  0xbf   :  { %v198_v22 = vsel %vm187_vm1, %v99_v20, %v136_v21 }
  0xc1   :  { %4059 = vset.pattern.permute.xlu1 %v4233_v15 }
  0xc2   :  { %385 = vperm.xlu1 %4059, %v4426_v56   ;;  %v172_v23 = vpop.permute.xlu0 %171  ;;  %v101_v26 = vpop.permute.xlu1 %100 }
  0xc3   :  { %v4474_v24 = vsel %vm200_vm2, %v198_v22, %v172_v23  ;;  %v7558_v22 = vmov 1  }
  0xc4   :  { %409 = vperm.xlu0 %4094, %v4474_v24  }
  0xc6   :  { %4060 = vset.pattern.permute.xlu1 %v7566_v44  ;;  %v138_v28 = vpop.permute.xlu0 %137  ;;  %v174_v30 = vpop.permute.xlu1 %173 }
  0xc7   :  { %570 = vperm.xlu1 %4060, %v4434_v61   ;;  %v199_v29 = vsel %vm187_vm1, %v101_v26, %v138_v28 }
  0xc8   :  { %4095 = vset.pattern.permute.xlu0 %v7564_v4  ;;  %v4500_v31 = vsel %vm200_vm2, %v199_v29, %v174_v30 }
  0xc9   :  { %634 = vperm.xlu0 %4095, %v4405_v39  }
  0xcb   :  { %4061 = vset.pattern.permute.xlu1 %v7564_v4 }
  0xcc   :  { %638 = vperm.xlu1 %4061, %v4418_v48  }
  0xcd   :  { %650 = vperm.xlu0 %4095, %v4438_v62  }
  0xd0   :  { %4062 = vset.pattern.permute.xlu1 %v7570_v19 }
  0xd1   :  { %818 = vperm.xlu1 %4062, %v4418_v48   ;;  %662 = vperm.xlu0 %4095, %v4463_v16  }
  0xd5   :  { %4063 = vset.pattern.permute.xlu1 %v7562_v25  ;;  %4098 = vset.pattern.permute.xlu0 %v4235_v43 }
  0xd6   :  { %918 = vperm.xlu1 %4063, %v4408_v40   ;;  %450 = vperm.xlu0 %4098, %v4405_v39  }
  0xda   :  { %4064 = vset.pattern.permute.xlu1 %v4233_v15  ;;  %458 = vperm.xlu0 %4098, %v4434_v61  }
  0xdb   :  { %389 = vperm.xlu1 %4064, %v4438_v62  }
  0xde   :  { %462 = vperm.xlu0 %4098, %v4426_v56  }
  0xdf   :  { %4065 = vset.pattern.permute.xlu1 %v4235_v43 }
  0xe0   :  { %466 = vperm.xlu1 %4065, %v4438_v62  }
  0xe2   :  { %478 = vperm.xlu0 %4098, %v4463_v16  }
  0xe4   :  { %4066 = vset.pattern.permute.xlu1 %v7564_v4 }
  0xe5   :  { %642 = vperm.xlu1 %4066, %v4434_v61  }
  0xe6   :  { %490 = vperm.xlu0 %4098, %v4500_v31  }
  0xe9   :  { %4067 = vset.pattern.permute.xlu1 %v7568_v11 }
  0xea   :  { %750 = vperm.xlu1 %4067, %v4434_v61   ;;  %4103 = vset.pattern.permute.xlu0 %v7568_v11 }
  0xeb   :  { %746 = vperm.xlu0 %4103, %v4418_v48  }
  0xee   :  { %4068 = vset.pattern.permute.xlu1 %v7562_v25 }
  0xef   :  { %926 = vperm.xlu1 %4068, %v4418_v48   ;;  %762 = vperm.xlu0 %4103, %v4514_v33  }
  0xf3   :  { %4069 = vset.pattern.permute.xlu1 %v7574_v36  ;;  %774 = vperm.xlu0 %4103, %v4521_v35  }
  0xf4   :  { %990 = vperm.xlu1 %4069, %v4408_v40  }
  0xf7   :  { %778 = vperm.xlu0 %4103, %v4474_v24  }
  0xf8   :  { %4070 = vset.pattern.permute.xlu1 %v4233_v15 }
  0xf9   :  { %393 = vperm.xlu1 %4070, %v4514_v33  }
  0xfb   :  { %4110 = vset.pattern.permute.xlu0 %v7574_v36 }
  0xfc   :  { %994 = vperm.xlu0 %4110, %v4405_v39  }
  0xfd   :  { %4071 = vset.pattern.permute.xlu1 %v4235_v43 }
  0xfe   :  { %470 = vperm.xlu1 %4071, %v4514_v33  }
 0x100   :  { %1006 = vperm.xlu0 %4110, %v4426_v56  }
 0x102   :  { %4072 = vset.pattern.permute.xlu1 %v7564_v4 }
 0x103   :  { %646 = vperm.xlu1 %4072, %v4426_v56  }
 0x104   :  { %1018 = vperm.xlu0 %4110, %v4455_v8  }
 0x107   :  { %4073 = vset.pattern.permute.xlu1 %v7568_v11 }
 0x108   :  { %754 = vperm.xlu1 %4073, %v4426_v56   ;;  %1022 = vperm.xlu0 %4110, %v4463_v16  }
 0x10b   :  { %v4540_v37 = vpop.permute.xlu1 %373  ;;  %v4565_v46 = vpop.permute.xlu0 %369 }
 0x10c   :  { %4074 = vset.pattern.permute.xlu1 %v7562_v25  ;;  %4113 = vset.pattern.permute.xlu0 %v7570_v19  ;;  %7620 = vst [vmem:[#allocation7_spill] sm:$0xff] %v4565_v46  ;;  %v521_v60 = vmul.f32 %v4599_v55, %v4565_v46 }
 0x10d   :  { %930 = vperm.xlu1 %4074, %v4434_v61   ;;  %810 = vperm.xlu0 %4113, %v4408_v40  }
 0x110   :  { %v4546_v38 = vpop.permute.xlu1 %446  ;;  %v4574_v49 = vpop.permute.xlu0 %558 }
 0x111   :  { %7619 = vst [vmem:[#allocation6_spill] sm:$0xff] %v4546_v38  ;;  %4075 = vset.pattern.permute.xlu1 %v7574_v36  ;;  %822 = vperm.xlu0 %4113, %v4434_v61   ;;  %7622 = vst [vmem:[#allocation9_spill] sm:$0xff] %v4574_v49  ;;  %v533_v59 = vmul.f32 %v4592_v53, %v4546_v38  ;;  %v605_v6 = vmul.f32 %v4619_v3, %v4574_v49 }
 0x112   :  { %998 = vperm.xlu1 %4075, %v4418_v48  }
 0x113   :  { %v545_v1 = vadd.f32 %v533_v59, %v521_v60 }
 0x115   :  { %v4551_v41 = vpop.permute.xlu1 %377  ;;  %826 = vperm.xlu0 %4113, %v4426_v56   ;;  %v617_v9 = vadd.f32 %v605_v6, %v545_v1 }
 0x116   :  { %4077 = vset.pattern.permute.xlu1 %v4235_v43 }
 0x117   :  { %474 = vperm.xlu1 %4077, %v4455_v8  }
 0x119   :  { %838 = vperm.xlu0 %4113, %v4455_v8  }
 0x11a   :  { %v4557_v42 = vpop.permute.xlu1 %454 }
 0x11b   :  { %4078 = vset.pattern.permute.xlu1 %v7566_v44 }
 0x11c   :  { %582 = vperm.xlu1 %4078, %v4514_v33  }
 0x11d   :  { %854 = vperm.xlu0 %4113, %v4500_v31  }
 0x11f   :  { %v4562_v45 = vpop.permute.xlu1 %562  ;;  %v4582_v51 = vpop.permute.xlu0 %574 }
 0x120   :  { %4079 = vset.pattern.permute.xlu1 %v7568_v11  ;;  %7623 = vst [vmem:[#allocation10_spill] sm:$0xff] %v4582_v51 }
 0x121   :  { %758 = vperm.xlu1 %4079, %v4438_v62   ;;  %4116 = vset.pattern.permute.xlu0 %v7562_v25 }
 0x122   :  { %922 = vperm.xlu0 %4116, %v4405_v39  }
 0x124   :  { %v4570_v47 = vpop.permute.xlu1 %381  ;;  %v4594_v54 = vpop.permute.xlu0 %578 }
 0x125   :  { %7621 = vst [vmem:[#allocation8_spill] sm:$0xff] %v4570_v47  ;;  %4080 = vset.pattern.permute.xlu1 %v7570_v19  ;;  %v524_v1 = vmul.f32 %v4599_v55, %v4570_v47  ;;  %v7645_v47 = vmov 5  }
 0x126   :  { %830 = vperm.xlu1 %4080, %v4438_v62   ;;  %934 = vperm.xlu0 %4116, %v4426_v56  }
 0x129   :  { %v4577_v50 = vpop.permute.xlu1 %566 }
 0x12a   :  { %4081 = vset.pattern.permute.xlu1 %v7574_v36  ;;  %946 = vperm.xlu0 %4116, %v4455_v8  }
 0x12b   :  { %1002 = vperm.xlu1 %4081, %v4434_v61  }
 0x12e   :  { %v4584_v52 = vpop.permute.xlu1 %630  ;;  %962 = vperm.xlu0 %4116, %v4500_v31  }
 0x12f   :  { %7624 = vst [vmem:[#allocation11_spill] sm:$0xff] %v4584_v52  ;;  %4082 = vset.pattern.permute.xlu1 %v4233_v15  ;;  %v677_v7 = vmul.f32 %v4624_v5, %v4584_v52  ;;  %v7648_v52 = vmov 7  }
 0x130   :  { %401 = vperm.xlu1 %4082, %v4463_v16   ;;  %v4613_v0 = vpop.permute.xlu0 %397 }
 0x131   :  { %v689_v13 = vadd.f32 %v677_v7, %v617_v9 }
 0x132   :  { %4119 = vset.pattern.permute.xlu0 %v7560_v57 }
 0x133   :  { %v4602_v58 = vpop.permute.xlu1 %738  ;;  %216 = vperm.xlu0 %4119, %v4408_v40  }
 0x134   :  { %4083 = vset.pattern.permute.xlu1 %v7566_v44 }
 0x135   :  { %586 = vperm.xlu1 %4083, %v4455_v8  }
 0x137   :  { %v4611_v63 = vpop.permute.xlu1 %742  ;;  %231 = vperm.xlu0 %4119, %v4434_v61   ;;  %v4635_v12 = vpop.permute.xlu0 %590 }
 0x138   :  { %7625 = vst [vmem:[#allocation12_spill] sm:$0xff] %v4611_v63 }
 0x139   :  { %4084 = vset.pattern.permute.xlu1 %v7564_v4 }
 0x13a   :  { %654 = vperm.xlu1 %4084, %v4514_v33  }
 0x13b   :  { %246 = vperm.xlu0 %4119, %v4514_v33  }
 0x13c   :  { %v4633_v10 = vpop.permute.xlu1 %814 }
 0x13d   :  { %7626 = vst [vmem:[#allocation13_spill] sm:$0xff] %v4633_v10 }
 0x13e   :  { %4085 = vset.pattern.permute.xlu1 %v7570_v19 }
 0x13f   :  { %834 = vperm.xlu1 %4085, %v4514_v33   ;;  %1073 = vrot.lane.b32.xlu0 %v689_v13, %s4243_s24 }
 0x141   :  { %v4640_v14 = vpop.permute.xlu1 %385 }
 0x143   :  { %4086 = vset.pattern.permute.xlu1 %v7562_v25  ;;  %v4643_v17 = vpop.permute.xlu0 %409  ;;  %261 = vperm.xlu0 %4119, %v4521_v35  }
 0x144   :  { %7627 = vst [vmem:[#allocation14_spill] sm:$0xff] %v4643_v17  ;;  %938 = vperm.xlu1 %4086, %v4438_v62  }
 0x146   :  { %v4647_v18 = vpop.permute.xlu1 %570 }
 0x147   :  { %7628 = vst [vmem:[#allocation15_spill] sm:$0xff] %v4647_v18  ;;  %266 = vperm.xlu0 %4119, %v4474_v24   ;;  %v608_v13 = vmul.f32 %v4619_v3, %v4647_v18 }
 0x148   :  { %4087 = vset.pattern.permute.xlu1 %v4233_v15  ;;  %v4651_v20 = vpop.permute.xlu0 %634 }
 0x149   :  { %405 = vperm.xlu1 %4087, %v4521_v35  }
 0x14b   :  { %v4654_v21 = vpop.permute.xlu1 %638  ;;  %4128 = vset.pattern.permute.xlu0 %v7558_v22 }
 0x14c   :  { %v4657_v23 = vpop.permute.xlu0 %650  ;;  %296 = vperm.xlu0 %4128, %v4405_v39  }
 0x14d   :  { %4088 = vset.pattern.permute.xlu1 %v4235_v43 }
 0x14e   :  { %482 = vperm.xlu1 %4088, %v4521_v35  }
 0x150   :  { %v4662_v26 = vpop.permute.xlu1 %818  ;;  %v4664_v28 = vpop.permute.xlu0 %662  ;;  %308 = vperm.xlu0 %4128, %v4426_v56  }
 0x151   :  { %7629 = vst [vmem:[#allocation16_spill] sm:$0xff] %v4662_v26  ;;  %7630 = vst [vmem:[#allocation17_spill] sm:$0xff] %v4664_v28 }
 0x152   :  { %4090 = vset.pattern.permute.xlu1 %v7564_v4 }
 0x153   :  { %658 = vperm.xlu1 %4090, %v4455_v8  }
 0x154   :  { %320 = vperm.xlu0 %4128, %v4455_v8  }
 0x155   :  { %v4670_v29 = vpop.permute.xlu1 %918  ;;  %v4672_v30 = vpop.permute.xlu0 %450 }
 0x157   :  { %4091 = vset.pattern.permute.xlu1 %v7568_v11 }
 0x158   :  { %766 = vperm.xlu1 %4091, %v4455_v8  }
 0x159   :  { %v4676_v32 = vpop.permute.xlu0 %458 }
 0x15a   :  { %7631 = vst [vmem:[#allocation18_spill] sm:$0xff] %v4676_v32  ;;  %v4678_v34 = vpop.permute.xlu1 %389  ;;  %v536_v59 = vmul.f32 %v4592_v53, %v4676_v32  ;;  %v7642_v32 = vmov 4  }
 0x15c   :  { %4092 = vset.pattern.permute.xlu1 %v7562_v25  ;;  %v548_v7 = vadd.f32 %v536_v59, %v524_v1 }
 0x15d   :  { %942 = vperm.xlu1 %4092, %v4514_v33   ;;  %v4684_v60 = vpop.permute.xlu0 %462 }
 0x15e   :  { %v620_v22 = vadd.f32 %v608_v13, %v548_v7 }
 0x15f   :  { %v4688_v6 = vpop.permute.xlu1 %466 }
 0x160   :  { %7632 = vst [vmem:[#allocation19_spill] sm:$0xff] %v4688_v6 }
 0x161   :  { %4093 = vset.pattern.permute.xlu1 %v7574_v36  ;;  %v4691_v9 = vpop.permute.xlu0 %478 }
 0x162   :  { %1010 = vperm.xlu1 %4093, %v4438_v62  }
 0x164   :  { %v4696_v2 = vpop.permute.xlu1 %642 }
 0x165   :  { %7633 = vst [vmem:[#allocation20_spill] sm:$0xff] %v4696_v2  ;;  %v680_v57 = vmul.f32 %v4624_v5, %v4696_v2  ;;  %v4700_v25 = vpop.permute.xlu0 %490 }
 0x166   :  { %7634 = vst [vmem:[#allocation21_spill] sm:$0xff] %v4700_v25  ;;  %4096 = vset.pattern.permute.xlu1 %v4235_v43 }
 0x167   :  { %v692_v59 = vadd.f32 %v680_v57, %v620_v22  ;;  %486 = vperm.xlu1 %4096, %v4474_v24  }
 0x169   :  { %v4704_v1 = vpop.permute.xlu1 %750  ;;  %1079 = vrot.lane.b32.xlu0 %v692_v59, %s4243_s24 }
 0x16a   :  { %7635 = vst [vmem:[#allocation22_spill] sm:$0xff] %v4704_v1  ;;  %v4707_v4 = vpop.permute.xlu0 %746 }
 0x16b   :  { %7636 = vst [vmem:[#allocation23_spill] sm:$0xff] %v4707_v4  ;;  %4097 = vset.pattern.permute.xlu1 %v7566_v44 }
 0x16c   :  { %594 = vperm.xlu1 %4097, %v4521_v35  }
 0x16e   :  { %v4711_v7 = vpop.permute.xlu1 %926  ;;  %v4713_v13 = vpop.permute.xlu0 %762 }
 0x16f   :  { %7637 = vst [vmem:[#allocation24_spill] sm:$0xff] %v4711_v7  ;;  %7638 = vst [vmem:[#allocation25_spill] sm:$0xff] %v4713_v13  ;;  %v538_v7 = vmul.f32 %v4592_v53, %v4688_v6 }
 0x170   :  { %4099 = vset.pattern.permute.xlu1 %v7568_v11 }
 0x171   :  { %770 = vperm.xlu1 %4099, %v4463_v16  }
 0x172   :  { %v4717_v43 = vpop.permute.xlu0 %774 }
 0x173   :  { %7639 = vst [vmem:[#allocation26_spill] sm:$0xff] %v4717_v43  ;;  %v4719_v57 = vpop.permute.xlu1 %990  ;;  %v7651_v43 = vmov 8  }
 0x175   :  { %4100 = vset.pattern.permute.xlu1 %v7570_v19 }
 0x176   :  { %842 = vperm.xlu1 %4100, %v4463_v16   ;;  %v4723_v22 = vpop.permute.xlu0 %778 }
 0x177   :  { %7640 = vst [vmem:[#allocation27_spill] sm:$0xff] %v4723_v22 }
 0x178   :  { %v4725_v59 = vpop.permute.xlu1 %393 }
 0x17a   :  { %4101 = vset.pattern.permute.xlu1 %v7574_v36 }
 0x17b   :  { %1014 = vperm.xlu1 %4101, %v4514_v33   ;;  %v995_v44 = vpop.permute.xlu0 %994 }
 0x17d   :  { %v4729_v11 = vpop.permute.xlu1 %470 }
 0x17f   :  { %4102 = vset.pattern.permute.xlu1 %v4233_v15  ;;  %v1007_v27 = vpop.permute.xlu0 %1006 }
 0x180   :  { %413 = vperm.xlu1 %4102, %v4500_v31  }
 0x182   :  { %v4733_v2 = vpop.permute.xlu1 %646 }
 0x183   :  { %7641 = vst [vmem:[#allocation28_spill] sm:$0xff] %v4733_v2  ;;  %v4735_v19 = vpop.permute.xlu0 %1018 }
 0x184   :  { %4104 = vset.pattern.permute.xlu1 %v7642_v32 }
 0x185   :  { %598 = vperm.xlu1 %4104, %v4474_v24  }
 0x187   :  { %v4739_v18 = vpop.permute.xlu1 %754  ;;  %v4741_v36 = vpop.permute.xlu0 %1022 }
 0x188   :  { %7643 = vst [vmem:[#allocation29_spill] sm:$0xff] %v4739_v18  ;;  %7644 = vst [vmem:[#allocation30_spill] sm:$0xff] %v4741_v36 }
 0x189   :  { %4105 = vset.pattern.permute.xlu1 %v7645_v47 }
 0x18a   :  { %666 = vperm.xlu1 %4105, %v4521_v35  }
 0x18c   :  { %v4745_v15 = vpop.permute.xlu1 %930  ;;  %v4747_v49 = vpop.permute.xlu0 %810 }
 0x18d   :  { %7646 = vst [vmem:[#allocation31_spill] sm:$0xff] %v4745_v15  ;;  %7647 = vst [vmem:[#allocation32_spill] sm:$0xff] %v4747_v49  ;;  %v894_v15 = vmul.f32 %v4592_v53, %v4633_v10  ;;  %v526_v10 = vmul.f32 %v4599_v55, %v4678_v34 }
 0x18e   :  { %4106 = vset.pattern.permute.xlu1 %v7648_v52 }
 0x18f   :  { %846 = vperm.xlu1 %4106, %v4521_v35   ;;  %v550_v4 = vadd.f32 %v538_v7, %v526_v10 }
 0x190   :  { %v4751_v38 = vpop.permute.xlu0 %822 }
 0x191   :  { %7649 = vst [vmem:[#allocation33_spill] sm:$0xff] %v4751_v38  ;;  %v4753_v46 = vpop.permute.xlu1 %998 }
 0x192   :  { %7650 = vst [vmem:[#allocation34_spill] sm:$0xff] %v4753_v46 }
 0x193   :  { %4107 = vset.pattern.permute.xlu1 %v7651_v43 }
 0x194   :  { %950 = vperm.xlu1 %4107, %v4463_v16   ;;  %v4757_v36 = vpop.permute.xlu0 %826 }
 0x195   :  { %7652 = vst [vmem:[#allocation35_spill] sm:$0xff] %v4757_v36 }
 0x196   :  { %v4759_v25 = vpop.permute.xlu1 %474 }
 0x197   :  { %7653 = vst [vmem:[#allocation36_spill] sm:$0xff] %v4759_v25 }
 0x198   :  { %4108 = vset.pattern.permute.xlu1 %v7642_v32  ;;  %v4762_v13 = vpop.permute.xlu0 %838  ;;  %v882_v32 = vmul.f32 %v4599_v55, %v4611_v63  ;;  %v885_v63 = vmul.f32 %v4599_v55, %v4739_v18 }
 0x199   :  { %7654 = vst [vmem:[#allocation37_spill] sm:$0xff] %v4762_v13  ;;  %602 = vperm.xlu1 %4108, %v4500_v31  }
 0x19a   :  { %v906_v26 = vadd.f32 %v894_v15, %v882_v32 }
 0x19b   :  { %v4765_v22 = vpop.permute.xlu1 %582 }
 0x19c   :  { %7655 = vst [vmem:[#allocation38_spill] sm:$0xff] %v4765_v22  ;;  %v4767_v17 = vpop.permute.xlu0 %854 }
 0x19d   :  { %7656 = vst [vmem:[#allocation39_spill] sm:$0xff] %v4767_v17  ;;  %4109 = vset.pattern.permute.xlu1 %v7645_v47  ;;  %v897_v17 = vmul.f32 %v4592_v53, %v4757_v36 }
 0x19e   :  { %670 = vperm.xlu1 %4109, %v4474_v24  }
 0x19f   :  { %v909_v51 = vadd.f32 %v897_v17, %v885_v63  ;;  %v527_v17 = vmul.f32 %v4599_v55, %v4725_v59 }
 0x1a0   :  { %v4773_v46 = vpop.permute.xlu1 %758 }
 0x1a1   :  { %7657 = vst [vmem:[#allocation40_spill] sm:$0xff] %v4773_v46  ;;  %v923_v1 = vpop.permute.xlu0 %922  ;;  %v1038_v46 = vmul.f32 %v4624_v5, %v995_v44  ;;  %v1041_v44 = vmul.f32 %v4624_v5, %v1007_v27 }
 0x1a2   :  { %4111 = vset.pattern.permute.xlu1 %v7648_v52  ;;  %v966_v38 = vmul.f32 %v4619_v3, %v923_v1  ;;  %v610_v1 = vmul.f32 %v4619_v3, %v4594_v54 }
 0x1a3   :  { %850 = vperm.xlu1 %4111, %v4474_v24  }
 0x1a4   :  { %v978_v52 = vadd.f32 %v966_v38, %v906_v26  ;;  %v622_v26 = vadd.f32 %v610_v1, %v550_v4  ;;  %v7660_v4 = vmov 0  }
 0x1a5   :  { %v4789_v2 = vpop.permute.xlu1 %830  ;;  %v935_v6 = vpop.permute.xlu0 %934 }
 0x1a6   :  { %7658 = vst [vmem:[#allocation41_spill] sm:$0xff] %v4789_v2  ;;  %v1050_v36 = vadd.f32 %v1038_v46, %v978_v52  ;;  %v969_v15 = vmul.f32 %v4619_v3, %v935_v6  ;;  %v682_v46 = vmul.f32 %v4624_v5, %v4657_v23  ;;  %v611_v6 = vmul.f32 %v4619_v3, %v4765_v22 }
 0x1a7   :  { %4112 = vset.pattern.permute.xlu1 %v7651_v43 }
 0x1a8   :  { %954 = vperm.xlu1 %4112, %v4521_v35   ;;  %v981_v32 = vadd.f32 %v969_v15, %v909_v51  ;;  %1123 = vrot.lane.b32.xlu0 %v1050_v36, %s4243_s24  ;;  %v694_v27 = vadd.f32 %v682_v46, %v622_v26  ;;  %v7659_v36 = vmov 6  }
 0x1aa   :  { %v4798_v38 = vpop.permute.xlu1 %1002  ;;  %v4800_v10 = vadd.f32 %v1041_v44, %v981_v32  ;;  %v7663_v44 = vmov 9  }
 0x1ac   :  { %4114 = vset.pattern.permute.xlu1 %v7645_v47  ;;  %336 = vperm.xlu0 %4128, %v4500_v31   ;;  %v539_v47 = vmul.f32 %v4592_v53, %v4729_v11 }
 0x1ad   :  { %674 = vperm.xlu1 %4114, %v4500_v31  }
 0x1ae   :  { %v551_v7 = vadd.f32 %v539_v47, %v527_v17  ;;  %v7667_v17 = vmov 1  }
 0x1af   :  { %v4807_v63 = vpop.permute.xlu1 %401 }
 0x1b0   :  { %1083 = vrot.lane.b32.xlu0 %v694_v27, %s4243_s24  ;;  %v623_v15 = vadd.f32 %v611_v6, %v551_v7  ;;  %v540_v27 = vmul.f32 %v4592_v53, %v4759_v25  ;;  %v528_v6 = vmul.f32 %v4599_v55, %v4613_v0  ;;  %v541_v7 = vmul.f32 %v4592_v53, %v4691_v9  ;;  %v7704_v25 = vld [vmem:[#allocation8_spill] sm:$0xff] }
 0x1b1   :  { %4115 = vset.pattern.permute.xlu1 %v7659_v36  ;;  %4190 = vset.pattern.permute.xlu0 %v7660_v4  ;;  %v529_v36 = vmul.f32 %v4599_v55, %v4807_v63 }
 0x1b2   :  { %782 = vperm.xlu1 %4115, %v4500_v31  }
 0x1b4   :  { %v4815_v51 = vpop.permute.xlu1 %586 }
 0x1b5   :  { %7661 = vst [vmem:[#allocation42_spill] sm:$0xff] %v4815_v51 }
 0x1b6   :  { %4117 = vset.pattern.permute.xlu1 %v7651_v43 }
 0x1b7   :  { %958 = vperm.xlu1 %4117, %v4474_v24  }
 0x1b9   :  { %v4823_v52 = vpop.permute.xlu1 %654 }
 0x1ba   :  { %7662 = vst [vmem:[#allocation43_spill] sm:$0xff] %v4823_v52  ;;  %v683_v1 = vmul.f32 %v4624_v5, %v4823_v52 }
 0x1bb   :  { %4118 = vset.pattern.permute.xlu1 %v7663_v44 }
 0x1bc   :  { %v695_v32 = vadd.f32 %v683_v1, %v623_v15  ;;  %1026 = vperm.xlu1 %4118, %v4521_v35   ;;  %v552_v15 = vadd.f32 %v540_v27, %v528_v6  ;;  %v553_v1 = vadd.f32 %v541_v7, %v529_v36  ;;  %v947_v27 = vpop.permute.xlu0 %946  ;;  %v900_v6 = vmul.f32 %v4592_v53, %v4762_v13 }
 0x1be   :  { %v4829_v26 = vpop.permute.xlu1 %834  ;;  %1085 = vrot.lane.b32.xlu0 %v695_v32, %s4243_s24  ;;  %v613_v32 = vmul.f32 %v4619_v3, %v4635_v12 }
 0x1bf   :  { %7664 = vst [vmem:[#allocation44_spill] sm:$0xff] %v4829_v26 }
 0x1c0   :  { %1030 = vperm.xlu1 %4118, %v4474_v24   ;;  %v625_v52 = vadd.f32 %v613_v32, %v553_v1  ;;  %v1044_v1 = vmul.f32 %v4624_v5, %v4735_v19 }
 0x1c3   :  { %v4833_v43 = vpop.permute.xlu1 %938 }
 0x1c4   :  { %1034 = vperm.xlu1 %4118, %v4500_v31  }
 0x1c8   :  { %v4836_v46 = vpop.permute.xlu1 %405  ;;  %4120 = vset.pattern.permute.xlu1 %v7660_v4 }
 0x1c9   :  { %7665 = vst [vmem:[#allocation45_spill] sm:$0xff] %v4836_v46  ;;  %221 = vperm.xlu1 %4120, %v4405_v39   ;;  %v612_v39 = vmul.f32 %v4619_v3, %v4815_v51  ;;  %v685_v51 = vmul.f32 %v4624_v5, %v4664_v28 }
 0x1cb   :  { %v624_v22 = vadd.f32 %v612_v39, %v552_v15  ;;  %v697_v39 = vadd.f32 %v685_v51, %v625_v52  ;;  %v534_v51 = vmul.f32 %v4592_v53, %v4672_v30 }
 0x1cd   :  { %v4844_v47 = vpop.permute.xlu1 %482  ;;  %4121 = vset.pattern.permute.xlu1 %v7667_v17 }
 0x1ce   :  { %7666 = vst [vmem:[#allocation46_spill] sm:$0xff] %v4844_v47  ;;  %292 = vperm.xlu1 %4121, %v4408_v40  }
 0x1d2   :  { %v4854_v44 = vpop.permute.xlu1 %658  ;;  %4122 = vset.pattern.permute.xlu1 %v7660_v4 }
 0x1d3   :  { %7668 = vst [vmem:[#allocation47_spill] sm:$0xff] %v4854_v44  ;;  %v684_v40 = vmul.f32 %v4624_v5, %v4854_v44  ;;  %226 = vperm.xlu1 %4122, %v4418_v48   ;;  %v7684_v44 = vld [vmem:[#allocation34_spill] sm:$0xff] }
 0x1d5   :  { %v696_v18 = vadd.f32 %v684_v40, %v624_v22  ;;  %v972_v22 = vmul.f32 %v4619_v3, %v947_v27 }
 0x1d7   :  { %v4864_v36 = vpop.permute.xlu1 %766  ;;  %4123 = vset.pattern.permute.xlu1 %v7667_v17  ;;  %1087 = vrot.lane.b32.xlu0 %v696_v18, %s4243_s24 }
 0x1d8   :  { %7669 = vst [vmem:[#allocation48_spill] sm:$0xff] %v4864_v36  ;;  %v888_v7 = vmul.f32 %v4599_v55, %v4864_v36  ;;  %300 = vperm.xlu1 %4123, %v4418_v48  }
 0x1da   :  { %v912_v15 = vadd.f32 %v900_v6, %v888_v7  ;;  %v678_v7 = vmul.f32 %v4624_v5, %v4651_v20 }
 0x1db   :  { %1089 = vrot.lane.b32.xlu0 %v697_v39, %s4243_s24 }
 0x1dc   :  { %v984_v32 = vadd.f32 %v972_v22, %v912_v15  ;;  %v4877_v40 = vpop.permute.xlu1 %942  ;;  %304 = vperm.xlu1 %4123, %v4434_v61   ;;  %v523_v15 = vmul.f32 %v4599_v55, %v4551_v41 }
 0x1de   :  { %v4880_v18 = vadd.f32 %v1044_v1, %v984_v32  ;;  %v607_v1 = vmul.f32 %v4619_v3, %v4577_v50  ;;  %v679_v32 = vmul.f32 %v4624_v5, %v4654_v21 }
 0x1e0   :  { %4124 = vset.pattern.permute.xlu1 %v7660_v4 }
 0x1e1   :  { %v4883_v13 = vpop.permute.xlu1 %1010  ;;  %236 = vperm.xlu1 %4124, %v4426_v56   ;;  %v522_v56 = vmul.f32 %v4599_v55, %v4540_v37 }
 0x1e3   :  { %v546_v27 = vadd.f32 %v534_v51, %v522_v56  ;;  %v881_v56 = vmul.f32 %v4599_v55, %v4602_v58 }
 0x1e5   :  { %241 = vperm.xlu1 %4124, %v4438_v62  }
 0x1e6   :  { %v4887_v48 = vpop.permute.xlu1 %486 }
 0x1e7   :  { %7670 = vst [vmem:[#allocation49_spill] sm:$0xff] %v4887_v48 }
 0x1e9   :  { %4125 = vset.pattern.permute.xlu1 %v7667_v17 }
 0x1ea   :  { %312 = vperm.xlu1 %4125, %v4438_v62   ;;  %v606_v62 = vmul.f32 %v4619_v3, %v4562_v45 }
 0x1eb   :  { %v4891_v19 = vpop.permute.xlu1 %594 }
 0x1ec   :  { %7671 = vst [vmem:[#allocation50_spill] sm:$0xff] %v4891_v19 }
 0x1ee   :  { %316 = vperm.xlu1 %4125, %v4514_v33   ;;  %v618_v33 = vadd.f32 %v606_v62, %v546_v27  ;;  %v542_v27 = vmul.f32 %v4592_v53, %v4844_v47 }
 0x1f0   :  { %v4894_v61 = vpop.permute.xlu1 %770  ;;  %v690_v39 = vadd.f32 %v678_v7, %v618_v33 }
 0x1f1   :  { %7672 = vst [vmem:[#allocation51_spill] sm:$0xff] %v4894_v61 }
 0x1f2   :  { %4126 = vset.pattern.permute.xlu1 %v7660_v4 }
 0x1f3   :  { %251 = vperm.xlu1 %4126, %v4455_v8   ;;  %v535_v8 = vmul.f32 %v4592_v53, %v4557_v42 }
 0x1f5   :  { %v4902_v52 = vpop.permute.xlu1 %842 }
 0x1f6   :  { %7673 = vst [vmem:[#allocation52_spill] sm:$0xff] %v4902_v52 }
 0x1f7   :  { %256 = vperm.xlu1 %4126, %v4463_v16  }
 0x1fa   :  { %v4907_v6 = vpop.permute.xlu1 %1014 }
 0x1fb   :  { %4127 = vset.pattern.permute.xlu1 %v7667_v17  ;;  %v547_v17 = vadd.f32 %v535_v8, %v523_v15  ;;  %v530_v8 = vmul.f32 %v4599_v55, %v4836_v46  ;;  %v965_v15 = vmul.f32 %v4619_v3, %v4670_v29  ;;  %v525_v29 = vmul.f32 %v4599_v55, %v4640_v14 }
 0x1fc   :  { %324 = vperm.xlu1 %4127, %v4463_v16   ;;  %v893_v16 = vmul.f32 %v4592_v53, %v4747_v49  ;;  %v1039_v49 = vmul.f32 %v4624_v5, %v7684_v44 }
 0x1fd   :  { %v619_v51 = vadd.f32 %v607_v1, %v547_v17  ;;  %v554_v1 = vadd.f32 %v542_v27, %v530_v8 }
 0x1fe   :  { %v905_v7 = vadd.f32 %v893_v16, %v881_v56  ;;  %v1037_v16 = vmul.f32 %v4624_v5, %v4719_v57  ;;  %v7678_v57 = vld [vmem:[#allocation23_spill] sm:$0xff] }
 0x1ff   :  { %v4915_v22 = vpop.permute.xlu1 %413  ;;  %v691_v33 = vadd.f32 %v679_v32, %v619_v51  ;;  %v537_v32 = vmul.f32 %v4592_v53, %v4684_v60 }
 0x200   :  { %7674 = vst [vmem:[#allocation53_spill] sm:$0xff] %v4915_v22  ;;  %1075 = vrot.lane.b32.xlu1 %v690_v39, %s4243_s24  ;;  %v614_v39 = vmul.f32 %v4619_v3, %v4891_v19  ;;  %v977_v28 = vadd.f32 %v965_v15, %v905_v7  ;;  %v7677_v7 = vld [vmem:[#allocation10_spill] sm:$0xff]  ;;  %v7680_v15 = vld [vmem:[#allocation33_spill] sm:$0xff] }
 0x201   :  { %v609_v8 = vmul.f32 %v4619_v3, %v7677_v7 }
 0x202   :  { %v626_v36 = vadd.f32 %v614_v39, %v554_v1  ;;  %v1049_v27 = vadd.f32 %v1037_v16, %v977_v28  ;;  %v896_v1 = vmul.f32 %v4592_v53, %v7680_v15 }
 0x204   :  { %v599_v62 = vpop.permute.xlu1 %598  ;;  %328 = vperm.xlu1 %4127, %v4521_v35  }
 0x205   :  { %v615_v44 = vmul.f32 %v4619_v3, %v599_v62 }
 0x208   :  { %1077 = vrot.lane.b32.xlu1 %v691_v33, %s4243_s24  ;;  %v549_v33 = vadd.f32 %v537_v32, %v525_v29  ;;  %v7682_v32 = vld [vmem:[#allocation24_spill] sm:$0xff]  ;;  %v7683_v29 = vld [vmem:[#allocation22_spill] sm:$0xff] }
 0x209   :  { %v4938_v17 = vpop.permute.xlu1 %666  ;;  %v967_v16 = vmul.f32 %v4619_v3, %v7682_v32  ;;  %v7685_v32 = vld [vmem:[#allocation31_spill] sm:$0xff] }
 0x20a   :  { %7675 = vst [vmem:[#allocation54_spill] sm:$0xff] %v4938_v17  ;;  %v686_v35 = vmul.f32 %v4624_v5, %v4938_v17 }
 0x20c   :  { %v698_v51 = vadd.f32 %v686_v35, %v626_v36  ;;  %332 = vperm.xlu1 %4127, %v4474_v24   ;;  %v883_v36 = vmul.f32 %v4599_v55, %v7678_v57  ;;  %v7679_v24 = vld [vmem:[#allocation28_spill] sm:$0xff] }
 0x20d   :  { %v681_v39 = vmul.f32 %v4624_v5, %v7679_v24  ;;  %v543_v24 = vmul.f32 %v4592_v53, %v4887_v48  ;;  %v7687_v48 = vld [vmem:[#allocation27_spill] sm:$0xff] }
 0x20e   :  { %v4949_v56 = vpop.permute.xlu1 %846  ;;  %1091 = vrot.lane.b32.xlu0 %v698_v51, %s4243_s24  ;;  %v7681_v51 = vld [vmem:[#allocation16_spill] sm:$0xff] }
 0x20f   :  { %7676 = vst [vmem:[#allocation55_spill] sm:$0xff] %v4949_v56  ;;  %v895_v28 = vmul.f32 %v4592_v53, %v7681_v51 }
 0x210   :  { %1121 = vrot.lane.b32.xlu1 %v1049_v27, %s4243_s24  ;;  %v884_v27 = vmul.f32 %v4599_v55, %v7683_v29 }
 0x211   :  { %4129 = vset.pattern.permute.xlu1 %v7660_v4  ;;  %v621_v4 = vadd.f32 %v609_v8, %v549_v33  ;;  %v907_v19 = vadd.f32 %v895_v28, %v883_v36  ;;  %v968_v33 = vmul.f32 %v4619_v3, %v7685_v32  ;;  %v7686_v8 = vld [vmem:[#allocation14_spill] sm:$0xff]  ;;  %v898_v28 = vmul.f32 %v4592_v53, %v4789_v2  ;;  %v7700_v2 = vld [vmem:[#allocation11_spill] sm:$0xff] }
 0x212   :  { %v908_v47 = vadd.f32 %v896_v1, %v884_v27  ;;  %v531_v36 = vmul.f32 %v4599_v55, %v7686_v8  ;;  %v711_v27 = vmul.f32 %v4599_v55, %v599_v62  ;;  %v899_v62 = vmul.f32 %v4592_v53, %v4829_v26 }
 0x213   :  { %v951_v35 = vpop.permute.xlu1 %950  ;;  %v693_v17 = vadd.f32 %v681_v39, %v621_v4  ;;  %v979_v15 = vadd.f32 %v967_v16, %v907_v19 }
 0x214   :  { %271 = vperm.xlu1 %4129, %v4500_v31   ;;  %v1040_v31 = vmul.f32 %v4624_v5, %v4798_v38  ;;  %v980_v1 = vadd.f32 %v968_v33, %v908_v47  ;;  %v555_v19 = vadd.f32 %v543_v24, %v531_v36  ;;  %v970_v24 = vmul.f32 %v4619_v3, %v4833_v43 }
 0x215   :  { %v1051_v39 = vadd.f32 %v1039_v49, %v979_v15  ;;  %v795_v49 = vmul.f32 %v4619_v3, %v7687_v48  ;;  %v7688_v15 = vld [vmem:[#allocation40_spill] sm:$0xff] }
 0x216   :  { %v627_v4 = vadd.f32 %v615_v44, %v555_v19  ;;  %v886_v47 = vmul.f32 %v4599_v55, %v7688_v15  ;;  %v713_v15 = vmul.f32 %v4592_v53, %v7700_v2 }
 0x218   :  { %v603_v57 = vpop.permute.xlu1 %602  ;;  %1081 = vrot.lane.b32.xlu1 %v693_v17, %s4243_s24  ;;  %v1052_v17 = vadd.f32 %v1040_v31, %v980_v1  ;;  %v910_v31 = vadd.f32 %v898_v28, %v886_v47 }
 0x21c   :  { %1125 = vrot.lane.b32.xlu1 %v1051_v39, %s4243_s24  ;;  %v1042_v39 = vmul.f32 %v4624_v5, %v4883_v13 }
 0x21d   :  { %v671_v16 = vpop.permute.xlu1 %670 }
 0x21e   :  { %v687_v38 = vmul.f32 %v4624_v5, %v671_v16  ;;  %v723_v32 = vmul.f32 %v4592_v53, %v671_v16  ;;  %v7689_v16 = vld [vmem:[#allocation25_spill] sm:$0xff] }
 0x21f   :  { %v887_v43 = vmul.f32 %v4599_v55, %v7689_v16 }
 0x220   :  { %v699_v33 = vadd.f32 %v687_v38, %v627_v4  ;;  %v735_v36 = vadd.f32 %v723_v32, %v711_v27  ;;  %1127 = vrot.lane.b32.xlu1 %v1052_v17, %s4243_s24  ;;  %v982_v4 = vadd.f32 %v970_v24, %v910_v31  ;;  %v971_v17 = vmul.f32 %v4619_v3, %v4877_v40  ;;  %v7691_v40 = vld [vmem:[#allocation21_spill] sm:$0xff] }
 0x221   :  { %v911_v27 = vadd.f32 %v899_v62, %v887_v43  ;;  %v1043_v38 = vmul.f32 %v4624_v5, %v4907_v6  ;;  %v532_v32 = vmul.f32 %v4599_v55, %v4915_v22  ;;  %v901_v24 = vmul.f32 %v4592_v53, %v4902_v52  ;;  %v7692_v52 = vld [vmem:[#allocation30_spill] sm:$0xff] }
 0x222   :  { %v851_v44 = vpop.permute.xlu1 %850  ;;  %v807_v1 = vadd.f32 %v795_v49, %v735_v36  ;;  %1093 = vrot.lane.b32.xlu0 %v699_v33, %s4243_s24  ;;  %v1054_v13 = vadd.f32 %v1042_v39, %v982_v4  ;;  %v616_v33 = vmul.f32 %v4619_v3, %v603_v57  ;;  %v889_v36 = vmul.f32 %v4599_v55, %v4894_v61  ;;  %v7699_v61 = vld [vmem:[#allocation6_spill] sm:$0xff] }
 0x223   :  { %v867_v19 = vmul.f32 %v4624_v5, %v851_v44  ;;  %v983_v47 = vadd.f32 %v971_v17, %v911_v27  ;;  %v973_v6 = vmul.f32 %v4619_v3, %v951_v35  ;;  %v712_v43 = vmul.f32 %v4599_v55, %v603_v57  ;;  %v7693_v57 = vld [vmem:[#allocation39_spill] sm:$0xff] }
 0x224   :  { %1129 = vrot.lane.b32.xlu1 %v4800_v10, %s4243_s24  ;;  %v544_v10 = vmul.f32 %v4592_v53, %v7691_v40  ;;  %v913_v39 = vadd.f32 %v901_v24, %v889_v36  ;;  %v868_v24 = vmul.f32 %v4624_v5, %v7693_v57  ;;  %v497_v26 = vmul.f32 %v4624_v5, %v7699_v61 }
 0x225   :  { %v5006_v28 = vadd.f32 %v867_v19, %v807_v1  ;;  %v1055_v31 = vadd.f32 %v1043_v38, %v983_v47  ;;  %v1045_v38 = vmul.f32 %v4624_v5, %v7692_v52  ;;  %v5103_v22 = vmul.f32 %v4624_v5, %v4557_v42 }
 0x226   :  { %v556_v62 = vadd.f32 %v544_v10, %v532_v32  ;;  %v985_v27 = vadd.f32 %v973_v6, %v913_v39  ;;  %v5111_v61 = vmul.f32 %v4599_v55, %v7677_v7  ;;  %v703_v42 = vmul.f32 %v4599_v55, %v4577_v50 }
 0x227   :  { %7690 = vst [vmem:[#allocation10_spill] sm:$0xff] %v5006_v28  ;;  %v955_v49 = vpop.permute.xlu1 %954  ;;  %v715_v50 = vmul.f32 %v4592_v53, %v4654_v21 }
 0x228   :  { %1131 = vrot.lane.b32.xlu1 %v1054_v13, %s4243_s24  ;;  %v628_v19 = vadd.f32 %v616_v33, %v556_v62  ;;  %v1057_v32 = vadd.f32 %v1045_v38, %v985_v27  ;;  %v902_v33 = vmul.f32 %v4592_v53, %v4949_v56  ;;  %v974_v6 = vmul.f32 %v4619_v3, %v955_v49  ;;  %v963_v49 = vpop.permute.xlu0 %962  ;;  %v7698_v56 = vld [vmem:[#allocation7_spill] sm:$0xff] }
 0x229   :  { %v903_v62 = vmul.f32 %v4592_v53, %v851_v44  ;;  %v904_v27 = vmul.f32 %v4592_v53, %v7693_v57  ;;  %7703 = vst [vmem:[#allocation31_spill] sm:$0xff] %v5111_v61 }
 0x22c   :  { %v675_v1 = vpop.permute.xlu1 %674  ;;  %1133 = vrot.lane.b32.xlu1 %v1055_v31, %s4243_s24  ;;  %v7695_v31 = vld [vmem:[#allocation26_spill] sm:$0xff]  ;;  %v217_v57 = vpop.permute.xlu0 %216 }
 0x22d   :  { %v688_v4 = vmul.f32 %v4624_v5, %v675_v1  ;;  %v724_v17 = vmul.f32 %v4592_v53, %v675_v1  ;;  %v891_v1 = vmul.f32 %v4599_v55, %v7687_v48  ;;  %v976_v48 = vmul.f32 %v4619_v3, %v963_v49 }
 0x22e   :  { %v278_v7 = vmul.f32 %v4599_v55, %v217_v57 }
 0x22f   :  { %v700_v13 = vadd.f32 %v688_v4, %v628_v19  ;;  %v736_v28 = vadd.f32 %v724_v17, %v712_v43 }
 0x230   :  { %1135 = vrot.lane.b32.xlu1 %v4880_v18, %s4243_s24  ;;  %v890_v18 = vmul.f32 %v4599_v55, %v7695_v31  ;;  %v420_v31 = vmul.f32 %v4619_v3, %v7698_v56  ;;  %v785_v56 = vmul.f32 %v4619_v3, %v4602_v58  ;;  %v706_v58 = vmul.f32 %v4599_v55, %v4594_v54 }
 0x231   :  { %v783_v35 = vpop.permute.xlu1 %782  ;;  %1095 = vrot.lane.b32.xlu0 %v700_v13, %s4243_s24  ;;  %v915_v13 = vadd.f32 %v903_v62, %v891_v1  ;;  %v5055_v62 = vpop.permute.xlu0 %231 }
 0x232   :  { %v796_v47 = vmul.f32 %v4619_v3, %v783_v35  ;;  %v914_v39 = vadd.f32 %v902_v33, %v890_v18  ;;  %v892_v43 = vmul.f32 %v4599_v55, %v783_v35 }
 0x234   :  { %v808_v10 = vadd.f32 %v796_v47, %v736_v28  ;;  %1137 = vrot.lane.b32.xlu1 %v1057_v32, %s4243_s24  ;;  %v986_v19 = vadd.f32 %v974_v6, %v914_v39  ;;  %v916_v44 = vadd.f32 %v904_v27, %v892_v43 }
 0x235   :  { %v5057_v1 = vpop.permute.xlu0 %246 }
 0x236   :  { %v5036_v36 = vadd.f32 %v868_v24, %v808_v10  ;;  %v959_v52 = vpop.permute.xlu1 %958  ;;  %v988_v33 = vadd.f32 %v976_v48, %v916_v44 }
 0x237   :  { %v975_v4 = vmul.f32 %v4619_v3, %v959_v52 }
 0x238   :  { %7694 = vst [vmem:[#allocation16_spill] sm:$0xff] %v5036_v36  ;;  %v421_v36 = vmul.f32 %v4619_v3, %v4540_v37 }
 0x239   :  { %v987_v47 = vadd.f32 %v975_v4, %v915_v13 }
 0x23b   :  { %v1027_v28 = vpop.permute.xlu1 %1026 }
 0x23c   :  { %v1046_v17 = vmul.f32 %v4624_v5, %v1027_v28 }
 0x23e   :  { %v1058_v38 = vadd.f32 %v1046_v17, %v986_v19  ;;  %v5059_v19 = vpop.permute.xlu0 %1073 }
 0x23f   :  { %v1031_v32 = vpop.permute.xlu1 %1030 }
 0x240   :  { %v1047_v24 = vmul.f32 %v4624_v5, %v1031_v32  ;;  %1139 = vrot.lane.b32.xlu1 %v1058_v38, %s4243_s24 }
 0x242   :  { %v1059_v35 = vadd.f32 %v1047_v24, %v987_v47  ;;  %v5061_v17 = vpop.permute.xlu0 %261 }
 0x243   :  { %v1035_v10 = vpop.permute.xlu1 %1034 }
 0x244   :  { %v1048_v52 = vmul.f32 %v4624_v5, %v1035_v10  ;;  %1141 = vrot.lane.b32.xlu0 %v1059_v35, %s4243_s24  ;;  %v714_v10 = vmul.f32 %v4592_v53, %v4651_v20  ;;  %v7701_v20 = vld [vmem:[#allocation9_spill] sm:$0xff] }
 0x245   :  { %v701_v16 = vmul.f32 %v4599_v55, %v7701_v20 }
 0x246   :  { %v1060_v18 = vadd.f32 %v1048_v52, %v988_v33  ;;  %v5065_v13 = vpop.permute.xlu0 %266  ;;  %v702_v52 = vmul.f32 %v4599_v55, %v4562_v45  ;;  %v422_v45 = vmul.f32 %v4619_v3, %v4551_v41  ;;  %v423_v41 = vmul.f32 %v4619_v3, %v7704_v25 }
 0x247   :  { %7696 = vst [vmem:[#allocation24_spill] sm:$0xff] %v5065_v13  ;;  %v5128_v25 = vmul.f32 %v4619_v3, %v4613_v0  ;;  %v5143_v0 = vmul.f32 %v4599_v55, %v4635_v12  ;;  %v281_v12 = vmul.f32 %v4599_v55, %v5055_v62 }
 0x248   :  { %v222_v6 = vpop.permute.xlu1 %221  ;;  %1143 = vrot.lane.b32.xlu1 %v1060_v18, %s4243_s24  ;;  %v726_v37 = vadd.f32 %v714_v10, %v702_v52  ;;  %v7705_v10 = vld [vmem:[#allocation12_spill] sm:$0xff] }
 0x249   :  { %v279_v2 = vmul.f32 %v4599_v55, %v222_v6  ;;  %v786_v52 = vmul.f32 %v4619_v3, %v7705_v10  ;;  %v718_v10 = vmul.f32 %v4592_v53, %v4657_v23  ;;  %v424_v23 = vmul.f32 %v4619_v3, %v4640_v14 }
 0x24a   :  { %v297_v49 = vpop.permute.xlu0 %296  ;;  %v5164_v14 = vmul.f32 %v4624_v5, %v7681_v51  ;;  %v5178_v51 = vmul.f32 %v4624_v5, %v4684_v60 }
 0x24b   :  { %v344_v6 = vmul.f32 %v4592_v53, %v297_v49  ;;  %v798_v61 = vadd.f32 %v786_v52, %v726_v37  ;;  %v1184_v37 = vlaneseq }
 0x24d   :  { %v293_v39 = vpop.permute.xlu1 %292 }
 0x24e   :  { %v5073_v47 = vpop.permute.xlu0 %308  ;;  %v343_v20 = vmul.f32 %v4592_v53, %v293_v39 }
 0x250   :  { %v355_v57 = vadd.f32 %v343_v20, %v278_v7  ;;  %v5154_v20 = vadd.f32 %v715_v50, %v703_v42  ;;  %v5156_v7 = vadd.f32 %v718_v10, %v706_v58  ;;  %v425_v58 = vmul.f32 %v4619_v3, %v4678_v34  ;;  %v7709_v50 = vld [vmem:[#allocation19_spill] sm:$0xff]  ;;  %v7710_v10 = vld [vmem:[#allocation20_spill] sm:$0xff] }
 0x251   :  { %v5186_v34 = vmul.f32 %v4624_v5, %v4691_v9  ;;  %v284_v9 = vmul.f32 %v4599_v55, %v5057_v1  ;;  %v5214_v1 = vmul.f32 %v4624_v5, %v7691_v40 }
 0x252   :  { %v227_v28 = vpop.permute.xlu1 %226  ;;  %v5077_v48 = vpop.permute.xlu0 %320 }
 0x253   :  { %v280_v49 = vmul.f32 %v4599_v55, %v227_v28 }
 0x256   :  { %v5083_v33 = vpop.permute.xlu0 %1079 }
 0x257   :  { %v301_v43 = vpop.permute.xlu1 %300  ;;  %7697 = vst [vmem:[#allocation22_spill] sm:$0xff] %v5083_v33  ;;  %v725_v33 = vadd.f32 %v713_v15, %v701_v16  ;;  %v356_v16 = vadd.f32 %v344_v6, %v279_v2 }
 0x258   :  { %v345_v39 = vmul.f32 %v4592_v53, %v301_v43  ;;  %v7706_v43 = vld [vmem:[#allocation13_spill] sm:$0xff] }
 0x259   :  { %v5136_v15 = vadd.f32 %v785_v56, %v725_v33  ;;  %v858_v13 = vmul.f32 %v4624_v5, %v7706_v43  ;;  %v5150_v33 = vmul.f32 %v4619_v3, %v7686_v8  ;;  %v7707_v56 = vld [vmem:[#allocation15_spill] sm:$0xff]  ;;  %v498_v8 = vmul.f32 %v4624_v5, %v4672_v30 }
 0x25a   :  { %v5105_v46 = vpop.permute.xlu0 %1123  ;;  %v704_v28 = vmul.f32 %v4599_v55, %v7707_v56  ;;  %v357_v2 = vadd.f32 %v345_v39, %v280_v49  ;;  %v433_v6 = vadd.f32 %v421_v36, %v356_v16  ;;  %v432_v43 = vadd.f32 %v420_v31, %v355_v57  ;;  %v7708_v56 = vld [vmem:[#allocation18_spill] sm:$0xff] }
 0x25b   :  { %v305_v4 = vpop.permute.xlu1 %304  ;;  %7702 = vst [vmem:[#allocation34_spill] sm:$0xff] %v5105_v46  ;;  %v500_v42 = vmul.f32 %v4624_v5, %v7708_v56  ;;  %v5172_v39 = vshrl.u32 %v1184_v37, 7  ;;  %v502_v30 = vmul.f32 %v4624_v5, %v7709_v50  ;;  %v716_v16 = vmul.f32 %v4592_v53, %v7710_v10 }
 0x25c   :  { %v346_v21 = vmul.f32 %v4592_v53, %v305_v4  ;;  %v5160_v4 = vadd.f32 %v858_v13, %v798_v61  ;;  %v434_v36 = vadd.f32 %v422_v45, %v357_v2  ;;  %v509_v49 = vadd.f32 %v497_v26, %v432_v43  ;;  %v5206_v26 = vld [vmem:[%s7546_s3] sm:$0x3] }
 0x25d   :  { %v5193_v60 = vsub.s32 0, %v5172_v39  ;;  %v510_v37 = vadd.f32 %v498_v8, %v433_v6  ;;  %v728_v40 = vadd.f32 %v716_v16, %v704_v28  ;;  %v428_v16 = vmul.f32 %v4619_v3, %v4807_v63  ;;  %v5279_v63 = vld [vmem:[%s7545_s2 + $0x2] ss:$0 sm:$0xff] }
 0x25e   :  { %v5134_v54 = vpop.permute.xlu0 %336  ;;  %v358_v13 = vadd.f32 %v346_v21, %v281_v12  ;;  %v347_v21 = vmul.f32 %v4592_v53, %v5073_v47  ;;  %v511_v8 = vadd.f32 %v5103_v22, %v434_v36  ;;  %v350_v47 = vmul.f32 %v4592_v53, %v5077_v48 }
 0x25f   :  { %v5220_v43 = vrot.slane %v5206_v26, %v5193_v60 }
 0x260   :  { %v5063_v27 = vpop.permute.xlu1 %236  ;;  %v435_v2 = vadd.f32 %v423_v41, %v358_v13  ;;  %v426_v13 = vmul.f32 %v4619_v3, %v4725_v59 }
 0x261   :  { %v282_v57 = vmul.f32 %v4599_v55, %v5063_v27 }
 0x262   :  { %v5174_v62 = vpop.permute.xlu0 %1083  ;;  %v512_v48 = vadd.f32 %v500_v42, %v435_v2  ;;  %v7712_v2 = vld [vmem:[#allocation22_spill] sm:$0xff] }
 0x263   :  { %v359_v6 = vadd.f32 %v347_v21, %v282_v57 }
 0x264   :  { %v5067_v38 = vpop.permute.xlu1 %241 }
 0x265   :  { %v283_v45 = vmul.f32 %v4599_v55, %v5067_v38 }
 0x266   :  { %v1086_v41 = vpop.permute.xlu0 %1085 }
 0x269   :  { %v5069_v32 = vpop.permute.xlu1 %312 }
 0x26a   :  { %v348_v31 = vmul.f32 %v4592_v53, %v5069_v32  ;;  %v1088_v28 = vpop.permute.xlu0 %1087 }
 0x26c   :  { %v360_v12 = vadd.f32 %v348_v31, %v283_v45 }
 0x26d   :  { %v5071_v44 = vpop.permute.xlu1 %316 }
 0x26e   :  { %v349_v32 = vmul.f32 %v4592_v53, %v5071_v44  ;;  %v437_v31 = vadd.f32 %v425_v58, %v360_v12  ;;  %v5248_v58 = vld [vmem:[%s7545_s2] ss:$0 sm:$0xff] }
 0x270   :  { %v361_v56 = vadd.f32 %v349_v32, %v284_v9 }
 0x272   :  { %v5075_v24 = vpop.permute.xlu1 %251 }
 0x273   :  { %v285_v38 = vmul.f32 %v4599_v55, %v5075_v24 }
 0x275   :  { %v362_v10 = vadd.f32 %v350_v47, %v285_v38 }
 0x276   :  { %v5079_v35 = vpop.permute.xlu1 %256 }
 0x277   :  { %v439_v9 = vadd.f32 %v5128_v25, %v362_v10 }
 0x27b   :  { %v5087_v18 = vpop.permute.xlu1 %324 }
 0x27c   :  { %v351_v24 = vmul.f32 %v4592_v53, %v5087_v18  ;;  %v286_v18 = vmul.f32 %v4599_v55, %v5079_v35  ;;  %v287_v55 = vmul.f32 %v5248_v58, %v5061_v17 }
 0x27e   :  { %v363_v35 = vadd.f32 %v351_v24, %v286_v18  ;;  %v7715_v24 = vld [vmem:[#allocation23_spill] sm:$0xff] }
 0x27f   :  { %v1076_v46 = vpop.permute.xlu1 %1075 }
 0x280   :  { %v1159_v44 = vsel %vm1157_vm3, %v510_v37, %v1076_v46  ;;  %v1158_v46 = vsel %vm1157_vm3, %v509_v49, %v5059_v19  ;;  %v788_v19 = vmul.f32 %v4619_v3, %v7683_v29  ;;  %v5255_v29 = vld [vmem:[%s7545_s2 + $0x1] ss:$0 sm:$0xff]  ;;  %v7711_v49 = vld [vmem:[#allocation24_spill] sm:$0xff]  ;;  %v514_v37 = vadd.f32 %v502_v30, %v437_v31 }
 0x281   :  { %v5230_v50 = vadd.f32 %v5220_v43, %v1159_v44  ;;  %v5240_v59 = vadd.f32 %v5220_v43, %v1158_v46  ;;  %v288_v45 = vmul.f32 %v5248_v58, %v7711_v49  ;;  %v7713_v3 = vld [vmem:[#allocation36_spill] sm:$0xff]  ;;  %v7714_v30 = vld [vmem:[#allocation45_spill] sm:$0xff]  ;;  %v787_v46 = vmul.f32 %v5279_v63, %v7715_v24  ;;  %v7724_v24 = vld [vmem:[#allocation35_spill] sm:$0xff] }
 0x282   :  { %v429_v25 = vmul.f32 %v5279_v63, %v7714_v30  ;;  %v7718_v49 = vld [vmem:[#allocation29_spill] sm:$0xff] }
 0x283   :  { %v329_v52 = vpop.permute.xlu1 %328  ;;  %v1218_v17 = vadd.f32 %v5230_v50, %v5240_v59 }
 0x284   :  { %v352_v57 = vmul.f32 %v4592_v53, %v329_v52  ;;  %v438_v53 = vadd.f32 %v426_v13, %v361_v56  ;;  %v800_v56 = vadd.f32 %v788_v19, %v728_v40  ;;  %v1090_v13 = vpop.permute.xlu0 %1089  ;;  %v7717_v19 = vld [vmem:[#allocation46_spill] sm:$0xff] }
 0x286   :  { %v364_v21 = vadd.f32 %v352_v57, %v287_v55  ;;  %v1163_v57 = vsel %vm1157_vm3, %v514_v37, %v5174_v62  ;;  %v799_v62 = vadd.f32 %v787_v46, %v5154_v20  ;;  %v7721_v20 = vld [vmem:[#allocation31_spill] sm:$0xff] }
 0x287   :  { %v1078_v61 = vpop.permute.xlu1 %1077 }
 0x288   :  { %v1160_v22 = vsel %vm1157_vm3, %v511_v8, %v1078_v61  ;;  %v436_v61 = vadd.f32 %v424_v23, %v359_v6  ;;  %v503_v23 = vmul.f32 %v4624_v5, %v4729_v11  ;;  %v5272_v11 = vld [vmem:[%s7545_s2 + $0x3] ss:$0 sm:$0xff]  ;;  %v440_v8 = vadd.f32 %v428_v16, %v363_v35 }
 0x289   :  { %v5243_v42 = vadd.f32 %v5220_v43, %v1160_v22  ;;  %v504_v5 = vmul.f32 %v5272_v11, %v7713_v3  ;;  %v354_v22 = vmul.f32 %v5255_v29, %v5134_v54  ;;  %v441_v18 = vadd.f32 %v429_v25, %v364_v21  ;;  %v7719_v21 = vld [vmem:[#allocation49_spill] sm:$0xff] }
 0x28a   :  { %v513_v38 = vadd.f32 %v5178_v51, %v436_v61  ;;  %v515_v44 = vadd.f32 %v503_v23, %v438_v53  ;;  %v7716_v61 = vld [vmem:[#allocation28_spill] sm:$0xff]  ;;  %v506_v55 = vmul.f32 %v5272_v11, %v7717_v19  ;;  %v861_v46 = vmul.f32 %v5272_v11, %v7724_v24 }
 0x28b   :  { %v333_v27 = vpop.permute.xlu1 %332  ;;  %v1219_v12 = vadd.f32 %v1218_v17, %v5243_v42  ;;  %v516_v10 = vadd.f32 %v504_v5, %v439_v9  ;;  %v717_v40 = vmul.f32 %v5255_v29, %v7716_v61  ;;  %v1092_v17 = vpop.permute.xlu0 %1091  ;;  %v7722_v5 = vld [vmem:[#allocation32_spill] sm:$0xff] }
 0x28c   :  { %v353_v52 = vmul.f32 %v5255_v29, %v333_v27  ;;  %v1161_v27 = vsel %vm1157_vm3, %v512_v48, %v7712_v2  ;;  %v1164_v35 = vsel %vm1157_vm3, %v515_v44, %v1086_v41  ;;  %v507_v41 = vmul.f32 %v5272_v11, %v7719_v21  ;;  %v7720_v2 = vld [vmem:[#allocation53_spill] sm:$0xff] }
 0x28d   :  { %v5291_v31 = vadd.f32 %v5220_v43, %v1161_v27  ;;  %v518_v27 = vadd.f32 %v506_v55, %v441_v18  ;;  %v729_v3 = vadd.f32 %v717_v40, %v7721_v20  ;;  %v857_v30 = vmul.f32 %v5272_v11, %v7722_v5  ;;  %v7726_v40 = vld [vmem:[#allocation43_spill] sm:$0xff]  ;;  %v7730_v20 = vld [vmem:[#allocation41_spill] sm:$0xff] }
 0x28e   :  { %v365_v47 = vadd.f32 %v353_v52, %v288_v45  ;;  %v517_v52 = vadd.f32 %v5186_v34, %v440_v8  ;;  %v789_v45 = vmul.f32 %v5279_v63, %v7718_v49  ;;  %v431_v34 = vmul.f32 %v5279_v63, %v7720_v2 }
 0x28f   :  { %v5232_v36 = vpop.permute.xlu1 %1121  ;;  %v1220_v53 = vadd.f32 %v1219_v12, %v5291_v31  ;;  %v5323_v25 = vadd.f32 %v5220_v43, %v1164_v35  ;;  %v1167_v19 = vsel %vm1157_vm3, %v518_v27, %v1092_v17  ;;  %v5343_v55 = vsub.s32 1, %v5172_v39  ;;  %v7728_v17 = vld [vmem:[#allocation40_spill] sm:$0xff] }
 0x290   :  { %v442_v23 = vadd.f32 %v5150_v33, %v365_v47  ;;  %v1165_v33 = vsel %vm1157_vm3, %v516_v10, %v1088_v28  ;;  %v1166_v8 = vsel %vm1157_vm3, %v517_v52, %v1090_v13  ;;  %v871_v28 = vadd.f32 %v5164_v14, %v799_v62 }
 0x291   :  { %v801_v61 = vadd.f32 %v789_v45, %v729_v3  ;;  %v719_v13 = vmul.f32 %v5255_v29, %v7726_v40  ;;  %v869_v14 = vadd.f32 %v857_v30, %v5136_v15  ;;  %v790_v15 = vmul.f32 %v5279_v63, %v7728_v17  ;;  %v7734_v40 = vld [vmem:[#allocation44_spill] sm:$0xff] }
 0x292   :  { %v5356_v21 = vadd.f32 %v5220_v43, %v1167_v19  ;;  %v862_v3 = vmul.f32 %v5272_v11, %v7730_v20  ;;  %v5368_v5 = vrot.slane %v5206_v26, %v5343_v55 }
 0x293   :  { %v272_v32 = vpop.permute.xlu1 %271  ;;  %v873_v45 = vadd.f32 %v861_v46, %v801_v61  ;;  %v1170_v27 = vsel %vm1157_vm3, %v869_v14, %v5232_v36  ;;  %v802_v26 = vadd.f32 %v790_v15, %v5156_v7  ;;  %v7735_v14 = vld [vmem:[#allocation17_spill] sm:$0xff] }
 0x294   :  { %v289_v6 = vmul.f32 %v5248_v58, %v272_v32  ;;  %v5311_v32 = vadd.f32 %v5220_v43, %v1163_v57  ;;  %v5384_v46 = vadd.f32 %v5368_v5, %v1170_v27 }
 0x296   :  { %v366_v16 = vadd.f32 %v354_v22, %v289_v6  ;;  %v519_v6 = vadd.f32 %v507_v41, %v442_v23  ;;  %v5333_v22 = vadd.f32 %v5220_v43, %v1165_v33  ;;  %v7727_v23 = vld [vmem:[#allocation38_spill] sm:$0xff] }
 0x297   :  { %v1082_v48 = vpop.permute.xlu1 %1081 }
 0x298   :  { %v1162_v51 = vsel %vm1157_vm3, %v513_v38, %v1082_v48  ;;  %v7723_v38 = vld [vmem:[#allocation33_spill] sm:$0xff]  ;;  %v443_v47 = vadd.f32 %v431_v34, %v366_v16  ;;  %v1094_v48 = vpop.permute.xlu0 %1093  ;;  %v707_v16 = vmul.f32 %v5248_v58, %v7727_v23 }
 0x299   :  { %v5301_v54 = vadd.f32 %v5220_v43, %v1162_v51  ;;  %v860_v44 = vmul.f32 %v5272_v11, %v7723_v38  ;;  %v7725_v51 = vld [vmem:[#allocation25_spill] sm:$0xff]  ;;  %v1168_v62 = vsel %vm1157_vm3, %v519_v6, %v1094_v48  ;;  %v7731_v38 = vld [vmem:[#allocation42_spill] sm:$0xff] }
 0x29a   :  { %v791_v57 = vmul.f32 %v5279_v63, %v7725_v51  ;;  %v520_v49 = vadd.f32 %v5214_v1, %v443_v47  ;;  %v731_v34 = vadd.f32 %v719_v13, %v707_v16  ;;  %v5371_v30 = vadd.f32 %v5220_v43, %v1168_v62  ;;  %v7733_v47 = vld [vmem:[#allocation34_spill] sm:$0xff] }
 0x29b   :  { %v1221_v37 = vadd.f32 %v1220_v53, %v5301_v54  ;;  %v1126_v9 = vpop.permute.xlu1 %1125  ;;  %v5346_v53 = vadd.f32 %v5220_v43, %v1166_v8  ;;  %v872_v52 = vadd.f32 %v860_v44, %v800_v56  ;;  %v7729_v56 = vld [vmem:[#allocation47_spill] sm:$0xff]  ;;  %v708_v44 = vmul.f32 %v5248_v58, %v7731_v38  ;;  %v7732_v8 = vld [vmem:[#allocation48_spill] sm:$0xff] }
 0x29c   :  { %v720_v33 = vmul.f32 %v5255_v29, %v7729_v56  ;;  %v792_v36 = vmul.f32 %v5279_v63, %v7732_v8  ;;  %v1171_v6 = vsel %vm1157_vm3, %v5160_v4, %v7733_v47  ;;  %v1172_v24 = vsel %vm1157_vm3, %v871_v28, %v1126_v9  ;;  %v7739_v56 = vld [vmem:[#allocation51_spill] sm:$0xff] }
 0x29d   :  { %v1222_v12 = vadd.f32 %v1221_v37, %v5311_v32  ;;  %v803_v61 = vadd.f32 %v791_v57, %v731_v34  ;;  %v863_v13 = vmul.f32 %v5272_v11, %v7734_v40  ;;  %v721_v9 = vmul.f32 %v5255_v29, %v7735_v14  ;;  %v7736_v57 = vld [vmem:[#allocation54_spill] sm:$0xff] }
 0x29e   :  { %v732_v19 = vadd.f32 %v720_v33, %v708_v44  ;;  %v5396_v7 = vadd.f32 %v5368_v5, %v1171_v6  ;;  %v5399_v28 = vadd.f32 %v5368_v5, %v1172_v24  ;;  %v722_v16 = vmul.f32 %v5255_v29, %v7736_v57 }
 0x29f   :  { %v1223_v10 = vadd.f32 %v1222_v12, %v5323_v25  ;;  %v1128_v18 = vpop.permute.xlu1 %1127  ;;  %v793_v29 = vmul.f32 %v5279_v63, %v7739_v56 }
 0x2a0   :  { %v1173_v4 = vsel %vm1157_vm3, %v872_v52, %v1128_v18  ;;  %v804_v23 = vadd.f32 %v792_v36, %v732_v19  ;;  %v1229_v52 = vadd.f32 %v5396_v7, %v5384_v46  ;;  %v7741_v36 = vld [vmem:[#allocation26_spill] sm:$0xff] }
 0x2a1   :  { %v1224_v35 = vadd.f32 %v1223_v10, %v5333_v22  ;;  %v1201_v17 = vadd.f32 %v5368_v5, %v1173_v4  ;;  %v794_v47 = vmul.f32 %v5279_v63, %v7741_v36 }
 0x2a2   :  { %v1230_v33 = vadd.f32 %v1229_v52, %v5399_v28 }
 0x2a3   :  { %v1130_v37 = vpop.permute.xlu1 %1129  ;;  %v1225_v41 = vadd.f32 %v1224_v35, %v5346_v53  ;;  %v1096_v2 = vpop.permute.xlu0 %1095  ;;  %v874_v35 = vadd.f32 %v862_v3, %v802_v26 }
 0x2a4   :  { %v1169_v1 = vsel %vm1157_vm3, %v520_v49, %v1096_v2  ;;  %v1174_v62 = vsel %vm1157_vm3, %v873_v45, %v1130_v37  ;;  %v7737_v49 = vld [vmem:[#allocation37_spill] sm:$0xff]  ;;  %v7738_v2 = vld [vmem:[#allocation50_spill] sm:$0xff]  ;;  %v733_v37 = vadd.f32 %v721_v9, %v5143_v0  ;;  %v1231_v44 = vadd.f32 %v1230_v33, %v1201_v17 }
 0x2a5   :  { %v1226_v12 = vadd.f32 %v1225_v41, %v5356_v21  ;;  %v5388_v10 = vadd.f32 %v5220_v43, %v1169_v1  ;;  %v864_v18 = vmul.f32 %v5272_v11, %v7737_v49  ;;  %v875_v41 = vadd.f32 %v863_v13, %v803_v61  ;;  %v7740_v1 = vld [vmem:[#allocation52_spill] sm:$0xff]  ;;  %v7742_v61 = vld [vmem:[#allocation55_spill] sm:$0xff] }
 0x2a6   :  { %v710_v34 = vmul.f32 %v5248_v58, %v7738_v2  ;;  %v1203_v27 = vadd.f32 %v5368_v5, %v1174_v62  ;;  %v865_v20 = vmul.f32 %v5272_v11, %v7740_v1  ;;  %v805_v6 = vadd.f32 %v793_v29, %v733_v37  ;;  %v7743_v62 = vld [vmem:[#allocation10_spill] sm:$0xff] }
 0x2a7   :  { %v1227_v48 = vadd.f32 %v1226_v12, %v5371_v30  ;;  %v1132_v51 = vpop.permute.xlu1 %1131  ;;  %v876_v38 = vadd.f32 %v864_v18, %v804_v23  ;;  %v866_v40 = vmul.f32 %v5272_v11, %v7742_v61 }
 0x2a8   :  { %v1175_v45 = vsel %vm1157_vm3, %v874_v35, %v1132_v51  ;;  %v734_v3 = vadd.f32 %v722_v16, %v710_v34  ;;  %v1232_v24 = vadd.f32 %v1231_v44, %v1203_v27  ;;  %v7744_v34 = vld [vmem:[#allocation16_spill] sm:$0xff] }
 0x2a9   :  { %v1228_v43 = vadd.f32 %v1227_v48, %v5388_v10  ;;  %v1205_v58 = vadd.f32 %v5368_v5, %v1175_v45  ;;  %v877_v48 = vadd.f32 %v865_v20, %v805_v6 }
 0x2aa   :  { %v806_v51 = vadd.f32 %v794_v47, %v734_v3 }
 0x2ab   :  { %v1134_v15 = vpop.permute.xlu1 %1133  ;;  %1241 = vrot.lane.b32.xlu0 %v1228_v43, %s4243_s24  ;;  %v1233_v13 = vadd.f32 %v1232_v24, %v1205_v58 }
 0x2ac   :  { %v1176_v12 = vsel %vm1157_vm3, %v875_v41, %v1134_v15  ;;  %v878_v35 = vadd.f32 %v866_v40, %v806_v51 }
 0x2ad   :  { %v1207_v26 = vadd.f32 %v5368_v5, %v1176_v12 }
 0x2af   :  { %v1136_v8 = vpop.permute.xlu1 %1135  ;;  %v1234_v9 = vadd.f32 %v1233_v13, %v1207_v26 }
 0x2b0   :  { %v1177_v0 = vsel %vm1157_vm3, %v876_v38, %v1136_v8 }
 0x2b1   :  { %v1209_v19 = vadd.f32 %v5368_v5, %v1177_v0 }
 0x2b3   :  { %v1138_v4 = vpop.permute.xlu1 %1137  ;;  %v1235_v57 = vadd.f32 %v1234_v9, %v1209_v19 }
 0x2b4   :  { %v1178_v14 = vsel %vm1157_vm3, %v877_v48, %v1138_v4 }
 0x2b5   :  { %v1211_v63 = vadd.f32 %v5368_v5, %v1178_v14 }
 0x2b6   :  { %v1142_v23 = vpop.permute.xlu0 %1141 }
 0x2b7   :  { %v1140_v16 = vpop.permute.xlu1 %1139  ;;  %v1180_v49 = vsel %vm1157_vm3, %v7743_v62, %v1142_v23  ;;  %v1236_v52 = vadd.f32 %v1235_v57, %v1211_v63 }
 0x2b8   :  { %v1179_v18 = vsel %vm1157_vm3, %v878_v35, %v1140_v16  ;;  %v1215_v15 = vadd.f32 %v5368_v5, %v1180_v49 }
 0x2b9   :  { %v1213_v11 = vadd.f32 %v5368_v5, %v1179_v18 }
 0x2bb   :  { %v1237_v41 = vadd.f32 %v1236_v52, %v1213_v11  ;;  %v1144_v2 = vpop.permute.xlu1 %1143 }
 0x2bc   :  { %v1181_v56 = vsel %vm1157_vm3, %v7744_v34, %v1144_v2 }
 0x2bd   :  { %v1217_v29 = vadd.f32 %v5368_v5, %v1181_v56  ;;  %v1238_v45 = vadd.f32 %v1237_v41, %v1215_v15 }
 0x2bf   :  { %v1239_v37 = vadd.f32 %v1238_v45, %v1217_v29 }
 0x2c1   :  { %1247 = vrot.lane.b32.xlu1 %v1239_v37, %s4243_s24 }
 0x31d   :  { %v1242_v33 = vpop.permute.xlu0 %1241 }
 0x31e   :  { %v1244_v1 = vadd.f32 %v1242_v33, %v1228_v43 }
 0x320   :  { %v1245_v20 = vadd.f32 %v1244_v1, %v1239_v37 }
 0x333   :  { %v1248_v3 = vpop.permute.xlu1 %1247 }
 0x334   :  { %v1250_v12 = vadd.f32 %v1248_v3, %v1245_v20 }
 0x336   :  { %v1251_v38 = vmul.f32 0.020833334, %v1250_v12 }
 0x338   :  { %1253 = vrot.lane.b32.xlu0 %v1251_v38, %s4243_s24 }
 0x3aa   :  { %v1254_v44 = vpop.permute.xlu0 %1253 }
 0x3ab   :  { %v5443_v8 = vsel %vm1157_vm3, %v1251_v38, %v1254_v44 }
 0x3ac   :  { %v5447_v36 = vsub.f32 %v5384_v46, %v5443_v8  ;;  %v5451_v5 = vsub.f32 %v5396_v7, %v5443_v8  ;;  %v5455_v43 = vsub.f32 %v5399_v28, %v5443_v8  ;;  %v5462_v0 = vsub.f32 %v1201_v17, %v5443_v8 }
 0x3ad   :  { %v5465_v46 = vsub.f32 %v1203_v27, %v5443_v8  ;;  %v5471_v28 = vsub.f32 %v5240_v59, %v5443_v8  ;;  %v5475_v48 = vsub.f32 %v5230_v50, %v5443_v8  ;;  %v5478_v51 = vsub.f32 %v1205_v58, %v5443_v8 }
 0x3ae   :  { %v1282_v47 = vmul.f32 %v5447_v36, %v5447_v36  ;;  %v1284_v6 = vmul.f32 %v5451_v5, %v5451_v5  ;;  %v1286_v7 = vmul.f32 %v5455_v43, %v5455_v43  ;;  %v1288_v17 = vmul.f32 %v5462_v0, %v5462_v0 }
 0x3af   :  { %v5484_v61 = vsub.f32 %v5243_v42, %v5443_v8  ;;  %v1281_v40 = vmul.f32 %v5471_v28, %v5471_v28  ;;  %v1283_v59 = vmul.f32 %v5475_v48, %v5475_v48  ;;  %v5491_v50 = vsub.f32 %v1207_v26, %v5443_v8 }
 0x3b0   :  { %v1316_v24 = vadd.f32 %v1284_v6, %v1282_v47  ;;  %v1290_v58 = vmul.f32 %v5465_v46, %v5465_v46  ;;  %v5497_v4 = vsub.f32 %v5291_v31, %v5443_v8  ;;  %v5500_v42 = vsub.f32 %v1209_v19, %v5443_v8 }
 0x3b1   :  { %v1292_v14 = vmul.f32 %v5478_v51, %v5478_v51  ;;  %v5506_v35 = vsub.f32 %v5301_v54, %v5443_v8  ;;  %v1285_v26 = vmul.f32 %v5484_v61, %v5484_v61  ;;  %v1305_v23 = vadd.f32 %v1283_v59, %v1281_v40 }
 0x3b2   :  { %v1317_v27 = vadd.f32 %v1316_v24, %v1286_v7  ;;  %v5511_v57 = vsub.f32 %v1211_v63, %v5443_v8  ;;  %v1294_v31 = vmul.f32 %v5491_v50, %v5491_v50  ;;  %v5517_v16 = vsub.f32 %v5311_v32, %v5443_v8 }
 0x3b3   :  { %v1287_v62 = vmul.f32 %v5497_v4, %v5497_v4  ;;  %v1306_v54 = vadd.f32 %v1305_v23, %v1285_v26  ;;  %v5522_v49 = vsub.f32 %v1213_v11, %v5443_v8  ;;  %v1296_v18 = vmul.f32 %v5500_v42, %v5500_v42 }
 0x3b4   :  { %v1318_v13 = vadd.f32 %v1317_v27, %v1288_v17  ;;  %v5528_v52 = vsub.f32 %v5323_v25, %v5443_v8  ;;  %v1289_v41 = vmul.f32 %v5506_v35, %v5506_v35  ;;  %v5533_v2 = vsub.f32 %v1215_v15, %v5443_v8 }
 0x3b5   :  { %v1307_v32 = vadd.f32 %v1306_v54, %v1287_v62  ;;  %v1298_v34 = vmul.f32 %v5511_v57, %v5511_v57  ;;  %v5539_v56 = vsub.f32 %v5333_v22, %v5443_v8  ;;  %v1291_v45 = vmul.f32 %v5517_v16, %v5517_v16  ;;  %v1578_v54 = vld [vmem:[%s7547_s4] sm:$0xff] }
 0x3b6   :  { %v1319_v9 = vadd.f32 %v1318_v13, %v1290_v58  ;;  %v5544_v37 = vsub.f32 %v1217_v29, %v5443_v8  ;;  %v1300_v33 = vmul.f32 %v5522_v49, %v5522_v49  ;;  %v5550_v1 = vsub.f32 %v5346_v53, %v5443_v8 }
 0x3b7   :  { %v1308_v25 = vadd.f32 %v1307_v32, %v1289_v41  ;;  %v1293_v20 = vmul.f32 %v5528_v52, %v5528_v52  ;;  %v1302_v3 = vmul.f32 %v5533_v2, %v5533_v2  ;;  %v5558_v29 = vsub.f32 %v5356_v21, %v5443_v8 }
 0x3b8   :  { %v1320_v19 = vadd.f32 %v1319_v9, %v1292_v14  ;;  %v1295_v38 = vmul.f32 %v5539_v56, %v5539_v56  ;;  %v1304_v53 = vmul.f32 %v5544_v37, %v5544_v37  ;;  %v5566_v6 = vsub.f32 %v5371_v30, %v5443_v8 }
 0x3b9   :  { %v1309_v22 = vadd.f32 %v1308_v25, %v1291_v45  ;;  %v1297_v7 = vmul.f32 %v5550_v1, %v5550_v1  ;;  %v5572_v21 = vsub.f32 %v5388_v10, %v5443_v8  ;;  %v1299_v27 = vmul.f32 %v5558_v29, %v5558_v29  ;;  %v1582_v45 = vld [vmem:[%s7547_s4 + $0x20] sm:$0xff]  ;;  %v1583_v25 = vld [vmem:[%s7547_s4 + $0x28] sm:$0xff] }
 0x3ba   :  { %v1321_v63 = vadd.f32 %v1320_v19, %v1294_v31  ;;  %v1301_v59 = vmul.f32 %v5566_v6, %v5566_v6  ;;  %v4245_v41 = vmov 0.0|0.0  }
 0x3bb   :  { %v1310_v44 = vadd.f32 %v1309_v22, %v1293_v20  ;;  %v1303_v58 = vmul.f32 %v5572_v21, %v5572_v21  ;;  %3685 = vmatprep.subr.bf16.mxu0 %v4245_v41  ;;  %v1585_v20 = vld [vmem:[%s7547_s4 + $0x38] sm:$0xff] }
 0x3bc   :  { %v1322_v11 = vadd.f32 %v1321_v63, %v1296_v18  ;;  %v1579_v18 = vld [vmem:[%s7547_s4 + $0x8] sm:$0xff]  ;;  %v1580_v63 = vld [vmem:[%s7547_s4 + $0x10] sm:$0xff] }
 0x3bd   :  { %v1311_v24 = vadd.f32 %v1310_v44, %v1295_v38  ;;  %v3686_v32 = vpack.c.bf16 %v1579_v18, %v1578_v54  ;;  %v1588_v44 = vld [vmem:[%s7547_s4 + $0x50] sm:$0xff]  ;;  %v1602_v18 = vld [vmem:[%s7547_s4 + $0xc0] sm:$0xff] }
 0x3be   :  { %v1323_v15 = vadd.f32 %v1322_v11, %v1298_v34  ;;  %v1581_v34 = vld [vmem:[%s7547_s4 + $0x18] sm:$0xff] }
 0x3bf   :  { %v1312_v40 = vadd.f32 %v1311_v24, %v1297_v7  ;;  %3687 = vmatpush1.bf16.msra.mxu0 %v3686_v32  ;;  %v3689_v11 = vpack.c.bf16 %v1581_v34, %v1580_v63  ;;  %v1590_v7 = vld [vmem:[%s7547_s4 + $0x60] sm:$0xff]  ;;  %v1591_v24 = vld [vmem:[%s7547_s4 + $0x68] sm:$0xff]  ;;  %v1604_v34 = vld [vmem:[%s7547_s4 + $0xd0] sm:$0xff] }
 0x3c0   :  { %v1324_v12 = vadd.f32 %v1323_v15, %v1300_v33  ;;  %3688 = vmatprep.subr.bf16.mxu0 %v4245_v41  ;;  %v3692_v33 = vpack.c.bf16 %v1583_v25, %v1582_v45  ;;  %v1584_v15 = vld [vmem:[%s7547_s4 + $0x30] sm:$0xff]  ;;  %v1603_v63 = vld [vmem:[%s7547_s4 + $0xc8] sm:$0xff]  ;;  %v1606_v25 = vld [vmem:[%s7547_s4 + $0xe0] sm:$0xff] }
 0x3c1   :  { %v1313_v30 = vadd.f32 %v1312_v40, %v1299_v27  ;;  %v3695_v22 = vpack.c.bf16 %v1585_v20, %v1584_v15  ;;  %v1592_v27 = vld [vmem:[%s7547_s4 + $0x70] sm:$0xff]  ;;  %v1593_v40 = vld [vmem:[%s7547_s4 + $0x78] sm:$0xff]  ;;  %v3722_v32 = vpack.c.bf16 %v1603_v63, %v1602_v18 }
 0x3c2   :  { %v1325_v47 = vadd.f32 %v1324_v12, %v1302_v3  ;;  %v1586_v3 = vld [vmem:[%s7547_s4 + $0x40] sm:$0xff]  ;;  %v1587_v12 = vld [vmem:[%s7547_s4 + $0x48] sm:$0xff]  ;;  %v1608_v20 = vld [vmem:[%s7547_s4 + $0xf0] sm:$0xff] }
 0x3c3   :  { %v1314_v13 = vadd.f32 %v1313_v30, %v1301_v59  ;;  %3690 = vmatpush1.bf16.msra.mxu0 %v3689_v11  ;;  %v3698_v38 = vpack.c.bf16 %v1587_v12, %v1586_v3  ;;  %v3707_v59 = vpack.c.bf16 %v1593_v40, %v1592_v27  ;;  %v1594_v30 = vld [vmem:[%s7547_s4 + $0x80] sm:$0xff]  ;;  %v1605_v11 = vld [vmem:[%s7547_s4 + $0xd8] sm:$0xff]  ;;  %v7745_v40 = vmov 0.0  }
 0x3c4   :  { %v1326_v17 = vadd.f32 %v1325_v47, %v1304_v53  ;;  %3691 = vmatprep.subr.bf16.mxu0 %v4245_v41  ;;  %v1589_v53 = vld [vmem:[%s7547_s4 + $0x58] sm:$0xff]  ;;  %v3725_v45 = vpack.c.bf16 %v1605_v11, %v1604_v34 }
 0x3c5   :  { %v1315_v14 = vadd.f32 %v1314_v13, %v1303_v58  ;;  %v3701_v47 = vpack.c.bf16 %v1589_v53, %v1588_v44  ;;  %v1595_v58 = vld [vmem:[%s7547_s4 + $0x88] sm:$0xff] }
 0x3c6   :  { %1334 = vrot.lane.b32.xlu0 %v1326_v17, %s4243_s24  ;;  %v3710_v13 = vpack.c.bf16 %v1595_v58, %v1594_v30 }
 0x3c7   :  { %1328 = vrot.lane.b32.xlu1 %v1315_v14, %s4243_s24  ;;  %3693 = vmatpush1.bf16.msra.mxu0 %v3692_v33  ;;  %v1607_v33 = vld [vmem:[%s7547_s4 + $0xe8] sm:$0xff] }
 0x3c8   :  { %3694 = vmatprep.subr.bf16.mxu0 %v4245_v41  ;;  %v3728_v15 = vpack.c.bf16 %v1607_v33, %v1606_v25 }
 0x3cb   :  { %3696 = vmatpush1.bf16.msra.mxu0 %v3695_v22  ;;  %v1609_v22 = vld [vmem:[%s7547_s4 + $0xf8] sm:$0xff] }
 0x3cc   :  { %3697 = vmatprep.subr.bf16.mxu0 %v4245_v41  ;;  %v3731_v3 = vpack.c.bf16 %v1609_v22, %v1608_v20 }
 0x3cf   :  { %3699 = vmatpush1.bf16.msra.mxu0 %v3698_v38 }
 0x3d0   :  { %3700 = vmatprep.subr.bf16.mxu0 %v4245_v41 }
 0x3d3   :  { %3702 = vmatpush1.bf16.msra.mxu0 %v3701_v47 }
 0x3d4   :  { %3703 = vmatprep.subr.bf16.mxu0 %v4245_v41 }
 0x438   :  { %v1335_v26 = vpop.permute.xlu0 %1334 }
 0x439   :  { %v1329_v9 = vpop.permute.xlu1 %1328 }
 0x43a   :  { %v1331_v10 = vadd.f32 %v1329_v9, %v1315_v14  ;;  %v1596_v14 = vld [vmem:[%s7547_s4 + $0x90] sm:$0xff]  ;;  %v1597_v9 = vld [vmem:[%s7547_s4 + $0x98] sm:$0xff] }
 0x43c   :  { %v1332_v8 = vadd.f32 %v1331_v10, %v1326_v17  ;;  %v3704_v17 = vpack.c.bf16 %v1591_v24, %v1590_v7  ;;  %v3713_v10 = vpack.c.bf16 %v1597_v9, %v1596_v14 }
 0x43e   :  { %v1337_v23 = vadd.f32 %v1335_v26, %v1332_v8  ;;  %3705 = vmatpush1.bf16.msra.mxu0 %v3704_v17  ;;  %v1598_v8 = vld [vmem:[%s7547_s4 + $0xa0] sm:$0xff]  ;;  %v1599_v26 = vld [vmem:[%s7547_s4 + $0xa8] sm:$0xff] }
 0x43f   :  { %3706 = vmatprep.subr.bf16.mxu0 %v4245_v41 }
 0x440   :  { %v1338_v31 = vmul.f32 0.020833334, %v1337_v23  ;;  %v3716_v23 = vpack.c.bf16 %v1599_v26, %v1598_v8 }
 0x442   :  { %v1339_v19 = vadd.f32 1e-05, %v1338_v31  ;;  %3708 = vmatpush1.bf16.msra.mxu0 %v3707_v59  ;;  %v1600_v31 = vld [vmem:[%s7547_s4 + $0xb0] sm:$0xff] }
 0x443   :  { %3709 = vmatprep.subr.bf16.mxu0 %v4245_v41 }
 0x444   :  { %4192 = vrsqrt.f32 %v1339_v19  ;;  %v1601_v19 = vld [vmem:[%s7547_s4 + $0xb8] sm:$0xff] }
 0x445   :  { %v3719_v54 = vpack.c.bf16 %v1601_v19, %v1600_v31 }
 0x446   :  { %3711 = vmatpush1.bf16.msra.mxu0 %v3710_v13 }
 0x447   :  { %3712 = vmatprep.subr.bf16.mxu0 %v4245_v41 }
 0x44a   :  { %3714 = vmatpush1.bf16.msra.mxu0 %v3713_v10 }
 0x44b   :  { %3715 = vmatprep.subr.bf16.mxu0 %v4245_v41 }
 0x44e   :  { %v5582_v62 = vpop.eup %4192  ;;  %3717 = vmatpush1.bf16.msra.mxu0 %v3716_v23 }
 0x44f   :  { %1342 = vrot.lane.b32.xlu1 %v5582_v62, %s4243_s24  ;;  %3718 = vmatprep.subr.bf16.mxu0 %v4245_v41 }
 0x452   :  { %3720 = vmatpush1.bf16.msra.mxu0 %v3719_v54 }
 0x453   :  { %3721 = vmatprep.subr.bf16.mxu0 %v4245_v41 }
 0x456   :  { %3723 = vmatpush1.bf16.msra.mxu0 %v3722_v32 }
 0x457   :  { %3724 = vmatprep.subr.bf16.mxu0 %v4245_v41 }
 0x45a   :  { %3726 = vmatpush1.bf16.msra.mxu0 %v3725_v45 }
 0x45b   :  { %3727 = vmatprep.subr.bf16.mxu0 %v4245_v41 }
 0x45e   :  { %3729 = vmatpush1.bf16.msra.mxu0 %v3728_v15 }
 0x45f   :  { %3730 = vmatprep.subr.bf16.mxu0 %v4245_v41 }
 0x462   :  { %3732 = vmatpush1.bf16.msra.mxu0 %v3731_v3 }
 0x4c1   :  { %v1343_v12 = vpop.permute.xlu1 %1342 }
 0x4c2   :  { %v5700_v38 = vsel %vm1157_vm3, %v5582_v62, %v1343_v12 }
 0x4c3   :  { %v1349_v44 = vmul.f32 %v5700_v38, %v5451_v5  ;;  %v1346_v41 = vmul.f32 %v5700_v38, %v5471_v28  ;;  %v1347_v53 = vmul.f32 %v5700_v38, %v5447_v36  ;;  %v1350_v47 = vmul.f32 %v5700_v38, %v5484_v61 }
 0x4c4   :  { %v1351_v7 = vmul.f32 %v5700_v38, %v5455_v43  ;;  %v1348_v24 = vmul.f32 %v5700_v38, %v5475_v48  ;;  %v1354_v62 = vmul.f32 %v5700_v38, %v5506_v35  ;;  %v1355_v5 = vmul.f32 %v5700_v38, %v5465_v46 }
 0x4c5   :  { %vm1373_vm4 = vcmp.ge.f32.partialorder %v1349_v44, 0.0  ;;  %v1397_v28 = vmul.f32 0.2, %v1349_v44  ;;  %vm1370_vm5 = vcmp.ge.f32.partialorder %v1346_v41, 0.0  ;;  %vm1371_vm6 = vcmp.ge.f32.partialorder %v1347_v53, 0.0 }
 0x4c6   :  { %v1394_v36 = vmul.f32 0.2, %v1346_v41  ;;  %v1395_v17 = vmul.f32 0.2, %v1347_v53  ;;  %vm1374_vm7 = vcmp.ge.f32.partialorder %v1350_v47, 0.0  ;;  %vm1375_vm8 = vcmp.ge.f32.partialorder %v1351_v7, 0.0 }
 0x4c7   :  { %v1421_v61 = vsel %vm1373_vm4, %v1349_v44, %v1397_v28  ;;  %v1398_v27 = vmul.f32 0.2, %v1350_v47  ;;  %v1399_v43 = vmul.f32 0.2, %v1351_v7  ;;  %vm1372_vm9 = vcmp.ge.f32.partialorder %v1348_v24, 0.0 }
 0x4c8   :  { %v4135_v48 = vpack.i.bf16 %v1421_v61, %v7745_v40  ;;  %v1418_v59 = vsel %vm1370_vm5, %v1346_v41, %v1394_v36  ;;  %v1419_v30 = vsel %vm1371_vm6, %v1347_v53, %v1395_v17  ;;  %v1396_v35 = vmul.f32 0.2, %v1348_v24 }
 0x4c9   :  { %v4130_v58 = vpack.i.bf16 %v1418_v59, %v1419_v30  ;;  %v1422_v13 = vsel %vm1374_vm7, %v1350_v47, %v1398_v27  ;;  %v1423_v46 = vsel %vm1375_vm8, %v1351_v7, %v1399_v43  ;;  %vm1378_vm10 = vcmp.ge.f32.partialorder %v1354_v62, 0.0 }
 0x4ca   :  { %4136 = vrot.lane.b32.xlu1 %v4135_v48, %s4243_s24  ;;  %v4140_v14 = vpack.i.bf16 %v1422_v13, %v1423_v46  ;;  %v1420_v9 = vsel %vm1372_vm9, %v1348_v24, %v1396_v35  ;;  %vm1379_vm11 = vcmp.ge.f32.partialorder %v1355_v5, 0.0  ;;  %v1402_v10 = vmul.f32 0.2, %v1354_v62 }
 0x4cb   :  { %4131 = vrot.lane.b32.xlu0 %v4130_v58, %s4243_s24  ;;  %v1403_v8 = vmul.f32 0.2, %v1355_v5  ;;  %v1352_v26 = vmul.f32 %v5700_v38, %v5497_v4  ;;  %v1353_v23 = vmul.f32 %v5700_v38, %v5462_v0  ;;  %v1358_v31 = vmul.f32 %v5700_v38, %v5528_v52 }
 0x4cc   :  { %v1426_v19 = vsel %vm1378_vm10, %v1354_v62, %v1402_v10  ;;  %v1359_v54 = vmul.f32 %v5700_v38, %v5491_v50  ;;  %v1356_v18 = vmul.f32 %v5700_v38, %v5517_v16  ;;  %v1357_v63 = vmul.f32 %v5700_v38, %v5478_v51 }
 0x4cd   :  { %v1427_v32 = vsel %vm1379_vm11, %v1355_v5, %v1403_v8  ;;  %vm1376_vm12 = vcmp.ge.f32.partialorder %v1352_v26, 0.0  ;;  %vm1377_vm13 = vcmp.ge.f32.partialorder %v1353_v23, 0.0  ;;  %v1400_v4 = vmul.f32 0.2, %v1352_v26  ;;  %v4210_v8 = vld [vmem:[%s7543_s0 + $0x58] sm:$0xff] }
 0x4ce   :  { %4141 = vrot.lane.b32.xlu1 %v4140_v14, %s4243_s24  ;;  %v4150_v0 = vpack.i.bf16 %v1426_v19, %v1427_v32  ;;  %v1401_v34 = vmul.f32 0.2, %v1353_v23  ;;  %vm1382_vm14 = vcmp.ge.f32.partialorder %v1358_v31, 0.0  ;;  %vm1383_vm15 = vcmp.ge.f32.partialorder %v1359_v54, 0.0 }
 0x4cf   :  { %1504 = vrot.lane.b32.xlu0 %v1420_v9, %s4243_s24  ;;  %v1424_v52 = vsel %vm1376_vm12, %v1352_v26, %v1400_v4  ;;  %v1406_v50 = vmul.f32 0.2, %v1358_v31  ;;  %v1407_v11 = vmul.f32 0.2, %v1359_v54  ;;  %vm1380_vm1 = vcmp.ge.f32.partialorder %v1356_v18, 0.0 }
 0x4d0   :  { %v1425_v16 = vsel %vm1377_vm13, %v1353_v23, %v1401_v34  ;;  %vm1381_vm2 = vcmp.ge.f32.partialorder %v1357_v63, 0.0  ;;  %v1404_v45 = vmul.f32 0.2, %v1356_v18  ;;  %v1405_v51 = vmul.f32 0.2, %v1357_v63 }
 0x4d1   :  { %v4145_v25 = vpack.i.bf16 %v1424_v52, %v1425_v16  ;;  %v1430_v33 = vsel %vm1382_vm14, %v1358_v31, %v1406_v50  ;;  %v1431_v15 = vsel %vm1383_vm15, %v1359_v54, %v1407_v11  ;;  %v1362_v20 = vmul.f32 %v5700_v38, %v5550_v1 }
 0x4d2   :  { %4151 = vrot.lane.b32.xlu1 %v4150_v0, %s4243_s24  ;;  %v4160_v22 = vpack.i.bf16 %v1430_v33, %v1431_v15  ;;  %v1428_v3 = vsel %vm1380_vm1, %v1356_v18, %v1404_v45  ;;  %v1429_v12 = vsel %vm1381_vm2, %v1357_v63, %v1405_v51  ;;  %v1363_v44 = vmul.f32 %v5700_v38, %v5511_v57 }
 0x4d3   :  { %4146 = vrot.lane.b32.xlu0 %v4145_v25, %s4243_s24  ;;  %v4155_v41 = vpack.i.bf16 %v1428_v3, %v1429_v12  ;;  %vm1386_vm4 = vcmp.ge.f32.partialorder %v1362_v20, 0.0  ;;  %v1410_v53 = vmul.f32 0.2, %v1362_v20  ;;  %v1360_v47 = vmul.f32 %v5700_v38, %v5539_v56 }
 0x4d4   :  { %vm1387_vm5 = vcmp.ge.f32.partialorder %v1363_v44, 0.0  ;;  %v1411_v7 = vmul.f32 0.2, %v1363_v44  ;;  %v1361_v1 = vmul.f32 %v5700_v38, %v5500_v42  ;;  %v1366_v24 = vmul.f32 %v5700_v38, %v5566_v6 }
 0x4d5   :  { %v1434_v62 = vsel %vm1386_vm4, %v1362_v20, %v1410_v53  ;;  %vm1384_vm6 = vcmp.ge.f32.partialorder %v1360_v47, 0.0  ;;  %v1408_v5 = vmul.f32 0.2, %v1360_v47  ;;  %v1367_v57 = vmul.f32 %v5700_v38, %v5533_v2 }
 0x4d6   :  { %4161 = vrot.lane.b32.xlu1 %v4160_v22, %s4243_s24  ;;  %v1435_v28 = vsel %vm1387_vm5, %v1363_v44, %v1411_v7  ;;  %vm1385_vm7 = vcmp.ge.f32.partialorder %v1361_v1, 0.0  ;;  %v1409_v36 = vmul.f32 0.2, %v1361_v1  ;;  %vm1390_vm8 = vcmp.ge.f32.partialorder %v1366_v24, 0.0 }
 0x4d7   :  { %4156 = vrot.lane.b32.xlu0 %v4155_v41, %s4243_s24  ;;  %v4170_v56 = vpack.i.bf16 %v1434_v62, %v1435_v28  ;;  %v1432_v17 = vsel %vm1384_vm6, %v1360_v47, %v1408_v5  ;;  %vm1391_vm9 = vcmp.ge.f32.partialorder %v1367_v57, 0.0  ;;  %v1414_v42 = vmul.f32 0.2, %v1366_v24 }
 0x4d8   :  { %v1433_v61 = vsel %vm1385_vm7, %v1361_v1, %v1409_v36  ;;  %v1415_v6 = vmul.f32 0.2, %v1367_v57  ;;  %v1364_v27 = vmul.f32 %v5700_v38, %v5558_v29  ;;  %v1365_v2 = vmul.f32 %v5700_v38, %v5522_v49 }
 0x4d9   :  { %v4165_v43 = vpack.i.bf16 %v1432_v17, %v1433_v61  ;;  %v1438_v48 = vsel %vm1390_vm8, %v1366_v24, %v1414_v42  ;;  %v1368_v59 = vmul.f32 %v5700_v38, %v5572_v21  ;;  %v1369_v30 = vmul.f32 %v5700_v38, %v5544_v37 }
 0x4da   :  { %4171 = vrot.lane.b32.xlu1 %v4170_v56, %s4243_s24  ;;  %v1439_v35 = vsel %vm1391_vm9, %v1367_v57, %v1415_v6  ;;  %vm1388_vm10 = vcmp.ge.f32.partialorder %v1364_v27, 0.0  ;;  %vm1389_vm11 = vcmp.ge.f32.partialorder %v1365_v2, 0.0  ;;  %v1412_v58 = vmul.f32 0.2, %v1364_v27 }
 0x4db   :  { %4166 = vrot.lane.b32.xlu0 %v4165_v43, %s4243_s24  ;;  %v4180_v29 = vpack.i.bf16 %v1438_v48, %v1439_v35  ;;  %v1413_v13 = vmul.f32 0.2, %v1365_v2  ;;  %vm1392_vm12 = vcmp.ge.f32.partialorder %v1368_v59, 0.0  ;;  %vm1393_vm13 = vcmp.ge.f32.partialorder %v1369_v30, 0.0 }
 0x4dc   :  { %v1436_v49 = vsel %vm1388_vm10, %v1364_v27, %v1412_v58  ;;  %v1416_v46 = vmul.f32 0.2, %v1368_v59  ;;  %v1417_v14 = vmul.f32 0.2, %v1369_v30 }
 0x4dd   :  { %v1437_v9 = vsel %vm1389_vm11, %v1365_v2, %v1413_v13 }
 0x4de   :  { %4181 = vrot.lane.b32.xlu1 %v4180_v29, %s4243_s24  ;;  %v4175_v21 = vpack.i.bf16 %v1436_v49, %v1437_v9  ;;  %v1440_v37 = vsel %vm1392_vm12, %v1368_v59, %v1416_v46  ;;  %v1441_v38 = vsel %vm1393_vm13, %v1369_v30, %v1417_v14 }
 0x4df   :  { %v4185_v10 = vpack.i.bf16 %v1441_v38, %v1440_v37 }
 0x4e0   :  { %4176 = vrot.lane.b32.xlu0 %v4175_v21, %s4243_s24 }
 0x4e4   :  { %4186 = vrot.lane.b32.xlu0 %v4185_v10, %s4243_s24 }
 0x4e8   :  { %3402 = vrot.lane.b32.xlu0 %v4210_v8, %s4231_s29 }
 0x53c   :  { %v5768_v26 = vpop.permute.xlu1 %4136 }
 0x53d   :  { %v4138_v23 = vunpack.i.l.bf16 %v5768_v26  ;;  %v4132_v31 = vpop.permute.xlu0 %4131  ;;  %v4139_v18 = vunpack.i.h.bf16 %v5768_v26  ;;  %v2027_v26 = vld [vmem:[%s7549_s6 + $0x10] sm:$0xff] }
 0x53e   :  { %v4134_v19 = vunpack.i.h.bf16 %v4132_v31  ;;  %v4133_v54 = vunpack.i.l.bf16 %v4132_v31 }
 0x540   :  { %v4142_v63 = vpop.permute.xlu1 %4141  ;;  %v5773_v32 = vsel %vm1157_vm3, %v4134_v19, %v4133_v54  ;;  %v1564_v4 = vsel %vm1157_vm3, %v4138_v23, %v4134_v19 }
 0x541   :  { %v1505_v0 = vpop.permute.xlu0 %1504  ;;  %1674 = vmatprep.mubr.f32.mxu0 %v5773_v32  ;;  %v4144_v34 = vunpack.i.h.bf16 %v4142_v63  ;;  %v4143_v52 = vunpack.i.l.bf16 %v4142_v63  ;;  %v2025_v63 = vld [vmem:[%s7549_s6] sm:$0xff] }
 0x542   :  { %1675 = vmatmul.mubr.f32.vlgmr.msra.gmra.mrb[0].mxu0 %v1564_v4  ;;  %v5780_v50 = vsel %vm1157_vm3, %v1505_v0, %v4139_v18  ;;  %v5784_v16 = vsel %vm1157_vm3, %v4133_v54, %v1505_v0  ;;  %v2026_v54 = vld [vmem:[%s7549_s6 + $0x8] sm:$0xff]  ;;  %v2032_v0 = vld [vmem:[%s7549_s6 + $0x38] sm:$0xff] }
 0x543   :  { %1679 = vmatprep.mubr.f32.mxu0 %v5780_v50  ;;  %v5788_v25 = vsel %vm1157_vm3, %v4144_v34, %v4143_v52  ;;  %v1566_v15 = vsel %vm1157_vm3, %v4139_v18, %v4144_v34  ;;  %v2028_v18 = vld [vmem:[%s7549_s6 + $0x18] sm:$0xff]  ;;  %v2030_v4 = vld [vmem:[%s7549_s6 + $0x28] sm:$0xff]  ;;  %v2029_v34 = vld [vmem:[%s7549_s6 + $0x20] sm:$0xff] }
 0x544   :  { %v4152_v33 = vpop.permute.xlu1 %4151 }
 0x545   :  { %v4147_v11 = vpop.permute.xlu0 %4146  ;;  %v4154_v20 = vunpack.i.h.bf16 %v4152_v33  ;;  %v4153_v22 = vunpack.i.l.bf16 %v4152_v33  ;;  %v2035_v33 = vld [vmem:[%s7549_s6 + $0x50] sm:$0xff] }
 0x546   :  { %v4149_v45 = vunpack.i.h.bf16 %v4147_v11  ;;  %v4148_v51 = vunpack.i.l.bf16 %v4147_v11  ;;  %1680 = vmatmul.mubr.f32.gmra.mrb[2].mxu0 %v5784_v16 }
 0x547   :  { %1684 = vmatprep.mubr.f32.mxu0 %v5788_v25  ;;  %v1532_v47 = vsel %vm1157_vm3, %v4154_v20, %v4153_v22 }
 0x548   :  { %v5793_v3 = vsel %vm1157_vm3, %v4149_v45, %v4148_v51  ;;  %v1567_v44 = vsel %vm1157_vm3, %v4143_v52, %v4149_v45  ;;  %v4162_v7 = vpop.permute.xlu1 %4161  ;;  %v1568_v1 = vsel %vm1157_vm3, %v4148_v51, %v4154_v20  ;;  %v3737_v52 = vpack.c.bf16 %v2032_v0, %v2030_v4  ;;  %v2036_v45 = vld [vmem:[%s7549_s6 + $0x58] sm:$0xff]  ;;  %v2038_v20 = vld [vmem:[%s7549_s6 + $0x68] sm:$0xff] }
 0x549   :  { %v4157_v12 = vpop.permute.xlu0 %4156  ;;  %v4164_v24 = vunpack.i.h.bf16 %v4162_v7  ;;  %v4163_v62 = vunpack.i.l.bf16 %v4162_v7 }
 0x54a   :  { %1685 = vmatmul.mubr.f32.gmra.mrb[4].mxu0 %v1566_v15  ;;  %v4159_v41 = vunpack.i.h.bf16 %v4157_v12  ;;  %v4158_v53 = vunpack.i.l.bf16 %v4157_v12  ;;  %v2037_v12 = vld [vmem:[%s7549_s6 + $0x60] sm:$0xff] }
 0x54b   :  { %1689 = vmatprep.mubr.f32.mxu0 %v5793_v3  ;;  %v1534_v17 = vsel %vm1157_vm3, %v4164_v24, %v4163_v62 }
 0x54c   :  { %v1533_v5 = vsel %vm1157_vm3, %v4159_v41, %v4158_v53  ;;  %v1569_v28 = vsel %vm1157_vm3, %v4153_v22, %v4159_v41  ;;  %v4172_v42 = vpop.permute.xlu1 %4171  ;;  %v1570_v61 = vsel %vm1157_vm3, %v4158_v53, %v4164_v24  ;;  %v2040_v22 = vld [vmem:[%s7549_s6 + $0x78] sm:$0xff]  ;;  %v2042_v53 = vld [vmem:[%s7549_s6 + $0x88] sm:$0xff]  ;;  %v2043_v24 = vld [vmem:[%s7549_s6 + $0x90] sm:$0xff] }
 0x54d   :  { %v4167_v57 = vpop.permute.xlu0 %4166  ;;  %v4174_v6 = vunpack.i.h.bf16 %v4172_v42  ;;  %v4173_v27 = vunpack.i.l.bf16 %v4172_v42 }
 0x54e   :  { %1690 = vmatmul.mubr.f32.gmra.mrb[6].mxu0 %v1567_v44  ;;  %v4169_v36 = vunpack.i.h.bf16 %v4167_v57  ;;  %v4168_v56 = vunpack.i.l.bf16 %v4167_v57  ;;  %v2048_v57 = vld [vmem:[%s7549_s6 + $0xb8] sm:$0xff] }
 0x54f   :  { %1694 = vmatprep.mubr.f32.mxu0 %v1532_v47  ;;  %v1536_v35 = vsel %vm1157_vm3, %v4174_v6, %v4173_v27 }
 0x550   :  { %v1535_v2 = vsel %vm1157_vm3, %v4169_v36, %v4168_v56  ;;  %v1571_v48 = vsel %vm1157_vm3, %v4163_v62, %v4169_v36  ;;  %v4182_v58 = vpop.permute.xlu1 %4181  ;;  %v1572_v29 = vsel %vm1157_vm3, %v4168_v56, %v4174_v6  ;;  %v2045_v36 = vld [vmem:[%s7549_s6 + $0xa0] sm:$0xff]  ;;  %v2047_v56 = vld [vmem:[%s7549_s6 + $0xb0] sm:$0xff]  ;;  %v2050_v6 = vld [vmem:[%s7549_s6 + $0xc8] sm:$0xff] }
 0x551   :  { %v4184_v13 = vunpack.i.h.bf16 %v4182_v58  ;;  %v4183_v49 = vunpack.i.l.bf16 %v4182_v58  ;;  %v3755_v42 = vpack.c.bf16 %v2047_v56, %v2045_v36  ;;  %v2069_v36 = vld [vmem:[%s7549_s6 + $0x160] sm:$0xff]  ;;  %v2071_v56 = vld [vmem:[%s7549_s6 + $0x170] sm:$0xff] }
 0x552   :  { %1695 = vmatmul.mubr.f32.gmra.mrb[8].mxu0 %v1568_v1  ;;  %v4177_v43 = vpop.permute.xlu0 %4176 }
 0x553   :  { %1699 = vmatprep.mubr.f32.mxu0 %v1533_v5  ;;  %v4179_v59 = vunpack.i.h.bf16 %v4177_v43  ;;  %v4178_v30 = vunpack.i.l.bf16 %v4177_v43  ;;  %v1538_v38 = vsel %vm1157_vm3, %v4184_v13, %v4183_v49 }
 0x555   :  { %v1537_v46 = vsel %vm1157_vm3, %v4179_v59, %v4178_v30  ;;  %v1573_v9 = vsel %vm1157_vm3, %v4173_v27, %v4179_v59  ;;  %v1574_v10 = vsel %vm1157_vm3, %v4178_v30, %v4184_v13  ;;  %v2052_v27 = vld [vmem:[%s7549_s6 + $0xd8] sm:$0xff]  ;;  %v2049_v59 = vld [vmem:[%s7549_s6 + $0xc0] sm:$0xff]  ;;  %v2051_v30 = vld [vmem:[%s7549_s6 + $0xd0] sm:$0xff] }
 0x556   :  { %1700 = vmatmul.mubr.f32.gmra.mrb[10].mxu0 %v1569_v28  ;;  %v4187_v14 = vpop.permute.xlu0 %4186  ;;  %v2056_v13 = vld [vmem:[%s7549_s6 + $0xf8] sm:$0xff] }
 0x557   :  { %1704 = vmatprep.mubr.f32.mxu0 %v1534_v17  ;;  %v4189_v21 = vunpack.i.h.bf16 %v4187_v14  ;;  %v4188_v37 = vunpack.i.l.bf16 %v4187_v14 }
 0x559   :  { %v1539_v8 = vsel %vm1157_vm3, %v4188_v37, %v4189_v21  ;;  %v1575_v31 = vsel %vm1157_vm3, %v4183_v49, %v4188_v37  ;;  %v1577_v19 = vsel %vm1157_vm3, %v4189_v21, %v4138_v23  ;;  %v3735_v23 = vpack.c.bf16 %v2027_v26, %v2025_v63  ;;  %v2053_v21 = vld [vmem:[%s7549_s6 + $0xe0] sm:$0xff]  ;;  %v2055_v37 = vld [vmem:[%s7549_s6 + $0xf0] sm:$0xff] }
 0x55a   :  { %1705 = vmatmul.mubr.f32.gmra.mrb[12].mxu0 %v1570_v61  ;;  %v2059_v26 = vld [vmem:[%s7549_s6 + $0x110] sm:$0xff] }
 0x55b   :  { %1709 = vmatprep.mubr.f32.mxu0 %v1535_v2 }
 0x55e   :  { %1710 = vmatmul.mubr.f32.gmra.mrb[14].mxu0 %v1571_v48 }
 0x55f   :  { %1714 = vmatprep.mubr.f32.mxu0 %v1536_v35 }
 0x562   :  { %1715 = vmatmul.mubr.f32.gmra.mrb[16].mxu0 %v1572_v29 }
 0x563   :  { %1719 = vmatprep.mubr.f32.mxu0 %v1537_v46 }
 0x566   :  { %1720 = vmatmul.mubr.f32.gmra.mrb[18].mxu0 %v1573_v9 }
 0x567   :  { %1724 = vmatprep.mubr.f32.mxu0 %v1538_v38 }
 0x56a   :  { %1725 = vmatmul.mubr.f32.gmra.mrb[20].mxu0 %v1574_v10 }
 0x56b   :  { %1729 = vmatprep.mubr.f32.mxu0 %v1539_v8 }
 0x56e   :  { %1730 = vmatmul.mubr.f32.gmra.mrb[22].mxu0 %v1575_v31 }
 0x56f   :  { %1734 = vmatprep.mubr.f32.mxu0 %v5784_v16  ;;  %v2034_v16 = vld [vmem:[%s7549_s6 + $0x48] sm:$0xff] }
 0x570   :  { %v3741_v51 = vpack.c.bf16 %v2036_v45, %v2034_v16  ;;  %v2061_v45 = vld [vmem:[%s7549_s6 + $0x120] sm:$0xff] }
 0x572   :  { %1735 = vmatmul.mubr.f32.gmra.mrb[24].mxu0 %v5773_v32  ;;  %v3733_v32 = vpack.c.bf16 %v2028_v18, %v2026_v54 }
 0x573   :  { %1739 = vmatprep.mubr.f32.mxu0 %v1566_v15 }
 0x574   :  { %3734 = vmatprep.subr.bf16.mxu1 %v3733_v32  ;;  %v2057_v32 = vld [vmem:[%s7549_s6 + $0x100] sm:$0xff] }
 0x575   :  { %3736 = vmatpush1.bf16.msra.mxu1 %v3735_v23  ;;  %v3767_v23 = vpack.c.bf16 %v2059_v26, %v2057_v32  ;;  %v2081_v26 = vld [vmem:[%s7549_s6 + $0x1c0] sm:$0xff] }
 0x576   :  { %1740 = vmatmul.mubr.f32.gmra.mrb[26].mxu0 %v5780_v50  ;;  %v2031_v50 = vld [vmem:[%s7549_s6 + $0x30] sm:$0xff]  ;;  %3738 = vmatprep.subr.bf16.mxu1 %v3737_v52  ;;  %v2064_v52 = vld [vmem:[%s7549_s6 + $0x138] sm:$0xff] }
 0x577   :  { %1744 = vmatprep.mubr.f32.mxu0 %v1567_v44  ;;  %v3739_v11 = vpack.c.bf16 %v2031_v50, %v2029_v34  ;;  %v2039_v44 = vld [vmem:[%s7549_s6 + $0x70] sm:$0xff]  ;;  %v2062_v34 = vld [vmem:[%s7549_s6 + $0x128] sm:$0xff] }
 0x578   :  { %v3747_v41 = vpack.c.bf16 %v2039_v44, %v2037_v12  ;;  %v3769_v16 = vpack.c.bf16 %v2064_v52, %v2062_v34 }
 0x579   :  { %3740 = vmatpush1.bf16.msra.mxu1 %v3739_v11 }
 0x57a   :  { %1745 = vmatmul.mubr.f32.gmra.mrb[28].mxu0 %v5788_v25  ;;  %v2033_v25 = vld [vmem:[%s7549_s6 + $0x40] sm:$0xff]  ;;  %3742 = vmatprep.subr.bf16.mxu1 %v3741_v51  ;;  %v2063_v51 = vld [vmem:[%s7549_s6 + $0x130] sm:$0xff] }
 0x57b   :  { %1749 = vmatprep.mubr.f32.mxu0 %v1568_v1  ;;  %v3743_v15 = vpack.c.bf16 %v2035_v33, %v2033_v25  ;;  %v2041_v1 = vld [vmem:[%s7549_s6 + $0x80] sm:$0xff]  ;;  %v3771_v25 = vpack.c.bf16 %v2063_v51, %v2061_v45 }
 0x57c   :  { %v3751_v62 = vpack.c.bf16 %v2043_v24, %v2041_v1  ;;  %v2070_v24 = vld [vmem:[%s7549_s6 + $0x168] sm:$0xff] }
 0x57d   :  { %3744 = vmatpush1.bf16.msra.mxu1 %v3743_v15 }
 0x57e   :  { %1750 = vmatmul.mubr.f32.gmra.mrb[30].mxu0 %v5793_v3  ;;  %v3745_v3 = vpack.c.bf16 %v2040_v22, %v2038_v20  ;;  %v2066_v20 = vld [vmem:[%s7549_s6 + $0x148] sm:$0xff]  ;;  %v2068_v22 = vld [vmem:[%s7549_s6 + $0x158] sm:$0xff] }
 0x57f   :  { %1754 = vmatprep.mubr.f32.mxu0 %v1569_v28  ;;  %v3773_v44 = vpack.c.bf16 %v2068_v22, %v2066_v20  ;;  %v2092_v20 = vld [vmem:[%s7549_s6 + $0x218] sm:$0xff] }
 0x580   :  { %3746 = vmatprep.subr.bf16.mxu1 %v3745_v3 }
 0x581   :  { %3748 = vmatpush1.bf16.msra.mxu1 %v3747_v41  ;;  %v2065_v41 = vld [vmem:[%s7549_s6 + $0x140] sm:$0xff] }
 0x582   :  { %1755 = vmatmul.mubr.f32.gmra.mrb[32].mxu0 %v1532_v47  ;;  %v2044_v47 = vld [vmem:[%s7549_s6 + $0x98] sm:$0xff] }
 0x583   :  { %1759 = vmatprep.mubr.f32.mxu0 %v1570_v61  ;;  %v3749_v7 = vpack.c.bf16 %v2044_v47, %v2042_v53  ;;  %v2067_v53 = vld [vmem:[%s7549_s6 + $0x150] sm:$0xff] }
 0x584   :  { %v3775_v47 = vpack.c.bf16 %v2067_v53, %v2065_v41 }
 0x585   :  { %3750 = vmatprep.subr.bf16.mxu1 %v3749_v7 }
 0x586   :  { %1760 = vmatmul.mubr.f32.gmra.mrb[34].mxu0 %v1533_v5  ;;  %3752 = vmatpush1.bf16.msra.mxu1 %v3751_v62  ;;  %v2046_v5 = vld [vmem:[%s7549_s6 + $0xa8] sm:$0xff]  ;;  %v2072_v62 = vld [vmem:[%s7549_s6 + $0x178] sm:$0xff] }
 0x587   :  { %1764 = vmatprep.mubr.f32.mxu0 %v1571_v48  ;;  %v3753_v28 = vpack.c.bf16 %v2048_v57, %v2046_v5  ;;  %v3757_v48 = vpack.c.bf16 %v2052_v27, %v2050_v6  ;;  %v2074_v27 = vld [vmem:[%s7549_s6 + $0x188] sm:$0xff] }
 0x589   :  { %3754 = vmatprep.subr.bf16.mxu1 %v3753_v28  ;;  %v3777_v28 = vpack.c.bf16 %v2072_v62, %v2070_v24 }
 0x58a   :  { %1765 = vmatmul.mubr.f32.gmra.mrb[36].mxu0 %v1534_v17  ;;  %v5896_v17 = vld [vmem:[%s7548_s5] sm:$0x3]  ;;  %3756 = vmatpush1.bf16.msra.mxu1 %v3755_v42  ;;  %v3779_v42 = vpack.c.bf16 %v2071_v56, %v2069_v36 }
 0x58b   :  { %1769 = vmatprep.mubr.f32.mxu0 %v1572_v29  ;;  %3758 = vmatprep.subr.bf16.mxu1 %v3757_v48  ;;  %v2054_v29 = vld [vmem:[%s7549_s6 + $0xe8] sm:$0xff]  ;;  %v2073_v48 = vld [vmem:[%s7549_s6 + $0x180] sm:$0xff] }
 0x58e   :  { %1770 = vmatmul.mubr.f32.gmra.mrb[38].mxu0 %v1535_v2  ;;  %v5906_v2 = vrot.slane %v5896_v17, %v5193_v60 }
 0x58f   :  { %1774 = vmatprep.mubr.f32.mxu0 %v1573_v9  ;;  %v3761_v9 = vpack.c.bf16 %v2056_v13, %v2054_v29  ;;  %v2078_v29 = vld [vmem:[%s7549_s6 + $0x1a8] sm:$0xff]  ;;  %v2080_v13 = vld [vmem:[%s7549_s6 + $0x1b8] sm:$0xff] }
 0x592   :  { %1775 = vmatmul.mubr.f32.gmra.mrb[40].mxu0 %v1536_v35  ;;  %v3759_v35 = vpack.c.bf16 %v2051_v30, %v2049_v59 }
 0x593   :  { %1779 = vmatprep.mubr.f32.mxu0 %v1574_v10 }
 0x594   :  { %3760 = vmatpush1.bf16.msra.mxu1 %v3759_v35 }
 0x595   :  { %3762 = vmatprep.subr.bf16.mxu1 %v3761_v9  ;;  %v3785_v9 = vpack.c.bf16 %v2080_v13, %v2078_v29 }
 0x596   :  { %1780 = vmatmul.mubr.f32.gmra.mrb[42].mxu0 %v1537_v46 }
 0x597   :  { %1784 = vmatprep.mubr.f32.mxu0 %v1575_v31  ;;  %v2058_v31 = vld [vmem:[%s7549_s6 + $0x108] sm:$0xff] }
 0x59a   :  { %1785 = vmatmul.mubr.f32.gmra.mrb[44].mxu0 %v1538_v38  ;;  %v3763_v38 = vpack.c.bf16 %v2055_v37, %v2053_v21  ;;  %v2077_v21 = vld [vmem:[%s7549_s6 + $0x1a0] sm:$0xff]  ;;  %v2079_v37 = vld [vmem:[%s7549_s6 + $0x1b0] sm:$0xff] }
 0x59b   :  { %1789 = vmatprep.mubr.f32.mxu0 %v1577_v19  ;;  %v2060_v19 = vld [vmem:[%s7549_s6 + $0x118] sm:$0xff] }
 0x59c   :  { %3764 = vmatpush1.bf16.msra.mxu1 %v3763_v38  ;;  %v3765_v63 = vpack.c.bf16 %v2060_v19, %v2058_v31  ;;  %v2082_v38 = vld [vmem:[%s7549_s6 + $0x1c8] sm:$0xff]  ;;  %v3787_v19 = vpack.c.bf16 %v2079_v37, %v2077_v21 }
 0x59e   :  { %1790 = vmatmul.mubr.f32.gmra.mrb[46].mxu0 %v1539_v8  ;;  %3766 = vmatprep.subr.bf16.mxu1 %v3765_v63 }
 0x5a0   :  { %3768 = vmatpush1.bf16.msra.mxu1 %v3767_v23  ;;  %v2083_v23 = vld [vmem:[%s7549_s6 + $0x1d0] sm:$0xff] }
 0x5a1   :  { %3770 = vmatprep.subr.bf16.mxu1 %v3769_v16 }
 0x5a4   :  { %3772 = vmatpush1.bf16.msra.mxu1 %v3771_v25  ;;  %v2085_v25 = vld [vmem:[%s7549_s6 + $0x1e0] sm:$0xff] }
 0x5a5   :  { %3774 = vmatprep.subr.bf16.mxu1 %v3773_v44 }
 0x5a8   :  { %3776 = vmatpush1.bf16.msra.mxu1 %v3775_v47 }
 0x5a9   :  { %3778 = vmatprep.subr.bf16.mxu1 %v3777_v28 }
 0x5ac   :  { %3780 = vmatpush1.bf16.msra.mxu1 %v3779_v42 }
 0x615   :  { %v1676_v61 = vpop.f32.mrb[0].mxu0 }
 0x616   :  { %v1678_v43 = vpop.f32.mrb[1].mxu0  ;;  %v5921_v49 = vadd.f32 %v5906_v2, %v1676_v61 }
 0x617   :  { %v2076_v43 = vld [vmem:[%s7549_s6 + $0x198] sm:$0xff] }
 0x618   :  { %v3781_v35 = vpack.c.bf16 %v2076_v43, %v2074_v27 }
 0x619   :  { %v1681_v58 = vpop.f32.mrb[2].mxu0 }
 0x61a   :  { %v5924_v46 = vadd.f32 %v5906_v2, %v1681_v58  ;;  %v1683_v14 = vpop.f32.mrb[3].mxu0  ;;  %v2075_v58 = vld [vmem:[%s7549_s6 + $0x190] sm:$0xff]  ;;  %3782 = vmatprep.subr.bf16.mxu1 %v3781_v35 }
 0x61b   :  { %v3783_v14 = vpack.c.bf16 %v2075_v58, %v2073_v48 }
 0x61c   :  { %v1831_v10 = vadd.f32 %v5924_v46, %v5921_v49 }
 0x61d   :  { %v1686_v8 = vpop.f32.mrb[4].mxu0  ;;  %3784 = vmatpush1.bf16.msra.mxu1 %v3783_v14 }
 0x61e   :  { %v5941_v54 = vadd.f32 %v5906_v2, %v1686_v8  ;;  %v1688_v18 = vpop.f32.mrb[5].mxu0  ;;  %v2084_v8 = vld [vmem:[%s7549_s6 + $0x1d8] sm:$0xff]  ;;  %3786 = vmatprep.subr.bf16.mxu1 %v3785_v9 }
 0x61f   :  { %v3789_v32 = vpack.c.bf16 %v2084_v8, %v2082_v38 }
 0x620   :  { %v1832_v4 = vadd.f32 %v1831_v10, %v5941_v54 }
 0x621   :  { %v1691_v0 = vpop.f32.mrb[6].mxu0  ;;  %3788 = vmatpush1.bf16.msra.mxu1 %v3787_v19 }
 0x622   :  { %v5957_v50 = vadd.f32 %v5906_v2, %v1691_v0  ;;  %v1693_v11 = vpop.f32.mrb[7].mxu0  ;;  %v2088_v0 = vld [vmem:[%s7549_s6 + $0x1f8] sm:$0xff]  ;;  %3790 = vmatprep.subr.bf16.mxu1 %v3789_v32 }
 0x623   :  { %v3791_v11 = vpack.c.bf16 %v2083_v23, %v2081_v26 }
 0x624   :  { %v1833_v33 = vadd.f32 %v1832_v4, %v5957_v50  ;;  %v2086_v4 = vld [vmem:[%s7549_s6 + $0x1e8] sm:$0xff] }
 0x625   :  { %v1696_v15 = vpop.f32.mrb[8].mxu0  ;;  %v3793_v51 = vpack.c.bf16 %v2088_v0, %v2086_v4  ;;  %3792 = vmatpush1.bf16.msra.mxu1 %v3791_v11 }
 0x626   :  { %v5973_v3 = vadd.f32 %v5906_v2, %v1696_v15  ;;  %v1698_v12 = vpop.f32.mrb[9].mxu0  ;;  %v2090_v15 = vld [vmem:[%s7549_s6 + $0x208] sm:$0xff] }
 0x627   :  { %3794 = vmatprep.subr.bf16.mxu1 %v3793_v51  ;;  %v3797_v47 = vpack.c.bf16 %v2092_v20, %v2090_v15 }
 0x628   :  { %v1834_v7 = vadd.f32 %v1833_v33, %v5973_v3  ;;  %v2087_v33 = vld [vmem:[%s7549_s6 + $0x1f0] sm:$0xff] }
 0x629   :  { %v1701_v1 = vpop.f32.mrb[10].mxu0  ;;  %v3795_v44 = vpack.c.bf16 %v2087_v33, %v2085_v25 }
 0x62a   :  { %v5989_v5 = vadd.f32 %v5906_v2, %v1701_v1  ;;  %v1703_v57 = vpop.f32.mrb[11].mxu0 }
 0x62b   :  { %3796 = vmatpush1.bf16.msra.mxu1 %v3795_v44 }
 0x62c   :  { %v1835_v61 = vadd.f32 %v1834_v7, %v5989_v5  ;;  %3798 = vmatprep.subr.bf16.mxu1 %v3797_v47 }
 0x62d   :  { %v1706_v6 = vpop.f32.mrb[12].mxu0 }
 0x62e   :  { %v6008_v59 = vadd.f32 %v5906_v2, %v1706_v6  ;;  %v1708_v30 = vpop.f32.mrb[13].mxu0  ;;  %v1804_v6 = vrot.slane %v5896_v17, %v5343_v55 }
 0x630   :  { %v1836_v10 = vadd.f32 %v1835_v61, %v6008_v59 }
 0x631   :  { %v1711_v31 = vpop.f32.mrb[14].mxu0 }
 0x632   :  { %v6033_v18 = vadd.f32 %v5906_v2, %v1711_v31  ;;  %v1713_v63 = vpop.f32.mrb[15].mxu0 }
 0x634   :  { %v1837_v34 = vadd.f32 %v1836_v10, %v6033_v18 }
 0x635   :  { %v1716_v52 = vpop.f32.mrb[16].mxu0 }
 0x636   :  { %v6049_v16 = vadd.f32 %v5906_v2, %v1716_v52  ;;  %v1718_v45 = vpop.f32.mrb[17].mxu0 }
 0x638   :  { %v1838_v22 = vadd.f32 %v1837_v34, %v6049_v16 }
 0x639   :  { %v1721_v12 = vpop.f32.mrb[18].mxu0 }
 0x63a   :  { %v6065_v41 = vadd.f32 %v5906_v2, %v1721_v12  ;;  %v1723_v53 = vpop.f32.mrb[19].mxu0 }
 0x63c   :  { %v1839_v7 = vadd.f32 %v1838_v22, %v6065_v41 }
 0x63d   :  { %v1726_v1 = vpop.f32.mrb[20].mxu0 }
 0x63e   :  { %v6069_v24 = vadd.f32 %v5906_v2, %v1726_v1  ;;  %v1728_v62 = vpop.f32.mrb[21].mxu0 }
 0x640   :  { %v1840_v57 = vadd.f32 %v1839_v7, %v6069_v24 }
 0x641   :  { %v1731_v28 = vpop.f32.mrb[22].mxu0 }
 0x642   :  { %v6073_v36 = vadd.f32 %v5906_v2, %v1731_v28  ;;  %v1733_v56 = vpop.f32.mrb[23].mxu0 }
 0x644   :  { %v1841_v42 = vadd.f32 %v1840_v57, %v6073_v36 }
 0x645   :  { %v1736_v61 = vpop.f32.mrb[24].mxu0 }
 0x646   :  { %v1738_v27 = vpop.f32.mrb[25].mxu0  ;;  %v1808_v48 = vadd.f32 %v1804_v6, %v1736_v61 }
 0x649   :  { %v1741_v43 = vpop.f32.mrb[26].mxu0 }
 0x64a   :  { %v1810_v30 = vadd.f32 %v1804_v6, %v1741_v43  ;;  %v1743_v35 = vpop.f32.mrb[27].mxu0 }
 0x64c   :  { %v1842_v58 = vadd.f32 %v1810_v30, %v1808_v48 }
 0x64d   :  { %v1746_v29 = vpop.f32.mrb[28].mxu0 }
 0x64e   :  { %v1812_v13 = vadd.f32 %v1804_v6, %v1746_v29  ;;  %v1748_v14 = vpop.f32.mrb[29].mxu0 }
 0x650   :  { %v1843_v9 = vadd.f32 %v1842_v58, %v1812_v13 }
 0x651   :  { %v1751_v21 = vpop.f32.mrb[30].mxu0 }
 0x652   :  { %v1814_v2 = vadd.f32 %v1804_v6, %v1751_v21  ;;  %v1753_v37 = vpop.f32.mrb[31].mxu0 }
 0x654   :  { %v1844_v38 = vadd.f32 %v1843_v9, %v1814_v2 }
 0x655   :  { %v1756_v10 = vpop.f32.mrb[32].mxu0 }
 0x656   :  { %v1816_v8 = vadd.f32 %v1804_v6, %v1756_v10  ;;  %v1758_v31 = vpop.f32.mrb[33].mxu0 }
 0x658   :  { %v1845_v19 = vadd.f32 %v1844_v38, %v1816_v8 }
 0x659   :  { %v1761_v63 = vpop.f32.mrb[34].mxu0 }
 0x65a   :  { %v1818_v17 = vadd.f32 %v1804_v6, %v1761_v63  ;;  %v1763_v32 = vpop.f32.mrb[35].mxu0 }
 0x65c   :  { %v1846_v26 = vadd.f32 %v1845_v19, %v1818_v17 }
 0x65d   :  { %v1766_v23 = vpop.f32.mrb[36].mxu0 }
 0x65e   :  { %v1820_v4 = vadd.f32 %v1804_v6, %v1766_v23  ;;  %v1768_v0 = vpop.f32.mrb[37].mxu0 }
 0x660   :  { %v1847_v34 = vadd.f32 %v1846_v26, %v1820_v4 }
 0x661   :  { %v1771_v52 = vpop.f32.mrb[38].mxu0 }
 0x662   :  { %v1822_v11 = vadd.f32 %v1804_v6, %v1771_v52  ;;  %v1773_v45 = vpop.f32.mrb[39].mxu0 }
 0x664   :  { %v1848_v51 = vadd.f32 %v1847_v34, %v1822_v11 }
 0x665   :  { %v1776_v25 = vpop.f32.mrb[40].mxu0 }
 0x666   :  { %v1824_v33 = vadd.f32 %v1804_v6, %v1776_v25  ;;  %v1778_v15 = vpop.f32.mrb[41].mxu0 }
 0x668   :  { %v1849_v20 = vadd.f32 %v1848_v51, %v1824_v33 }
 0x669   :  { %v1781_v22 = vpop.f32.mrb[42].mxu0 }
 0x66a   :  { %v1826_v12 = vadd.f32 %v1804_v6, %v1781_v22  ;;  %v1783_v44 = vpop.f32.mrb[43].mxu0 }
 0x66c   :  { %v1850_v53 = vadd.f32 %v1849_v20, %v1826_v12 }
 0x66d   :  { %v1786_v47 = vpop.f32.mrb[44].mxu0 }
 0x66e   :  { %v1828_v7 = vadd.f32 %v1804_v6, %v1786_v47  ;;  %v1788_v1 = vpop.f32.mrb[45].mxu0 }
 0x670   :  { %v1851_v62 = vadd.f32 %v1850_v53, %v1828_v7 }
 0x671   :  { %v1791_v57 = vpop.f32.mrb[46].mxu0 }
 0x672   :  { %v1830_v28 = vadd.f32 %v1804_v6, %v1791_v57  ;;  %v1793_v56 = vpop.f32.mrb[47].mxu0 }
 0x674   :  { %v1852_v61 = vadd.f32 %v1851_v62, %v1830_v28 }
 0x676   :  { %v1853_v27 = vadd.f32 %v1852_v61, %v1841_v42 }
 0x678   :  { %v1854_v43 = vmul.f32 0.041666668, %v1853_v27 }
 0x67a   :  { %v6079_v35 = vsub.f32 %v5921_v49, %v1854_v43  ;;  %v6081_v58 = vsub.f32 %v1808_v48, %v1854_v43  ;;  %v6084_v29 = vsub.f32 %v5924_v46, %v1854_v43  ;;  %v6086_v14 = vsub.f32 %v1810_v30, %v1854_v43 }
 0x67b   :  { %v6089_v9 = vsub.f32 %v5941_v54, %v1854_v43  ;;  %v6091_v21 = vsub.f32 %v1812_v13, %v1854_v43  ;;  %v6094_v6 = vsub.f32 %v5957_v50, %v1854_v43  ;;  %v6096_v42 = vsub.f32 %v1814_v2, %v1854_v43 }
 0x67c   :  { %v6099_v49 = vsub.f32 %v5973_v3, %v1854_v43  ;;  %v6101_v48 = vsub.f32 %v1816_v8, %v1854_v43  ;;  %v6104_v46 = vsub.f32 %v5989_v5, %v1854_v43  ;;  %v6106_v30 = vsub.f32 %v1818_v17, %v1854_v43 }
 0x67d   :  { %v6109_v54 = vsub.f32 %v6008_v59, %v1854_v43  ;;  %v6111_v13 = vsub.f32 %v1820_v4, %v1854_v43  ;;  %v6114_v50 = vsub.f32 %v6033_v18, %v1854_v43  ;;  %v6116_v2 = vsub.f32 %v1822_v11, %v1854_v43 }
 0x67e   :  { %v6119_v3 = vsub.f32 %v6049_v16, %v1854_v43  ;;  %v6121_v37 = vsub.f32 %v1824_v33, %v1854_v43  ;;  %v6124_v5 = vsub.f32 %v6065_v41, %v1854_v43  ;;  %v6126_v38 = vsub.f32 %v1826_v12, %v1854_v43 }
 0x67f   :  { %v6129_v59 = vsub.f32 %v6069_v24, %v1854_v43  ;;  %v6131_v10 = vsub.f32 %v1828_v7, %v1854_v43  ;;  %v6134_v18 = vsub.f32 %v6073_v36, %v1854_v43  ;;  %v1878_v8 = vsub.f32 %v1830_v28, %v1854_v43 }
 0x680   :  { %v1879_v16 = vmul.f32 %v6079_v35, %v6079_v35  ;;  %v1880_v31 = vmul.f32 %v6081_v58, %v6081_v58  ;;  %v1881_v41 = vmul.f32 %v6084_v29, %v6084_v29  ;;  %v1882_v19 = vmul.f32 %v6086_v14, %v6086_v14 }
 0x681   :  { %v1883_v24 = vmul.f32 %v6089_v9, %v6089_v9  ;;  %v1884_v36 = vmul.f32 %v6091_v21, %v6091_v21  ;;  %v1885_v32 = vmul.f32 %v6094_v6, %v6094_v6  ;;  %v1886_v26 = vmul.f32 %v6096_v42, %v6096_v42 }
 0x682   :  { %v1903_v63 = vadd.f32 %v1881_v41, %v1879_v16  ;;  %v1914_v17 = vadd.f32 %v1882_v19, %v1880_v31  ;;  %v1887_v0 = vmul.f32 %v6099_v49, %v6099_v49  ;;  %v1888_v34 = vmul.f32 %v6101_v48, %v6101_v48 }
 0x683   :  { %v1889_v45 = vmul.f32 %v6104_v46, %v6104_v46  ;;  %v1890_v51 = vmul.f32 %v6106_v30, %v6106_v30  ;;  %v1891_v15 = vmul.f32 %v6109_v54, %v6109_v54  ;;  %v1892_v20 = vmul.f32 %v6111_v13, %v6111_v13 }
 0x684   :  { %v1904_v23 = vadd.f32 %v1903_v63, %v1883_v24  ;;  %v1915_v4 = vadd.f32 %v1914_v17, %v1884_v36  ;;  %v1893_v44 = vmul.f32 %v6114_v50, %v6114_v50  ;;  %v1894_v53 = vmul.f32 %v6116_v2, %v6116_v2 }
 0x685   :  { %v1895_v1 = vmul.f32 %v6119_v3, %v6119_v3  ;;  %v1896_v62 = vmul.f32 %v6121_v37, %v6121_v37  ;;  %v1897_v56 = vmul.f32 %v6124_v5, %v6124_v5  ;;  %v1898_v61 = vmul.f32 %v6126_v38, %v6126_v38 }
 0x686   :  { %v1905_v52 = vadd.f32 %v1904_v23, %v1885_v32  ;;  %v1916_v11 = vadd.f32 %v1915_v4, %v1886_v26  ;;  %v1899_v16 = vmul.f32 %v6129_v59, %v6129_v59  ;;  %v1900_v31 = vmul.f32 %v6131_v10, %v6131_v10 }
 0x687   :  { %v1901_v24 = vmul.f32 %v6134_v18, %v6134_v18  ;;  %v1902_v36 = vmul.f32 %v1878_v8, %v1878_v8 }
 0x688   :  { %v1906_v25 = vadd.f32 %v1905_v52, %v1887_v0  ;;  %v1917_v33 = vadd.f32 %v1916_v11, %v1888_v34 }
 0x68a   :  { %v1907_v22 = vadd.f32 %v1906_v25, %v1889_v45  ;;  %v1918_v12 = vadd.f32 %v1917_v33, %v1890_v51  ;;  %v2089_v45 = vld [vmem:[%s7549_s6 + $0x200] sm:$0xff]  ;;  %v2091_v51 = vld [vmem:[%s7549_s6 + $0x210] sm:$0xff] }
 0x68c   :  { %v1908_v47 = vadd.f32 %v1907_v22, %v1891_v15  ;;  %v1919_v7 = vadd.f32 %v1918_v12, %v1892_v20 }
 0x68e   :  { %v1909_v57 = vadd.f32 %v1908_v47, %v1893_v44  ;;  %v1920_v28 = vadd.f32 %v1919_v7, %v1894_v53  ;;  %v3799_v44 = vpack.c.bf16 %v2091_v51, %v2089_v45  ;;  %v2100_v7 = vld [vmem:[%s7549_s6 + $0x258] sm:$0xff] }
 0x690   :  { %v1910_v27 = vadd.f32 %v1909_v57, %v1895_v1  ;;  %v1921_v43 = vadd.f32 %v1920_v28, %v1896_v62 }
 0x692   :  { %v1911_v41 = vadd.f32 %v1910_v27, %v1897_v56  ;;  %v1922_v19 = vadd.f32 %v1921_v43, %v1898_v61  ;;  %v2097_v43 = vld [vmem:[%s7549_s6 + $0x240] sm:$0xff] }
 0x694   :  { %v1912_v63 = vadd.f32 %v1911_v41, %v1899_v16  ;;  %v1923_v17 = vadd.f32 %v1922_v19, %v1900_v31  ;;  %v2104_v41 = vld [vmem:[%s7549_s6 + $0x278] sm:$0xff] }
 0x696   :  { %v1913_v32 = vadd.f32 %v1912_v63, %v1901_v24  ;;  %v1924_v26 = vadd.f32 %v1923_v17, %v1902_v36 }
 0x698   :  { %v1925_v23 = vadd.f32 %v1924_v26, %v1913_v32  ;;  %v2101_v26 = vld [vmem:[%s7549_s6 + $0x260] sm:$0xff] }
 0x69a   :  { %v1926_v4 = vmul.f32 0.041666668, %v1925_v23 }
 0x69c   :  { %v1927_v0 = vadd.f32 1e-05, %v1926_v4 }
 0x69e   :  { %4194 = vrsqrt.f32 %v1927_v0  ;;  %v2108_v0 = vld [vmem:[%s7549_s6 + $0x298] sm:$0xff] }
 0x6a8   :  { %v6182_v34 = vpop.eup %4194 }
 0x6a9   :  { %v6185_v52 = vmul.f32 %v6182_v34, %v1878_v8  ;;  %v1929_v11 = vmul.f32 %v6182_v34, %v6079_v35  ;;  %v1931_v25 = vmul.f32 %v6182_v34, %v6084_v29  ;;  %v1930_v33 = vmul.f32 %v6182_v34, %v6081_v58  ;;  %v2094_v8 = vld [vmem:[%s7549_s6 + $0x228] sm:$0xff]  ;;  %v2096_v35 = vld [vmem:[%s7549_s6 + $0x238] sm:$0xff] }
 0x6aa   :  { %v1933_v15 = vmul.f32 %v6182_v34, %v6089_v9  ;;  %v1932_v20 = vmul.f32 %v6182_v34, %v6086_v14  ;;  %v1935_v29 = vmul.f32 %v6182_v34, %v6094_v6  ;;  %v6213_v58 = vmul.f32 %v6182_v34, %v6091_v21  ;;  %v2093_v9 = vld [vmem:[%s7549_s6 + $0x220] sm:$0xff]  ;;  %v2095_v14 = vld [vmem:[%s7549_s6 + $0x230] sm:$0xff]  ;;  %v2098_v21 = vld [vmem:[%s7549_s6 + $0x248] sm:$0xff] }
 0x6ab   :  { %vm1953_vm14 = vcmp.ge.f32.partialorder %v1929_v11, 0.0  ;;  %v1977_v22 = vmul.f32 0.2, %v1929_v11  ;;  %v1979_v12 = vmul.f32 0.2, %v1931_v25  ;;  %vm1955_vm15 = vcmp.ge.f32.partialorder %v1931_v25, 0.0 }
 0x6ac   :  { %v3801_v47 = vpack.c.bf16 %v2096_v35, %v2094_v8  ;;  %v1978_v6 = vmul.f32 0.2, %v1930_v33  ;;  %vm1954_vm1 = vcmp.ge.f32.partialorder %v1930_v33, 0.0  ;;  %v1981_v62 = vmul.f32 0.2, %v1933_v15  ;;  %v2105_v8 = vld [vmem:[%s7549_s6 + $0x280] sm:$0xff] }
 0x6ad   :  { %v2001_v53 = vsel %vm1953_vm14, %v1929_v11, %v1977_v22  ;;  %v6228_v1 = vsel %vm1955_vm15, %v1931_v25, %v1979_v12  ;;  %v1937_v57 = vmul.f32 %v6182_v34, %v6099_v49  ;;  %v3803_v28 = vpack.c.bf16 %v2095_v14, %v2093_v9  ;;  %v2099_v49 = vld [vmem:[%s7549_s6 + $0x250] sm:$0xff]  ;;  %v2114_v14 = vld [vmem:[%s7549_s6 + $0x2c8] sm:$0xff] }
 0x6ae   :  { %2217 = vmatprep.mubr.f32.mxu1 %v2001_v53  ;;  %vm1957_vm2 = vcmp.ge.f32.partialorder %v1933_v15, 0.0  ;;  %v6235_v56 = vmul.f32 %v6182_v34, %v6096_v42  ;;  %v6239_v61 = vmul.f32 %v6182_v34, %v6104_v46  ;;  %v3805_v27 = vpack.c.bf16 %v2100_v7, %v2098_v21  ;;  %v2102_v46 = vld [vmem:[%s7549_s6 + $0x268] sm:$0xff] }
 0x6af   :  { %2218 = vmatmul.mubr.f32.vlgmr.msra.gmra.mrb[0].mxu1 %v7745_v40  ;;  %v6249_v16 = vmul.f32 %v6182_v34, %v6101_v48  ;;  %v6251_v42 = vsel %vm1954_vm1, %v1930_v33, %v1978_v6  ;;  %v1980_v31 = vmul.f32 0.2, %v1932_v20  ;;  %v6260_v19 = vsel %vm1957_vm2, %v1933_v15, %v1981_v62  ;;  %v2110_v15 = vld [vmem:[%s7549_s6 + $0x2a8] sm:$0xff]  ;;  %v2116_v6 = vld [vmem:[%s7549_s6 + $0x2d8] sm:$0xff] }
 0x6b0   :  { %3800 = vmatpush1.bf16.msra.mxu1 %v3799_v44  ;;  %2223 = vmatprep.mubr.f32.mxu1 %v6228_v1  ;;  %vm1956_vm4 = vcmp.ge.f32.partialorder %v1932_v20, 0.0  ;;  %v1983_v24 = vmul.f32 0.2, %v1935_v29  ;;  %v6264_v48 = vmul.f32 %v6182_v34, %v6109_v54  ;;  %v3807_v36 = vpack.c.bf16 %v2099_v49, %v2097_v43  ;;  %v2103_v54 = vld [vmem:[%s7549_s6 + $0x270] sm:$0xff]  ;;  %v2120_v43 = vld [vmem:[%s7549_s6 + $0x2f8] sm:$0xff] }
 0x6b1   :  { %3802 = vmatprep.subr.bf16.mxu1 %v3801_v47  ;;  %vm1959_vm5 = vcmp.ge.f32.partialorder %v1935_v29, 0.0  ;;  %v6269_v63 = vmul.f32 %v6182_v34, %v6106_v30  ;;  %v3809_v17 = vpack.c.bf16 %v2104_v41, %v2102_v46  ;;  %v1982_v32 = vmul.f32 0.2, %v6213_v58  ;;  %v2106_v30 = vld [vmem:[%s7549_s6 + $0x288] sm:$0xff]  ;;  %v2109_v47 = vld [vmem:[%s7549_s6 + $0x2a0] sm:$0xff] }
 0x6b2   :  { %v6280_v23 = vmul.f32 %v6182_v34, %v6114_v50  ;;  %v6282_v4 = vsel %vm1956_vm4, %v1932_v20, %v1980_v31  ;;  %vm1958_vm6 = vcmp.ge.f32.partialorder %v6213_v58, 0.0  ;;  %v6293_v11 = vmul.f32 %v6182_v34, %v6111_v13  ;;  %v2112_v20 = vld [vmem:[%s7549_s6 + $0x2b8] sm:$0xff]  ;;  %v2117_v41 = vld [vmem:[%s7549_s6 + $0x2e0] sm:$0xff] }
 0x6b3   :  { %2224 = vmatmul.mubr.f32.gmra.mrb[2].mxu1 %v6251_v42  ;;  %v6297_v50 = vmul.f32 %v6182_v34, %v6119_v3  ;;  %v6300_v45 = vsel %vm1959_vm5, %v1935_v29, %v1983_v24  ;;  %v1985_v51 = vmul.f32 0.2, %v1937_v57  ;;  %v6304_v25 = vmul.f32 %v6182_v34, %v6116_v2  ;;  %v2107_v2 = vld [vmem:[%s7549_s6 + $0x290] sm:$0xff] }
 0x6b4   :  { %3804 = vmatpush1.bf16.msra.mxu1 %v3803_v28  ;;  %2229 = vmatprep.mubr.f32.mxu1 %v6260_v19  ;;  %v3811_v33 = vpack.c.bf16 %v2103_v54, %v2101_v26  ;;  %vm1961_vm7 = vcmp.ge.f32.partialorder %v1937_v57, 0.0  ;;  %v6308_v13 = vsel %vm1958_vm6, %v6213_v58, %v1982_v32  ;;  %v3813_v3 = vpack.c.bf16 %v2108_v0, %v2106_v30  ;;  %v2119_v24 = vld [vmem:[%s7549_s6 + $0x2f0] sm:$0xff]  ;;  %v2124_v32 = vld [vmem:[%s7549_s6 + $0x318] sm:$0xff]  ;;  %v2121_v0 = vld [vmem:[%s7549_s6 + $0x300] sm:$0xff] }
 0x6b5   :  { %3806 = vmatprep.subr.bf16.mxu1 %v3805_v27  ;;  %vm1960_vm8 = vcmp.ge.f32.partialorder %v6235_v56, 0.0  ;;  %v1984_v35 = vmul.f32 0.2, %v6235_v56  ;;  %v6326_v29 = vmul.f32 %v6182_v34, %v6124_v5  ;;  %v6330_v58 = vmul.f32 %v6182_v34, %v6121_v37 }
 0x6b6   :  { %v6334_v22 = vmul.f32 %v6182_v34, %v6129_v59  ;;  %v6337_v12 = vsel %vm1961_vm7, %v1937_v57, %v1985_v51  ;;  %v1987_v44 = vmul.f32 0.2, %v6239_v61  ;;  %v6342_v53 = vmul.f32 %v6182_v34, %v6126_v38  ;;  %v2111_v38 = vld [vmem:[%s7549_s6 + $0x2b0] sm:$0xff] }
 0x6b7   :  { %2230 = vmatmul.mubr.f32.gmra.mrb[4].mxu1 %v6282_v4  ;;  %v6346_v5 = vmul.f32 %v6182_v34, %v6134_v18  ;;  %v3815_v37 = vpack.c.bf16 %v2107_v2, %v2105_v8  ;;  %vm1963_vm9 = vcmp.ge.f32.partialorder %v6239_v61, 0.0  ;;  %v3817_v59 = vpack.c.bf16 %v2112_v20, %v2110_v15  ;;  %v2128_v8 = vld [vmem:[%s7549_s6 + $0x338] sm:$0xff]  ;;  %v2125_v20 = vld [vmem:[%s7549_s6 + $0x320] sm:$0xff] }
 0x6b8   :  { %3808 = vmatpush1.bf16.msra.mxu1 %v3807_v36  ;;  %2235 = vmatprep.mubr.f32.mxu1 %v6300_v45  ;;  %v6359_v18 = vsel %vm1960_vm8, %v6235_v56, %v1984_v35  ;;  %v1986_v9 = vmul.f32 0.2, %v6249_v16  ;;  %v6370_v21 = vsel %vm1963_vm9, %v6239_v61, %v1987_v44  ;;  %vm1962_vm10 = vcmp.ge.f32.partialorder %v6249_v16, 0.0  ;;  %v2113_v56 = vld [vmem:[%s7549_s6 + $0x2c0] sm:$0xff]  ;;  %v2115_v61 = vld [vmem:[%s7549_s6 + $0x2d0] sm:$0xff] }
 0x6b9   :  { %3810 = vmatprep.subr.bf16.mxu1 %v3809_v17  ;;  %v1989_v7 = vmul.f32 0.2, %v6264_v48  ;;  %v6376_v62 = vmul.f32 %v6182_v34, %v6131_v10  ;;  %v3819_v57 = vpack.c.bf16 %v2111_v38, %v2109_v47  ;;  %vm1965_vm11 = vcmp.ge.f32.partialorder %v6264_v48, 0.0  ;;  %v2118_v34 = vld [vmem:[%s7549_s6 + $0x2e8] sm:$0xff]  ;;  %v2132_v47 = vld [vmem:[%s7549_s6 + $0x358] sm:$0xff] }
 0x6ba   :  { %v3821_v28 = vpack.c.bf16 %v2116_v6, %v2114_v14  ;;  %v6387_v27 = vsel %vm1962_vm10, %v6249_v16, %v1986_v9  ;;  %v1988_v10 = vmul.f32 0.2, %v6269_v63  ;;  %vm1964_vm12 = vcmp.ge.f32.partialorder %v6269_v63, 0.0  ;;  %v2122_v17 = vld [vmem:[%s7549_s6 + $0x308] sm:$0xff]  ;;  %v2129_v6 = vld [vmem:[%s7549_s6 + $0x340] sm:$0xff] }
 0x6bb   :  { %2236 = vmatmul.mubr.f32.gmra.mrb[6].mxu1 %v6308_v13  ;;  %v6398_v49 = vsel %vm1965_vm11, %v6264_v48, %v1989_v7  ;;  %v1991_v16 = vmul.f32 0.2, %v6280_v23  ;;  %v3823_v31 = vpack.c.bf16 %v2115_v61, %v2113_v56  ;;  %vm1967_vm13 = vcmp.ge.f32.partialorder %v6280_v23, 0.0  ;;  %v2136_v56 = vld [vmem:[%s7549_s6 + $0x378] sm:$0xff] }
 0x6bc   :  { %3812 = vmatpush1.bf16.msra.mxu1 %v3811_v33  ;;  %2241 = vmatprep.mubr.f32.mxu1 %v6337_v12  ;;  %v3825_v46 = vpack.c.bf16 %v2120_v43, %v2118_v34  ;;  %v6411_v48 = vsel %vm1964_vm12, %v6269_v63, %v1988_v10  ;;  %v1990_v36 = vmul.f32 0.2, %v6293_v11  ;;  %vm1966_vm14 = vcmp.ge.f32.partialorder %v6293_v11, 0.0  ;;  %v2133_v43 = vld [vmem:[%s7549_s6 + $0x360] sm:$0xff] }
 0x6bd   :  { %3814 = vmatprep.subr.bf16.mxu1 %v3813_v3  ;;  %v6422_v26 = vsel %vm1967_vm13, %v6280_v23, %v1991_v16  ;;  %v1993_v63 = vmul.f32 0.2, %v6297_v50  ;;  %v3827_v54 = vpack.c.bf16 %v2119_v24, %v2117_v41  ;;  %vm1969_vm15 = vcmp.ge.f32.partialorder %v6297_v50, 0.0  ;;  %v2123_v23 = vld [vmem:[%s7549_s6 + $0x310] sm:$0xff]  ;;  %v2126_v3 = vld [vmem:[%s7549_s6 + $0x328] sm:$0xff]  ;;  %v2140_v41 = vld [vmem:[%s7549_s6 + $0x398] sm:$0xff] }
 0x6be   :  { %v3829_v30 = vpack.c.bf16 %v2124_v32, %v2122_v17  ;;  %v6435_v51 = vsel %vm1966_vm14, %v6293_v11, %v1990_v36  ;;  %v1992_v33 = vmul.f32 0.2, %v6304_v25  ;;  %vm1968_vm1 = vcmp.ge.f32.partialorder %v6304_v25, 0.0  ;;  %v2137_v17 = vld [vmem:[%s7549_s6 + $0x380] sm:$0xff]  ;;  %v2139_v32 = vld [vmem:[%s7549_s6 + $0x390] sm:$0xff] }
 0x6bf   :  { %2242 = vmatmul.mubr.f32.gmra.mrb[8].mxu1 %v6359_v18  ;;  %v6446_v2 = vsel %vm1969_vm15, %v6297_v50, %v1993_v63  ;;  %v1995_v11 = vmul.f32 0.2, %v6326_v29  ;;  %v3831_v35 = vpack.c.bf16 %v2123_v23, %v2121_v0  ;;  %vm1971_vm2 = vcmp.ge.f32.partialorder %v6326_v29, 0.0  ;;  %v2127_v50 = vld [vmem:[%s7549_s6 + $0x330] sm:$0xff]  ;;  %v2141_v23 = vld [vmem:[%s7549_s6 + $0x3a0] sm:$0xff] }
 0x6c0   :  { %3816 = vmatpush1.bf16.msra.mxu1 %v3815_v37  ;;  %2247 = vmatprep.mubr.f32.mxu1 %v6370_v21  ;;  %v3833_v15 = vpack.c.bf16 %v2128_v8, %v2126_v3  ;;  %v6459_v44 = vsel %vm1968_vm1, %v6304_v25, %v1992_v33  ;;  %v1994_v37 = vmul.f32 0.2, %v6330_v58  ;;  %vm1970_vm4 = vcmp.ge.f32.partialorder %v6330_v58, 0.0  ;;  %v2146_v33 = vld [vmem:[%s7549_s6 + $0x3c8] sm:$0xff]  ;;  %v2148_v3 = vld [vmem:[%s7549_s6 + $0x3d8] sm:$0xff] }
 0x6c1   :  { %3818 = vmatprep.subr.bf16.mxu1 %v3817_v59  ;;  %v2130_v59 = vld [vmem:[%s7549_s6 + $0x348] sm:$0xff]  ;;  %v6470_v38 = vsel %vm1971_vm2, %v6326_v29, %v1995_v11  ;;  %v1997_v25 = vmul.f32 0.2, %v6334_v22  ;;  %v3835_v9 = vpack.c.bf16 %v2127_v50, %v2125_v20  ;;  %vm1973_vm5 = vcmp.ge.f32.partialorder %v6334_v22, 0.0  ;;  %v2131_v29 = vld [vmem:[%s7549_s6 + $0x350] sm:$0xff]  ;;  %v2145_v11 = vld [vmem:[%s7549_s6 + $0x3c0] sm:$0xff] }
 0x6c2   :  { %v3837_v14 = vpack.c.bf16 %v2132_v47, %v2130_v59  ;;  %v6483_v7 = vsel %vm1970_vm4, %v6330_v58, %v1994_v37  ;;  %vm1972_vm6 = vcmp.ge.f32.partialorder %v6342_v53, 0.0  ;;  %v1999_v58 = vmul.f32 0.2, %v6346_v5  ;;  %v2152_v20 = vld [vmem:[%s7549_s6 + $0x3f8] sm:$0xff]  ;;  %v2149_v59 = vld [vmem:[%s7549_s6 + $0x3e0] sm:$0xff]  ;;  %v2151_v47 = vld [vmem:[%s7549_s6 + $0x3f0] sm:$0xff] }
 0x6c3   :  { %2248 = vmatmul.mubr.f32.gmra.mrb[10].mxu1 %v6387_v27  ;;  %v6494_v61 = vsel %vm1973_vm5, %v6334_v22, %v1997_v25  ;;  %v3839_v10 = vpack.c.bf16 %v2131_v29, %v2129_v6  ;;  %vm1975_vm7 = vcmp.ge.f32.partialorder %v6346_v5, 0.0  ;;  %v2135_v22 = vld [vmem:[%s7549_s6 + $0x370] sm:$0xff]  ;;  %vm1974_vm8 = vcmp.ge.f32.partialorder %v6376_v62, 0.0  ;;  %v2682_v29 = vld [vmem:[%s7551_s8 + $0xb8] sm:$0xff] }
 0x6c4   :  { %3820 = vmatpush1.bf16.msra.mxu1 %v3819_v57  ;;  %2253 = vmatprep.mubr.f32.mxu1 %v6398_v49  ;;  %v1996_v57 = vmul.f32 0.2, %v6342_v53  ;;  %v2023_v24 = vsel %vm1975_vm7, %v6346_v5, %v1999_v58  ;;  %v3843_v36 = vpack.c.bf16 %v2135_v22, %v2133_v43  ;;  %v2142_v5 = vld [vmem:[%s7549_s6 + $0x3a8] sm:$0xff]  ;;  %v3853_v8 = vpack.c.bf16 %v2148_v3, %v2146_v33  ;;  %v2681_v6 = vld [vmem:[%s7551_s8 + $0xb0] sm:$0xff]  ;;  %v2698_v33 = vld [vmem:[%s7551_s8 + $0x138] sm:$0xff] }
 0x6c5   :  { %3822 = vmatprep.subr.bf16.mxu1 %v3821_v28  ;;  %v2134_v28 = vld [vmem:[%s7549_s6 + $0x368] sm:$0xff]  ;;  %v3859_v25 = vpack.c.bf16 %v2151_v47, %v2149_v59  ;;  %vm1976_vm9 = vcmp.ge.f32.partialorder %v6185_v52, 0.0  ;;  %v2669_v47 = vld [vmem:[%s7551_s8 + $0x50] sm:$0xff] }
 0x6c6   :  { %v3841_v34 = vpack.c.bf16 %v2136_v56, %v2134_v28  ;;  %v2020_v16 = vsel %vm1972_vm6, %v6342_v53, %v1996_v57  ;;  %v3873_v57 = vpack.c.bf16 %v2682_v29, %v2681_v6  ;;  %v2666_v28 = vld [vmem:[%s7551_s8 + $0x38] sm:$0xff]  ;;  %v2708_v58 = vld [vmem:[%s7551_s8 + $0x188] sm:$0xff] }
 0x6c7   :  { %2254 = vmatmul.mubr.f32.gmra.mrb[12].mxu1 %v6411_v48  ;;  %v2692_v43 = vld [vmem:[%s7551_s8 + $0x108] sm:$0xff] }
 0x6c8   :  { %3824 = vmatpush1.bf16.msra.mxu1 %v3823_v31  ;;  %2259 = vmatprep.mubr.f32.mxu1 %v6422_v26  ;;  %v1998_v31 = vmul.f32 0.2, %v6376_v62 }
 0x6c9   :  { %3826 = vmatprep.subr.bf16.mxu1 %v3825_v46  ;;  %v2138_v46 = vld [vmem:[%s7549_s6 + $0x388] sm:$0xff] }
 0x6ca   :  { %v3845_v53 = vpack.c.bf16 %v2140_v41, %v2138_v46  ;;  %v2022_v63 = vsel %vm1974_vm8, %v6376_v62, %v1998_v31  ;;  %v2143_v62 = vld [vmem:[%s7549_s6 + $0x3b0] sm:$0xff]  ;;  %v2710_v31 = vld [vmem:[%s7551_s8 + $0x198] sm:$0xff] }
 0x6cb   :  { %2260 = vmatmul.mubr.f32.gmra.mrb[14].mxu1 %v6435_v51  ;;  %v2693_v41 = vld [vmem:[%s7551_s8 + $0x110] sm:$0xff] }
 0x6cc   :  { %3828 = vmatpush1.bf16.msra.mxu1 %v3827_v54  ;;  %2265 = vmatprep.mubr.f32.mxu1 %v6446_v2  ;;  %v2144_v54 = vld [vmem:[%s7549_s6 + $0x3b8] sm:$0xff] }
 0x6cd   :  { %3830 = vmatprep.subr.bf16.mxu1 %v3829_v30  ;;  %v3847_v30 = vpack.c.bf16 %v2139_v32, %v2137_v17  ;;  %v3849_v0 = vpack.c.bf16 %v2144_v54, %v2142_v5  ;;  %v2712_v17 = vld [vmem:[%s7551_s8 + $0x1a8] sm:$0xff] }
 0x6ce   :  { %v2696_v5 = vld [vmem:[%s7551_s8 + $0x128] sm:$0xff] }
 0x6cf   :  { %2266 = vmatmul.mubr.f32.gmra.mrb[16].mxu1 %v6459_v44 }
 0x6d0   :  { %3832 = vmatpush1.bf16.msra.mxu1 %v3831_v35  ;;  %2271 = vmatprep.mubr.f32.mxu1 %v6470_v38  ;;  %v2147_v35 = vld [vmem:[%s7549_s6 + $0x3d0] sm:$0xff] }
 0x6d1   :  { %3834 = vmatprep.subr.bf16.mxu1 %v3833_v15  ;;  %v2150_v15 = vld [vmem:[%s7549_s6 + $0x3e8] sm:$0xff]  ;;  %v3855_v50 = vpack.c.bf16 %v2147_v35, %v2145_v11  ;;  %v2667_v11 = vld [vmem:[%s7551_s8 + $0x40] sm:$0xff] }
 0x6d2   :  { %v3857_v37 = vpack.c.bf16 %v2152_v20, %v2150_v15  ;;  %v2668_v15 = vld [vmem:[%s7551_s8 + $0x48] sm:$0xff]  ;;  %v2685_v20 = vld [vmem:[%s7551_s8 + $0xd0] sm:$0xff] }
 0x6d3   :  { %2272 = vmatmul.mubr.f32.gmra.mrb[18].mxu1 %v6483_v7 }
 0x6d4   :  { %3836 = vmatpush1.bf16.msra.mxu1 %v3835_v9  ;;  %2277 = vmatprep.mubr.f32.mxu1 %v6494_v61  ;;  %v2664_v9 = vld [vmem:[%s7551_s8 + $0x28] sm:$0xff] }
 0x6d5   :  { %3838 = vmatprep.subr.bf16.mxu1 %v3837_v14 }
 0x6d7   :  { %2278 = vmatmul.mubr.f32.gmra.mrb[20].mxu1 %v2020_v16 }
 0x6d8   :  { %3840 = vmatpush1.bf16.msra.mxu1 %v3839_v10  ;;  %2283 = vmatprep.mubr.f32.mxu1 %v2023_v24 }
 0x6d9   :  { %3842 = vmatprep.subr.bf16.mxu1 %v3841_v34  ;;  %v2691_v34 = vld [vmem:[%s7551_s8 + $0x100] sm:$0xff] }
 0x6da   :  { %v3895_v22 = vpack.c.bf16 %v2692_v43, %v2691_v34  ;;  %v2721_v34 = vld [vmem:[%s7551_s8 + $0x1f0] sm:$0xff]  ;;  %v2722_v43 = vld [vmem:[%s7551_s8 + $0x1f8] sm:$0xff] }
 0x6db   :  { %2284 = vmatmul.mubr.f32.gmra.mrb[22].mxu1 %v2022_v63 }
 0x6dc   :  { %3844 = vmatpush1.bf16.msra.mxu1 %v3843_v36  ;;  %2354 = vmatprep.mubr.f32.mxu1 %v6228_v1  ;;  %v3851_v1 = vpack.c.bf16 %v2143_v62, %v2141_v23  ;;  %v2697_v62 = vld [vmem:[%s7551_s8 + $0x130] sm:$0xff] }
 0x6dd   :  { %3846 = vmatprep.subr.bf16.mxu1 %v3845_v53  ;;  %v2711_v53 = vld [vmem:[%s7551_s8 + $0x1a0] sm:$0xff]  ;;  %v3907_v3 = vpack.c.bf16 %v2698_v33, %v2697_v62 }
 0x6de   :  { %v3901_v32 = vpack.c.bf16 %v2712_v17, %v2711_v53  ;;  %v2771_v17 = vld [vmem:[%s7551_s8 + $0x380] sm:$0xff] }
 0x6e0   :  { %3848 = vmatpush1.bf16.msra.mxu1 %v3847_v30  ;;  %v2713_v30 = vld [vmem:[%s7551_s8 + $0x1b0] sm:$0xff] }
 0x6e1   :  { %3850 = vmatprep.subr.bf16.mxu1 %v3849_v0  ;;  %v2714_v0 = vld [vmem:[%s7551_s8 + $0x1b8] sm:$0xff] }
 0x6e2   :  { %v3905_v23 = vpack.c.bf16 %v2714_v0, %v2713_v30 }
 0x6e4   :  { %3852 = vmatpush1.bf16.msra.mxu1 %v3851_v1  ;;  %v2683_v1 = vld [vmem:[%s7551_s8 + $0xc0] sm:$0xff] }
 0x6e5   :  { %3854 = vmatprep.subr.bf16.mxu1 %v3853_v8  ;;  %v2684_v8 = vld [vmem:[%s7551_s8 + $0xc8] sm:$0xff] }
 0x6e6   :  { %v3877_v35 = vpack.c.bf16 %v2684_v8, %v2683_v1 }
 0x6e8   :  { %3856 = vmatpush1.bf16.msra.mxu1 %v3855_v50  ;;  %v2686_v50 = vld [vmem:[%s7551_s8 + $0xd8] sm:$0xff] }
 0x6e9   :  { %3858 = vmatprep.subr.bf16.mxu1 %v3857_v37  ;;  %v3879_v37 = vpack.c.bf16 %v2668_v15, %v2667_v11  ;;  %v3881_v59 = vpack.c.bf16 %v2686_v50, %v2685_v20 }
 0x6ec   :  { %3860 = vmatpush1.bf16.msra.mxu1 %v3859_v25  ;;  %v2670_v25 = vld [vmem:[%s7551_s8 + $0x58] sm:$0xff] }
 0x6ef   :  { %2355 = vmatmul.mubr.f32.vlgmr.msra.gmra.mrb[0].mxu1 %v6251_v42  ;;  %v2000_v42 = vmul.f32 0.2, %v6185_v52 }
 0x6f0   :  { %2360 = vmatprep.mubr.f32.mxu1 %v6260_v19 }
 0x6f1   :  { %v2024_v19 = vsel %vm1976_vm9, %v6185_v52, %v2000_v42  ;;  %v2677_v52 = vld [vmem:[%s7551_s8 + $0x90] sm:$0xff]  ;;  %v2687_v42 = vld [vmem:[%s7551_s8 + $0xe0] sm:$0xff] }
 0x6f3   :  { %2361 = vmatmul.mubr.f32.gmra.mrb[2].mxu1 %v6282_v4  ;;  %v2675_v4 = vld [vmem:[%s7551_s8 + $0x80] sm:$0xff] }
 0x6f4   :  { %2366 = vmatprep.mubr.f32.mxu1 %v6300_v45  ;;  %v2676_v45 = vld [vmem:[%s7551_s8 + $0x88] sm:$0xff] }
 0x6f7   :  { %2367 = vmatmul.mubr.f32.gmra.mrb[4].mxu1 %v6308_v13  ;;  %v2659_v13 = vld [vmem:[%s7551_s8] sm:$0xff] }
 0x6f8   :  { %2372 = vmatprep.mubr.f32.mxu1 %v6337_v12  ;;  %v3861_v12 = vpack.c.bf16 %v2676_v45, %v2675_v4  ;;  %v3883_v4 = vpack.c.bf16 %v2670_v25, %v2669_v47  ;;  %v2715_v45 = vld [vmem:[%s7551_s8 + $0x1c0] sm:$0xff] }
 0x6fa   :  { %3862 = vmatprep.subr.bf16.mxu0 %v3861_v12  ;;  %v2699_v12 = vld [vmem:[%s7551_s8 + $0x140] sm:$0xff] }
 0x6fb   :  { %2373 = vmatmul.mubr.f32.gmra.mrb[6].mxu1 %v6359_v18 }
 0x6fc   :  { %2378 = vmatprep.mubr.f32.mxu1 %v6370_v21  ;;  %v2678_v21 = vld [vmem:[%s7551_s8 + $0x98] sm:$0xff] }
 0x6ff   :  { %2379 = vmatmul.mubr.f32.gmra.mrb[8].mxu1 %v6387_v27  ;;  %v2661_v27 = vld [vmem:[%s7551_s8 + $0x10] sm:$0xff] }
 0x700   :  { %2384 = vmatprep.mubr.f32.mxu1 %v6398_v49  ;;  %v3865_v49 = vpack.c.bf16 %v2678_v21, %v2677_v52  ;;  %v2672_v52 = vld [vmem:[%s7551_s8 + $0x68] sm:$0xff] }
 0x703   :  { %2385 = vmatmul.mubr.f32.gmra.mrb[10].mxu1 %v6411_v48  ;;  %v2662_v48 = vld [vmem:[%s7551_s8 + $0x18] sm:$0xff] }
 0x704   :  { %2390 = vmatprep.mubr.f32.mxu1 %v6422_v26  ;;  %v3867_v26 = vpack.c.bf16 %v2662_v48, %v2661_v27  ;;  %v2700_v27 = vld [vmem:[%s7551_s8 + $0x148] sm:$0xff]  ;;  %v2689_v48 = vld [vmem:[%s7551_s8 + $0xf0] sm:$0xff] }
 0x707   :  { %2391 = vmatmul.mubr.f32.gmra.mrb[12].mxu1 %v6435_v51  ;;  %v2679_v51 = vld [vmem:[%s7551_s8 + $0xa0] sm:$0xff] }
 0x708   :  { %2396 = vmatprep.mubr.f32.mxu1 %v6446_v2  ;;  %v2680_v2 = vld [vmem:[%s7551_s8 + $0xa8] sm:$0xff] }
 0x70b   :  { %2397 = vmatmul.mubr.f32.gmra.mrb[14].mxu1 %v6459_v44  ;;  %v2663_v44 = vld [vmem:[%s7551_s8 + $0x20] sm:$0xff] }
 0x70c   :  { %2402 = vmatprep.mubr.f32.mxu1 %v6470_v38  ;;  %v3869_v38 = vpack.c.bf16 %v2680_v2, %v2679_v51  ;;  %v3871_v14 = vpack.c.bf16 %v2664_v9, %v2663_v44  ;;  %v2717_v51 = vld [vmem:[%s7551_s8 + $0x1d0] sm:$0xff]  ;;  %v2718_v2 = vld [vmem:[%s7551_s8 + $0x1d8] sm:$0xff] }
 0x70d   :  { %v2701_v44 = vld [vmem:[%s7551_s8 + $0x150] sm:$0xff]  ;;  %v3913_v6 = vpack.c.bf16 %v2718_v2, %v2717_v51 }
 0x70f   :  { %2403 = vmatmul.mubr.f32.gmra.mrb[16].mxu1 %v6483_v7  ;;  %v2665_v7 = vld [vmem:[%s7551_s8 + $0x30] sm:$0xff] }
 0x710   :  { %2408 = vmatprep.mubr.f32.mxu1 %v6494_v61  ;;  %v3875_v56 = vpack.c.bf16 %v2666_v28, %v2665_v7  ;;  %v2707_v61 = vld [vmem:[%s7551_s8 + $0x180] sm:$0xff] }
 0x711   :  { %v3893_v10 = vpack.c.bf16 %v2708_v58, %v2707_v61  ;;  %v2719_v7 = vld [vmem:[%s7551_s8 + $0x1e0] sm:$0xff] }
 0x712   :  { %v2703_v58 = vld [vmem:[%s7551_s8 + $0x160] sm:$0xff] }
 0x713   :  { %2409 = vmatmul.mubr.f32.gmra.mrb[18].mxu1 %v2020_v16  ;;  %3894 = vmatprep.subr.bf16.mxu1 %v3893_v10  ;;  %v2709_v16 = vld [vmem:[%s7551_s8 + $0x190] sm:$0xff]  ;;  %v2704_v10 = vld [vmem:[%s7551_s8 + $0x168] sm:$0xff] }
 0x714   :  { %2414 = vmatprep.mubr.f32.mxu1 %v2023_v24  ;;  %3896 = vmatpush3.bf16.msra.mxu1 %v3895_v22  ;;  %v3897_v46 = vpack.c.bf16 %v2710_v31, %v2709_v16  ;;  %v2694_v24 = vld [vmem:[%s7551_s8 + $0x118] sm:$0xff]  ;;  %v2739_v22 = vld [vmem:[%s7551_s8 + $0x280] sm:$0xff]  ;;  %v2740_v16 = vld [vmem:[%s7551_s8 + $0x288] sm:$0xff] }
 0x715   :  { %v3899_v36 = vpack.c.bf16 %v2694_v24, %v2693_v41  ;;  %v3921_v41 = vpack.c.bf16 %v2722_v43, %v2721_v34  ;;  %v2705_v24 = vld [vmem:[%s7551_s8 + $0x170] sm:$0xff]  ;;  %v3925_v53 = vpack.c.bf16 %v2740_v16, %v2739_v22 }
 0x716   :  { %3898 = vmatprep.subr.bf16.mxu1 %v3897_v46  ;;  %v3919_v46 = vpack.c.bf16 %v2704_v10, %v2703_v58 }
 0x717   :  { %2415 = vmatmul.mubr.f32.gmra.mrb[20].mxu1 %v2022_v63  ;;  %v2695_v63 = vld [vmem:[%s7551_s8 + $0x120] sm:$0xff] }
 0x718   :  { %2420 = vmatprep.mubr.f32.mxu1 %v7745_v40  ;;  %v2660_v40 = vld [vmem:[%s7551_s8 + $0x8] sm:$0xff]  ;;  %3900 = vmatpush3.bf16.msra.mxu1 %v3899_v36  ;;  %v3903_v54 = vpack.c.bf16 %v2696_v5, %v2695_v63  ;;  %v2706_v36 = vld [vmem:[%s7551_s8 + $0x178] sm:$0xff] }
 0x719   :  { %v3863_v18 = vpack.c.bf16 %v2660_v40, %v2659_v13  ;;  %3902 = vmatprep.subr.bf16.mxu1 %v3901_v32  ;;  %v2716_v13 = vld [vmem:[%s7551_s8 + $0x1c8] sm:$0xff]  ;;  %v3923_v63 = vpack.c.bf16 %v2706_v36, %v2705_v24 }
 0x71a   :  { %v3909_v21 = vpack.c.bf16 %v2716_v13, %v2715_v45  ;;  %v2772_v32 = vld [vmem:[%s7551_s8 + $0x388] sm:$0xff] }
 0x71b   :  { %2421 = vmatmul.mubr.f32.gmra.mrb[22].mxu1 %v2024_v19  ;;  %3864 = vmatpush3.bf16.msra.mxu0 %v3863_v18  ;;  %v2688_v19 = vld [vmem:[%s7551_s8 + $0xe8] sm:$0xff]  ;;  %v2671_v18 = vld [vmem:[%s7551_s8 + $0x60] sm:$0xff]  ;;  %v6786_v5 = vpack.c.bf16 %v2772_v32, %v2771_v17 }
 0x71c   :  { %3866 = vmatprep.subr.bf16.mxu0 %v3865_v49  ;;  %3904 = vmatpush3.bf16.msra.mxu1 %v3903_v54  ;;  %v3885_v40 = vpack.c.bf16 %v2688_v19, %v2687_v42  ;;  %v3911_v49 = vpack.c.bf16 %v2700_v27, %v2699_v12  ;;  %v3887_v9 = vpack.c.bf16 %v2672_v52, %v2671_v18  ;;  %v2427_v54 = vld [vmem:[%s7550_s7] sm:$0x3] }
 0x71d   :  { %3906 = vmatprep.subr.bf16.mxu1 %v3905_v23  ;;  %v6793_v0 = vrot.slane %v2427_v54, %v5193_v60  ;;  %v6796_v62 = vrot.slane %v2427_v54, %v5343_v55 }
 0x71f   :  { %3868 = vmatpush3.bf16.msra.mxu0 %v3867_v26  ;;  %v2690_v26 = vld [vmem:[%s7551_s8 + $0xf8] sm:$0xff] }
 0x720   :  { %3870 = vmatprep.subr.bf16.mxu0 %v3869_v38  ;;  %3908 = vmatpush3.bf16.msra.mxu1 %v3907_v3  ;;  %v2702_v38 = vld [vmem:[%s7551_s8 + $0x158] sm:$0xff]  ;;  %v3889_v28 = vpack.c.bf16 %v2690_v26, %v2689_v48 }
 0x721   :  { %3910 = vmatprep.subr.bf16.mxu1 %v3909_v21  ;;  %v3915_v29 = vpack.c.bf16 %v2702_v38, %v2701_v44 }
 0x723   :  { %3872 = vmatpush3.bf16.msra.mxu0 %v3871_v14  ;;  %v2673_v14 = vld [vmem:[%s7551_s8 + $0x70] sm:$0xff] }
 0x724   :  { %3874 = vmatprep.subr.bf16.mxu0 %v3873_v57  ;;  %3912 = vmatpush3.bf16.msra.mxu1 %v3911_v49  ;;  %v2720_v57 = vld [vmem:[%s7551_s8 + $0x1e8] sm:$0xff] }
 0x725   :  { %v3917_v61 = vpack.c.bf16 %v2720_v57, %v2719_v7  ;;  %3914 = vmatprep.subr.bf16.mxu1 %v3913_v6 }
 0x727   :  { %3876 = vmatpush3.bf16.msra.mxu0 %v3875_v56  ;;  %v2674_v56 = vld [vmem:[%s7551_s8 + $0x78] sm:$0xff] }
 0x728   :  { %3878 = vmatprep.subr.bf16.mxu0 %v3877_v35  ;;  %v3891_v31 = vpack.c.bf16 %v2674_v56, %v2673_v14  ;;  %3916 = vmatpush3.bf16.msra.mxu1 %v3915_v29 }
 0x729   :  { %3918 = vmatprep.subr.bf16.mxu1 %v3917_v61 }
 0x72b   :  { %3880 = vmatpush3.bf16.msra.mxu0 %v3879_v37 }
 0x72c   :  { %3882 = vmatprep.subr.bf16.mxu0 %v3881_v59  ;;  %3920 = vmatpush3.bf16.msra.mxu1 %v3919_v46 }
 0x72d   :  { %3922 = vmatprep.subr.bf16.mxu1 %v3921_v41 }
 0x72f   :  { %3884 = vmatpush3.bf16.msra.mxu0 %v3883_v4 }
 0x730   :  { %3886 = vmatprep.subr.bf16.mxu0 %v3885_v40  ;;  %3924 = vmatpush3.bf16.msra.mxu1 %v3923_v63 }
 0x731   :  { %3989 = vmatprep.subr.bf16.mxu1 %v6786_v5 }
 0x733   :  { %3888 = vmatpush3.bf16.msra.mxu0 %v3887_v9 }
 0x734   :  { %3890 = vmatprep.subr.bf16.mxu0 %v3889_v28 }
 0x737   :  { %3892 = vmatpush3.bf16.msra.mxu0 %v3891_v31 }
 0x738   :  { %3926 = vmatprep.subr.bf16.mxu0 %v3925_v53 }
 0x7c2   :  { %v2356_v30 = vpop.f32.mrb[0].mxu1 }
 0x7c3   :  { %v2358_v23 = vpop.f32.mrb[1].mxu1  ;;  %v6799_v3 = vadd.f32 %v6793_v0, %v2356_v30 }
 0x7c4   :  { %v6805_v11 = vadd.f32 %v6796_v62, %v2358_v23 }
 0x7c6   :  { %v2362_v33 = vpop.f32.mrb[2].mxu1 }
 0x7c7   :  { %v6802_v1 = vadd.f32 %v6793_v0, %v2362_v33  ;;  %v2364_v8 = vpop.f32.mrb[3].mxu1 }
 0x7c8   :  { %v6808_v35 = vadd.f32 %v6796_v62, %v2364_v8 }
 0x7c9   :  { %v2463_v15 = vadd.f32 %v6802_v1, %v6799_v3 }
 0x7ca   :  { %v2474_v55 = vadd.f32 %v6808_v35, %v6805_v11  ;;  %v2368_v20 = vpop.f32.mrb[4].mxu1 }
 0x7cb   :  { %v6815_v50 = vadd.f32 %v6793_v0, %v2368_v20  ;;  %v2370_v37 = vpop.f32.mrb[5].mxu1 }
 0x7cc   :  { %v6818_v59 = vadd.f32 %v6796_v62, %v2370_v37 }
 0x7cd   :  { %v2464_v47 = vadd.f32 %v2463_v15, %v6815_v50 }
 0x7ce   :  { %v2475_v25 = vadd.f32 %v2474_v55, %v6818_v59  ;;  %v2374_v42 = vpop.f32.mrb[6].mxu1 }
 0x7cf   :  { %v2445_v19 = vadd.f32 %v6793_v0, %v2374_v42  ;;  %v2376_v4 = vpop.f32.mrb[7].mxu1 }
 0x7d0   :  { %v6824_v45 = vadd.f32 %v6796_v62, %v2376_v4 }
 0x7d1   :  { %v2465_v13 = vadd.f32 %v2464_v47, %v2445_v19 }
 0x7d2   :  { %v2476_v12 = vadd.f32 %v2475_v25, %v6824_v45  ;;  %v2380_v40 = vpop.f32.mrb[8].mxu1 }
 0x7d3   :  { %v2447_v18 = vadd.f32 %v6793_v0, %v2380_v40  ;;  %v2382_v52 = vpop.f32.mrb[9].mxu1 }
 0x7d4   :  { %v6829_v21 = vadd.f32 %v6796_v62, %v2382_v52 }
 0x7d5   :  { %v2466_v27 = vadd.f32 %v2465_v13, %v2447_v18 }
 0x7d6   :  { %v2477_v49 = vadd.f32 %v2476_v12, %v6829_v21  ;;  %v2386_v48 = vpop.f32.mrb[10].mxu1 }
 0x7d7   :  { %v2449_v26 = vadd.f32 %v6793_v0, %v2386_v48  ;;  %v2388_v51 = vpop.f32.mrb[11].mxu1 }
 0x7d8   :  { %v6834_v2 = vadd.f32 %v6796_v62, %v2388_v51 }
 0x7d9   :  { %v2467_v44 = vadd.f32 %v2466_v27, %v2449_v26 }
 0x7da   :  { %v2478_v38 = vadd.f32 %v2477_v49, %v6834_v2  ;;  %v2392_v9 = vpop.f32.mrb[12].mxu1 }
 0x7db   :  { %v2451_v14 = vadd.f32 %v6793_v0, %v2392_v9  ;;  %v2394_v6 = vpop.f32.mrb[13].mxu1 }
 0x7dc   :  { %v2452_v29 = vadd.f32 %v6796_v62, %v2394_v6 }
 0x7dd   :  { %v2468_v7 = vadd.f32 %v2467_v44, %v2451_v14 }
 0x7de   :  { %v2479_v57 = vadd.f32 %v2478_v38, %v2452_v29  ;;  %v2398_v28 = vpop.f32.mrb[14].mxu1 }
 0x7df   :  { %v2453_v56 = vadd.f32 %v6793_v0, %v2398_v28  ;;  %v2400_v61 = vpop.f32.mrb[15].mxu1 }
 0x7e0   :  { %v2454_v58 = vadd.f32 %v6796_v62, %v2400_v61 }
 0x7e1   :  { %v2469_v10 = vadd.f32 %v2468_v7, %v2453_v56 }
 0x7e2   :  { %v2480_v34 = vadd.f32 %v2479_v57, %v2454_v58  ;;  %v2404_v43 = vpop.f32.mrb[16].mxu1 }
 0x7e3   :  { %v2455_v22 = vadd.f32 %v6793_v0, %v2404_v43  ;;  %v2406_v16 = vpop.f32.mrb[17].mxu1 }
 0x7e4   :  { %v2456_v31 = vadd.f32 %v6796_v62, %v2406_v16 }
 0x7e5   :  { %v2470_v46 = vadd.f32 %v2469_v10, %v2455_v22 }
 0x7e6   :  { %v2481_v41 = vadd.f32 %v2480_v34, %v2456_v31  ;;  %v2410_v24 = vpop.f32.mrb[18].mxu1 }
 0x7e7   :  { %v2457_v36 = vadd.f32 %v6793_v0, %v2410_v24  ;;  %v2412_v53 = vpop.f32.mrb[19].mxu1 }
 0x7e8   :  { %v2458_v17 = vadd.f32 %v6796_v62, %v2412_v53 }
 0x7e9   :  { %v2471_v32 = vadd.f32 %v2470_v46, %v2457_v36 }
 0x7ea   :  { %v2482_v63 = vadd.f32 %v2481_v41, %v2458_v17  ;;  %v2416_v54 = vpop.f32.mrb[20].mxu1 }
 0x7eb   :  { %v2459_v30 = vadd.f32 %v6793_v0, %v2416_v54  ;;  %v2418_v23 = vpop.f32.mrb[21].mxu1 }
 0x7ec   :  { %v2460_v33 = vadd.f32 %v6796_v62, %v2418_v23 }
 0x7ed   :  { %v2472_v8 = vadd.f32 %v2471_v32, %v2459_v30 }
 0x7ee   :  { %v2483_v15 = vadd.f32 %v2482_v63, %v2460_v33  ;;  %v2422_v55 = vpop.f32.mrb[22].mxu1 }
 0x7ef   :  { %v2461_v20 = vadd.f32 %v6793_v0, %v2422_v55  ;;  %v2424_v37 = vpop.f32.mrb[23].mxu1 }
 0x7f0   :  { %v2462_v47 = vadd.f32 %v6796_v62, %v2424_v37 }
 0x7f1   :  { %v2473_v25 = vadd.f32 %v2472_v8, %v2461_v20 }
 0x7f2   :  { %v2484_v42 = vadd.f32 %v2483_v15, %v2462_v47 }
 0x7f3   :  { %v2485_v4 = vmul.f32 0.083333336, %v2473_v25 }
 0x7f4   :  { %v2486_v13 = vmul.f32 0.083333336, %v2484_v42 }
 0x7f5   :  { %v6850_v12 = vsub.f32 %v6799_v3, %v2485_v4  ;;  %v6853_v40 = vsub.f32 %v6802_v1, %v2485_v4  ;;  %v6856_v52 = vsub.f32 %v6815_v50, %v2485_v4  ;;  %v6858_v27 = vsub.f32 %v2445_v19, %v2485_v4 }
 0x7f6   :  { %v6860_v49 = vsub.f32 %v2447_v18, %v2485_v4  ;;  %v6862_v0 = vsub.f32 %v2449_v26, %v2485_v4  ;;  %v6864_v62 = vsub.f32 %v2451_v14, %v2485_v4  ;;  %v6866_v48 = vsub.f32 %v2453_v56, %v2485_v4 }
 0x7f7   :  { %v6868_v51 = vsub.f32 %v2455_v22, %v2485_v4  ;;  %v6870_v3 = vsub.f32 %v2457_v36, %v2485_v4  ;;  %v6872_v44 = vsub.f32 %v2459_v30, %v2485_v4  ;;  %v6874_v1 = vsub.f32 %v2461_v20, %v2485_v4 }
 0x7f8   :  { %v2511_v50 = vmul.f32 %v6850_v12, %v6850_v12  ;;  %v2513_v19 = vmul.f32 %v6853_v40, %v6853_v40  ;;  %v2515_v18 = vmul.f32 %v6856_v52, %v6856_v52  ;;  %v2517_v26 = vmul.f32 %v6858_v27, %v6858_v27 }
 0x7f9   :  { %v6885_v9 = vsub.f32 %v6805_v11, %v2486_v13  ;;  %v6888_v14 = vsub.f32 %v6808_v35, %v2486_v13  ;;  %v6891_v6 = vsub.f32 %v6818_v59, %v2486_v13  ;;  %v6894_v7 = vsub.f32 %v6824_v45, %v2486_v13 }
 0x7fa   :  { %v2535_v38 = vadd.f32 %v2513_v19, %v2511_v50  ;;  %v6897_v57 = vsub.f32 %v6829_v21, %v2486_v13  ;;  %v6900_v28 = vsub.f32 %v6834_v2, %v2486_v13  ;;  %v6902_v56 = vsub.f32 %v2452_v29, %v2486_v13 }
 0x7fb   :  { %v6904_v11 = vsub.f32 %v2454_v58, %v2486_v13  ;;  %v6906_v10 = vsub.f32 %v2456_v31, %v2486_v13  ;;  %v6908_v35 = vsub.f32 %v2458_v17, %v2486_v13  ;;  %v6910_v59 = vsub.f32 %v2460_v33, %v2486_v13 }
 0x7fc   :  { %v2536_v61 = vadd.f32 %v2535_v38, %v2515_v18  ;;  %v2510_v34 = vsub.f32 %v2462_v47, %v2486_v13  ;;  %v2512_v45 = vmul.f32 %v6885_v9, %v6885_v9  ;;  %v2514_v21 = vmul.f32 %v6888_v14, %v6888_v14 }
 0x7fd   :  { %v2519_v2 = vmul.f32 %v6860_v49, %v6860_v49  ;;  %v2521_v58 = vmul.f32 %v6862_v0, %v6862_v0  ;;  %v2516_v22 = vmul.f32 %v6891_v6, %v6891_v6  ;;  %v2523_v31 = vmul.f32 %v6864_v62, %v6864_v62 }
 0x7fe   :  { %v2537_v29 = vadd.f32 %v2536_v61, %v2517_v26  ;;  %v2546_v16 = vadd.f32 %v2514_v21, %v2512_v45  ;;  %v2518_v41 = vmul.f32 %v6894_v7, %v6894_v7  ;;  %v2525_v36 = vmul.f32 %v6866_v48, %v6866_v48 }
 0x7ff   :  { %v2520_v17 = vmul.f32 %v6897_v57, %v6897_v57  ;;  %v2527_v63 = vmul.f32 %v6868_v51, %v6868_v51  ;;  %v2522_v30 = vmul.f32 %v6900_v28, %v6900_v28  ;;  %v2529_v33 = vmul.f32 %v6870_v3, %v6870_v3 }
 0x800   :  { %v2538_v43 = vadd.f32 %v2537_v29, %v2519_v2  ;;  %v2547_v24 = vadd.f32 %v2546_v16, %v2516_v22  ;;  %v2524_v15 = vmul.f32 %v6902_v56, %v6902_v56  ;;  %v2531_v20 = vmul.f32 %v6872_v44, %v6872_v44 }
 0x801   :  { %v2526_v47 = vmul.f32 %v6904_v11, %v6904_v11  ;;  %v2533_v42 = vmul.f32 %v6874_v1, %v6874_v1  ;;  %v2528_v13 = vmul.f32 %v6906_v10, %v6906_v10  ;;  %v2530_v18 = vmul.f32 %v6908_v35, %v6908_v35 }
 0x802   :  { %v2539_v46 = vadd.f32 %v2538_v43, %v2521_v58  ;;  %v2548_v32 = vadd.f32 %v2547_v24, %v2518_v41  ;;  %v2532_v61 = vmul.f32 %v6910_v59, %v6910_v59  ;;  %v2534_v2 = vmul.f32 %v2510_v34, %v2510_v34 }
 0x804   :  { %v2540_v53 = vadd.f32 %v2539_v46, %v2523_v31  ;;  %v2549_v23 = vadd.f32 %v2548_v32, %v2520_v17  ;;  %v2724_v32 = vld [vmem:[%s7551_s8 + $0x208] sm:$0xff] }
 0x806   :  { %v2541_v54 = vadd.f32 %v2540_v53, %v2525_v36  ;;  %v2550_v55 = vadd.f32 %v2549_v23, %v2522_v30 }
 0x808   :  { %v2542_v8 = vadd.f32 %v2541_v54, %v2527_v63  ;;  %v2551_v25 = vadd.f32 %v2550_v55, %v2524_v15  ;;  %v2755_v54 = vld [vmem:[%s7551_s8 + $0x300] sm:$0xff]  ;;  %v2725_v55 = vld [vmem:[%s7551_s8 + $0x210] sm:$0xff] }
 0x80a   :  { %v2543_v37 = vadd.f32 %v2542_v8, %v2529_v33  ;;  %v2552_v50 = vadd.f32 %v2551_v25, %v2526_v47 }
 0x80c   :  { %v2544_v4 = vadd.f32 %v2543_v37, %v2531_v20  ;;  %v2553_v26 = vadd.f32 %v2552_v50, %v2528_v13  ;;  %v2726_v20 = vld [vmem:[%s7551_s8 + $0x218] sm:$0xff]  ;;  %v2743_v13 = vld [vmem:[%s7551_s8 + $0x2a0] sm:$0xff]  ;;  %v2773_v50 = vld [vmem:[%s7551_s8 + $0x390] sm:$0xff] }
 0x80e   :  { %v2545_v19 = vadd.f32 %v2544_v4, %v2533_v42  ;;  %v2554_v45 = vadd.f32 %v2553_v26, %v2530_v18  ;;  %v3931_v26 = vpack.c.bf16 %v2726_v20, %v2725_v55  ;;  %v2777_v55 = vld [vmem:[%s7551_s8 + $0x3b0] sm:$0xff] }
 0x810   :  { %v2557_v38 = vmul.f32 0.083333336, %v2545_v19  ;;  %v2555_v29 = vadd.f32 %v2554_v45, %v2532_v61  ;;  %v2774_v19 = vld [vmem:[%s7551_s8 + $0x398] sm:$0xff]  ;;  %v2757_v61 = vld [vmem:[%s7551_s8 + $0x310] sm:$0xff] }
 0x811   :  { %v2758_v45 = vld [vmem:[%s7551_s8 + $0x318] sm:$0xff] }
 0x812   :  { %v2559_v21 = vadd.f32 1e-05, %v2557_v38  ;;  %v2556_v58 = vadd.f32 %v2555_v29, %v2534_v2  ;;  %v2744_v38 = vld [vmem:[%s7551_s8 + $0x2a8] sm:$0xff] }
 0x814   :  { %4196 = vrsqrt.f32 %v2559_v21  ;;  %v2558_v43 = vmul.f32 0.083333336, %v2556_v58 }
 0x816   :  { %v2560_v22 = vadd.f32 1e-05, %v2558_v43  ;;  %v7069_v43 = vpack.c.bf16 %v2774_v19, %v2773_v50 }
 0x818   :  { %4198 = vrsqrt.f32 %v2560_v22  ;;  %v2728_v22 = vld [vmem:[%s7551_s8 + $0x228] sm:$0xff] }
 0x81e   :  { %v6950_v16 = vpop.eup %4196 }
 0x81f   :  { %v6954_v31 = vmul.f32 %v6950_v16, %v6874_v1  ;;  %v2563_v46 = vmul.f32 %v6950_v16, %v6850_v12  ;;  %v2565_v41 = vmul.f32 %v6950_v16, %v6853_v40  ;;  %v6962_v24 = vmul.f32 %v6950_v16, %v6856_v52 }
 0x820   :  { %v6966_v36 = vmul.f32 %v6950_v16, %v6858_v27  ;;  %v6970_v53 = vmul.f32 %v6950_v16, %v6860_v49  ;;  %v6974_v1 = vmul.f32 %v6950_v16, %v6862_v0  ;;  %v6978_v12 = vmul.f32 %v6950_v16, %v6864_v62  ;;  %v2723_v62 = vld [vmem:[%s7551_s8 + $0x200] sm:$0xff] }
 0x821   :  { %vm2587_vm10 = vcmp.ge.f32.partialorder %v2563_v46, 0.0  ;;  %v2611_v52 = vmul.f32 0.2, %v2563_v46  ;;  %vm2589_vm11 = vcmp.ge.f32.partialorder %v2565_v41, 0.0  ;;  %v6984_v27 = vmul.f32 %v6950_v16, %v6866_v48 }
 0x822   :  { %v6980_v40 = vpop.eup %4198  ;;  %v2613_v63 = vmul.f32 0.2, %v2565_v41  ;;  %v3927_v8 = vpack.c.bf16 %v2724_v32, %v2723_v62  ;;  %v2615_v42 = vmul.f32 0.2, %v6962_v24  ;;  %vm2591_vm15 = vcmp.ge.f32.partialorder %v6962_v24, 0.0 }
 0x823   :  { %v6987_v49 = vmul.f32 %v6980_v40, %v2510_v34  ;;  %v2564_v0 = vmul.f32 %v6980_v40, %v6885_v9  ;;  %v2566_v17 = vmul.f32 %v6980_v40, %v6888_v14  ;;  %v2568_v48 = vmul.f32 %v6980_v40, %v6891_v6  ;;  %v2741_v34 = vld [vmem:[%s7551_s8 + $0x290] sm:$0xff]  ;;  %v2742_v9 = vld [vmem:[%s7551_s8 + $0x298] sm:$0xff]  ;;  %v2756_v6 = vld [vmem:[%s7551_s8 + $0x308] sm:$0xff] }
 0x824   :  { %v2570_v14 = vmul.f32 %v6980_v40, %v6894_v7  ;;  %v7017_v30 = vmul.f32 %v6980_v40, %v6897_v57  ;;  %v7021_v23 = vmul.f32 %v6980_v40, %v6900_v28  ;;  %v3929_v47 = vpack.c.bf16 %v2742_v9, %v2741_v34  ;;  %v2760_v34 = vld [vmem:[%s7551_s8 + $0x328] sm:$0xff] }
 0x825   :  { %vm2588_vm12 = vcmp.ge.f32.partialorder %v2564_v0, 0.0  ;;  %v2612_v33 = vmul.f32 0.2, %v2564_v0  ;;  %vm2590_vm13 = vcmp.ge.f32.partialorder %v2566_v17, 0.0  ;;  %v2614_v7 = vmul.f32 0.2, %v2566_v17 }
 0x826   :  { %v2616_v15 = vmul.f32 0.2, %v2568_v48  ;;  %vm2592_vm14 = vcmp.ge.f32.partialorder %v2568_v48, 0.0  ;;  %v2635_v28 = vsel %vm2587_vm10, %v2563_v46, %v2611_v52  ;;  %v2637_v25 = vsel %vm2589_vm11, %v2565_v41, %v2613_v63 }
 0x827   :  { %v2636_v57 = vsel %vm2588_vm12, %v2564_v0, %v2612_v33  ;;  %v2638_v37 = vsel %vm2590_vm13, %v2566_v17, %v2614_v7  ;;  %v7032_v4 = vpack.c.bf16 %v2756_v6, %v2755_v54  ;;  %v2618_v18 = vmul.f32 0.2, %v2570_v14  ;;  %v2729_v6 = vld [vmem:[%s7551_s8 + $0x230] sm:$0xff]  ;;  %v2730_v33 = vld [vmem:[%s7551_s8 + $0x238] sm:$0xff] }
 0x828   :  { %2858 = vmatprep.mubr.f32.mxu0 %v2636_v57  ;;  %2968 = vmatprep.mubr.f32.mxu1 %v2638_v37  ;;  %v7055_v21 = vmul.f32 %v6980_v40, %v6902_v56  ;;  %v7058_v2 = vsel %vm2592_vm14, %v2568_v48, %v2616_v15  ;;  %vm2594_vm1 = vcmp.ge.f32.partialorder %v2570_v14, 0.0  ;;  %v7062_v29 = vmul.f32 %v6980_v40, %v6904_v11  ;;  %v2727_v56 = vld [vmem:[%s7551_s8 + $0x220] sm:$0xff] }
 0x829   :  { %2859 = vmatmul.mubr.f32.vlgmr.msra.gmra.mrb[48].mxu0 %v2635_v28  ;;  %2969 = vmatmul.mubr.f32.vlgmr.msra.gmra.mrb[24].mxu1 %v2637_v25  ;;  %v7066_v58 = vmul.f32 %v6980_v40, %v6906_v10  ;;  %v2775_v11 = vld [vmem:[%s7551_s8 + $0x3a0] sm:$0xff]  ;;  %v7082_v10 = vmul.f32 %v6950_v16, %v6868_v51  ;;  %v7086_v46 = vmul.f32 %v6980_v40, %v6908_v35  ;;  %v2617_v52 = vmul.f32 0.2, %v6966_v36  ;;  %v2776_v51 = vld [vmem:[%s7551_s8 + $0x3a8] sm:$0xff]  ;;  %v2745_v35 = vld [vmem:[%s7551_s8 + $0x2b0] sm:$0xff] }
 0x82a   :  { %3928 = vmatpush3.bf16.msra.mxu0 %v3927_v8  ;;  %2863 = vmatprep.mubr.f32.mxu0 %v2638_v37  ;;  %v7091_v41 = vsel %vm2591_vm15, %v6962_v24, %v2615_v42  ;;  %v3933_v0 = vpack.c.bf16 %v2744_v38, %v2743_v13  ;;  %v7095_v17 = vpack.c.bf16 %v2758_v45, %v2757_v61  ;;  %v2746_v24 = vld [vmem:[%s7551_s8 + $0x2b8] sm:$0xff]  ;;  %vm2593_vm2 = vcmp.ge.f32.partialorder %v6966_v36, 0.0  ;;  %v2759_v48 = vld [vmem:[%s7551_s8 + $0x320] sm:$0xff]  ;;  %v2748_v37 = vld [vmem:[%s7551_s8 + $0x2c8] sm:$0xff] }
 0x82b   :  { %2973 = vmatprep.mubr.f32.mxu1 %v7058_v2  ;;  %3930 = vmatprep.subr.bf16.mxu0 %v3929_v47  ;;  %v7108_v62 = vsel %vm2594_vm1, %v2570_v14, %v2618_v18  ;;  %v2620_v32 = vmul.f32 0.2, %v7017_v30  ;;  %vm2596_vm4 = vcmp.ge.f32.partialorder %v7017_v30, 0.0  ;;  %v3935_v63 = vpack.c.bf16 %v2728_v22, %v2727_v56  ;;  %v2731_v28 = vld [vmem:[%s7551_s8 + $0x240] sm:$0xff]  ;;  %v2764_v45 = vld [vmem:[%s7551_s8 + $0x348] sm:$0xff]  ;;  %v2749_v56 = vld [vmem:[%s7551_s8 + $0x2d0] sm:$0xff] }
 0x82c   :  { %3997 = vmatpush3.bf16.msra.mxu1 %v7032_v4  ;;  %v7123_v9 = vmul.f32 %v6950_v16, %v6870_v3  ;;  %v7126_v14 = vpack.c.bf16 %v2776_v51, %v2775_v11  ;;  %v3937_v54 = vpack.c.bf16 %v2746_v24, %v2745_v35  ;;  %v7136_v7 = vmul.f32 %v6980_v40, %v6910_v59  ;;  %v2778_v59 = vld [vmem:[%s7551_s8 + $0x3b8] sm:$0xff]  ;;  %v2779_v18 = vld [vmem:[%s7551_s8 + $0x3c0] sm:$0xff] }
 0x82d   :  { %2864 = vmatmul.mubr.f32.gmra.mrb[50].mxu0 %v2637_v25  ;;  %2974 = vmatmul.mubr.f32.gmra.mrb[26].mxu1 %v7091_v41  ;;  %v7141_v3 = vsel %vm2593_vm2, %v6966_v36, %v2617_v52  ;;  %v2619_v8 = vmul.f32 0.2, %v6970_v53  ;;  %v7145_v15 = vpack.c.bf16 %v2760_v34, %v2759_v48  ;;  %v2747_v36 = vld [vmem:[%s7551_s8 + $0x2c0] sm:$0xff]  ;;  %v7158_v40 = vmul.f32 %v6950_v16, %v6872_v44  ;;  %v2761_v44 = vld [vmem:[%s7551_s8 + $0x330] sm:$0xff]  ;;  %v2762_v16 = vld [vmem:[%s7551_s8 + $0x338] sm:$0xff] }
 0x82e   :  { %2868 = vmatprep.mubr.f32.mxu0 %v7058_v2  ;;  %2978 = vmatprep.mubr.f32.mxu1 %v7108_v62  ;;  %v7165_v20 = vsel %vm2596_vm4, %v7017_v30, %v2620_v32  ;;  %vm2595_vm5 = vcmp.ge.f32.partialorder %v6970_v53, 0.0  ;;  %v2622_v57 = vmul.f32 0.2, %v7021_v23  ;;  %vm2598_vm6 = vcmp.ge.f32.partialorder %v7021_v23, 0.0  ;;  %v2732_v25 = vld [vmem:[%s7551_s8 + $0x248] sm:$0xff]  ;;  %v2750_v22 = vld [vmem:[%s7551_s8 + $0x2d8] sm:$0xff] }
 0x82f   :  { %3932 = vmatpush3.bf16.msra.mxu0 %v3931_v26  ;;  %3990 = vmatprep.subr.bf16.mxu1 %v7069_v43  ;;  %v3939_v30 = vpack.c.bf16 %v2730_v33, %v2729_v6  ;;  %v7182_v47 = vpack.c.bf16 %v2778_v59, %v2777_v55  ;;  %v7191_v42 = vsel %vm2595_vm5, %v6970_v53, %v2619_v8  ;;  %v2621_v13 = vmul.f32 0.2, %v6974_v1  ;;  %v2780_v26 = vld [vmem:[%s7551_s8 + $0x3c8] sm:$0xff]  ;;  %v2763_v53 = vld [vmem:[%s7551_s8 + $0x340] sm:$0xff]  ;;  %v2733_v52 = vld [vmem:[%s7551_s8 + $0x250] sm:$0xff] }
 0x830   :  { %3934 = vmatprep.subr.bf16.mxu0 %v3933_v0  ;;  %3998 = vmatpush3.bf16.msra.mxu1 %v7095_v17  ;;  %v3941_v50 = vpack.c.bf16 %v2748_v37, %v2747_v36  ;;  %v7195_v19 = vpack.c.bf16 %v2762_v16, %v2761_v44  ;;  %v7211_v38 = vsel %vm2598_vm6, %v7021_v23, %v2622_v57  ;;  %vm2597_vm7 = vcmp.ge.f32.partialorder %v6974_v1, 0.0  ;;  %v2734_v0 = vld [vmem:[%s7551_s8 + $0x258] sm:$0xff]  ;;  %v2781_v48 = vld [vmem:[%s7551_s8 + $0x3d0] sm:$0xff]  ;;  %v2751_v33 = vld [vmem:[%s7551_s8 + $0x2e0] sm:$0xff] }
 0x831   :  { %2869 = vmatmul.mubr.f32.gmra.mrb[52].mxu0 %v7091_v41  ;;  %2979 = vmatmul.mubr.f32.gmra.mrb[28].mxu1 %v7141_v3  ;;  %v2624_v61 = vmul.f32 0.2, %v7055_v21  ;;  %vm2600_vm8 = vcmp.ge.f32.partialorder %v7055_v21, 0.0  ;;  %v3943_v23 = vpack.c.bf16 %v2732_v25, %v2731_v28  ;;  %v7228_v11 = vpack.c.bf16 %v2780_v26, %v2779_v18  ;;  %v2782_v34 = vld [vmem:[%s7551_s8 + $0x3d8] sm:$0xff]  ;;  %v2752_v8 = vld [vmem:[%s7551_s8 + $0x2e8] sm:$0xff]  ;;  %v2735_v59 = vld [vmem:[%s7551_s8 + $0x260] sm:$0xff] }
 0x832   :  { %2873 = vmatprep.mubr.f32.mxu0 %v7108_v62  ;;  %2983 = vmatprep.mubr.f32.mxu1 %v7165_v20  ;;  %v7237_v51 = vsel %vm2597_vm7, %v6974_v1, %v2621_v13  ;;  %v2623_v35 = vmul.f32 0.2, %v6978_v12  ;;  %v7241_v24 = vpack.c.bf16 %v2764_v45, %v2763_v53  ;;  %v3945_v32 = vpack.c.bf16 %v2750_v22, %v2749_v56  ;;  %v2765_v1 = vld [vmem:[%s7551_s8 + $0x350] sm:$0xff]  ;;  %v2766_v6 = vld [vmem:[%s7551_s8 + $0x358] sm:$0xff]  ;;  %v2736_v36 = vld [vmem:[%s7551_s8 + $0x268] sm:$0xff] }
 0x833   :  { %3936 = vmatpush3.bf16.msra.mxu0 %v3935_v63  ;;  %3991 = vmatprep.subr.bf16.mxu1 %v7126_v14  ;;  %v7257_v63 = vsel %vm2600_vm8, %v7055_v21, %v2624_v61  ;;  %vm2599_vm9 = vcmp.ge.f32.partialorder %v6978_v12, 0.0  ;;  %vm2602_vm10 = vcmp.ge.f32.partialorder %v7062_v29, 0.0  ;;  %v3947_v21 = vpack.c.bf16 %v2734_v0, %v2733_v52  ;;  %v2784_v28 = vld [vmem:[%s7551_s8 + $0x3e8] sm:$0xff]  ;;  %v2753_v18 = vld [vmem:[%s7551_s8 + $0x2f0] sm:$0xff]  ;;  %v2754_v26 = vld [vmem:[%s7551_s8 + $0x2f8] sm:$0xff] }
 0x834   :  { %3938 = vmatprep.subr.bf16.mxu0 %v3937_v54  ;;  %3999 = vmatpush3.bf16.msra.mxu1 %v7145_v15  ;;  %v2626_v54 = vmul.f32 0.2, %v7062_v29  ;;  %v7274_v55 = vpack.c.bf16 %v2782_v34, %v2781_v48  ;;  %v7283_v57 = vsel %vm2599_vm9, %v6978_v12, %v2623_v35  ;;  %v2625_v37 = vmul.f32 0.2, %v6984_v27  ;;  %v2767_v12 = vld [vmem:[%s7551_s8 + $0x360] sm:$0xff]  ;;  %v2737_v61 = vld [vmem:[%s7551_s8 + $0x270] sm:$0xff] }
 0x835   :  { %2874 = vmatmul.mubr.f32.gmra.mrb[54].mxu0 %v7141_v3  ;;  %2984 = vmatmul.mubr.f32.gmra.mrb[30].mxu1 %v7191_v42  ;;  %v7287_v44 = vpack.c.bf16 %v2766_v6, %v2765_v1  ;;  %v3949_v16 = vpack.c.bf16 %v2752_v8, %v2751_v33  ;;  %vm2601_vm11 = vcmp.ge.f32.partialorder %v6984_v27, 0.0  ;;  %v2628_v13 = vmul.f32 0.2, %v7066_v58  ;;  %v2738_v52 = vld [vmem:[%s7551_s8 + $0x278] sm:$0xff]  ;;  %v2785_v0 = vld [vmem:[%s7551_s8 + $0x3f0] sm:$0xff] }
 0x836   :  { %2878 = vmatprep.mubr.f32.mxu0 %v7165_v20  ;;  %2988 = vmatprep.mubr.f32.mxu1 %v7211_v38  ;;  %v7303_v25 = vsel %vm2602_vm10, %v7062_v29, %v2626_v54  ;;  %vm2604_vm12 = vcmp.ge.f32.partialorder %v7066_v58, 0.0  ;;  %v3951_v29 = vpack.c.bf16 %v2736_v36, %v2735_v59  ;;  %v7326_v45 = vsel %vm2601_vm11, %v6984_v27, %v2625_v37  ;;  %v2786_v27 = vld [vmem:[%s7551_s8 + $0x3f8] sm:$0xff]  ;;  %v2769_v48 = vld [vmem:[%s7551_s8 + $0x370] sm:$0xff] }
 0x837   :  { %3940 = vmatpush3.bf16.msra.mxu0 %v3939_v30  ;;  %3992 = vmatprep.subr.bf16.mxu1 %v7182_v47  ;;  %v2783_v30 = vld [vmem:[%s7551_s8 + $0x3e0] sm:$0xff]  ;;  %v2627_v56 = vmul.f32 0.2, %v7082_v10  ;;  %v7346_v35 = vsel %vm2604_vm12, %v7066_v58, %v2628_v13  ;;  %vm2603_vm13 = vcmp.ge.f32.partialorder %v7082_v10, 0.0  ;;  %v2770_v34 = vld [vmem:[%s7551_s8 + $0x378] sm:$0xff]  ;;  %vm2606_vm14 = vcmp.ge.f32.partialorder %v7086_v46, 0.0 }
 0x838   :  { %3942 = vmatprep.subr.bf16.mxu0 %v3941_v50  ;;  %4000 = vmatpush3.bf16.msra.mxu1 %v7195_v19  ;;  %v2768_v50 = vld [vmem:[%s7551_s8 + $0x368] sm:$0xff]  ;;  %v7320_v53 = vpack.c.bf16 %v2784_v28, %v2783_v30  ;;  %v3955_v58 = vpack.c.bf16 %v2738_v52, %v2737_v61  ;;  %v7360_v1 = vpack.c.bf16 %v2786_v27, %v2785_v0  ;;  %v2629_v6 = vmul.f32 0.2, %v7123_v9 }
 0x839   :  { %2879 = vmatmul.mubr.f32.gmra.mrb[56].mxu0 %v7191_v42  ;;  %2989 = vmatmul.mubr.f32.gmra.mrb[32].mxu1 %v7237_v51  ;;  %v7330_v22 = vpack.c.bf16 %v2768_v50, %v2767_v12  ;;  %v7363_v54 = vsel %vm2603_vm13, %v7082_v10, %v2627_v56  ;;  %v7367_v33 = vpack.c.bf16 %v2770_v34, %v2769_v48  ;;  %vm2605_vm15 = vcmp.ge.f32.partialorder %v7123_v9, 0.0 }
 0x83a   :  { %2883 = vmatprep.mubr.f32.mxu0 %v7211_v38  ;;  %2993 = vmatprep.mubr.f32.mxu1 %v7257_v63  ;;  %v2653_v10 = vsel %vm2605_vm15, %v7123_v9, %v2629_v6  ;;  %vm2608_vm1 = vcmp.ge.f32.partialorder %v7136_v7, 0.0  ;;  %vm2607_vm2 = vcmp.ge.f32.partialorder %v7158_v40, 0.0  ;;  %vm2610_vm4 = vcmp.ge.f32.partialorder %v6987_v49, 0.0 }
 0x83b   :  { %3944 = vmatpush3.bf16.msra.mxu0 %v3943_v23  ;;  %3993 = vmatprep.subr.bf16.mxu1 %v7228_v11  ;;  %v3953_v23 = vpack.c.bf16 %v2754_v26, %v2753_v18  ;;  %vm2609_vm5 = vcmp.ge.f32.partialorder %v6954_v31, 0.0 }
 0x83c   :  { %4001 = vmatpush3.bf16.msra.mxu1 %v7241_v24  ;;  %3946 = vmatprep.subr.bf16.mxu0 %v3945_v32  ;;  %v2630_v32 = vmul.f32 0.2, %v7086_v46 }
 0x83d   :  { %2884 = vmatmul.mubr.f32.gmra.mrb[58].mxu0 %v7237_v51  ;;  %2994 = vmatmul.mubr.f32.gmra.mrb[34].mxu1 %v7283_v57 }
 0x83e   :  { %2888 = vmatprep.mubr.f32.mxu0 %v7257_v63  ;;  %2998 = vmatprep.mubr.f32.mxu1 %v7303_v25  ;;  %v2654_v8 = vsel %vm2606_vm14, %v7086_v46, %v2630_v32 }
 0x83f   :  { %3948 = vmatpush3.bf16.msra.mxu0 %v3947_v21  ;;  %3994 = vmatprep.subr.bf16.mxu1 %v7274_v55 }
 0x840   :  { %4002 = vmatpush3.bf16.msra.mxu1 %v7287_v44  ;;  %3950 = vmatprep.subr.bf16.mxu0 %v3949_v16 }
 0x841   :  { %2889 = vmatmul.mubr.f32.gmra.mrb[60].mxu0 %v7283_v57  ;;  %2999 = vmatmul.mubr.f32.gmra.mrb[36].mxu1 %v7326_v45 }
 0x842   :  { %2893 = vmatprep.mubr.f32.mxu0 %v7303_v25  ;;  %3003 = vmatprep.mubr.f32.mxu1 %v7346_v35 }
 0x843   :  { %3952 = vmatpush3.bf16.msra.mxu0 %v3951_v29  ;;  %3995 = vmatprep.subr.bf16.mxu1 %v7320_v53 }
 0x844   :  { %4003 = vmatpush3.bf16.msra.mxu1 %v7330_v22  ;;  %3954 = vmatprep.subr.bf16.mxu0 %v3953_v23 }
 0x845   :  { %2894 = vmatmul.mubr.f32.gmra.mrb[62].mxu0 %v7326_v45  ;;  %3004 = vmatmul.mubr.f32.gmra.mrb[38].mxu1 %v7363_v54 }
 0x846   :  { %2898 = vmatprep.mubr.f32.mxu0 %v7346_v35  ;;  %3008 = vmatprep.mubr.f32.mxu1 %v2654_v8 }
 0x847   :  { %3956 = vmatpush3.bf16.msra.mxu0 %v3955_v58  ;;  %3996 = vmatprep.subr.bf16.mxu1 %v7360_v1 }
 0x848   :  { %4004 = vmatpush3.bf16.msra.mxu1 %v7367_v33  ;;  %3958 = vmatprep.subr.bf16.mxu0 %v6786_v5  ;;  %v2632_v5 = vmul.f32 0.2, %v7136_v7 }
 0x849   :  { %2899 = vmatmul.mubr.f32.gmra.mrb[64].mxu0 %v7363_v54  ;;  %3009 = vmatmul.mubr.f32.gmra.mrb[40].mxu1 %v2653_v10 }
 0x84a   :  { %3078 = vmatprep.mubr.f32.mxu0 %v7058_v2  ;;  %3198 = vmatprep.mubr.f32.mxu1 %v7211_v38  ;;  %v2656_v2 = vsel %vm2608_vm1, %v7136_v7, %v2632_v5 }
 0x84d   :  { %3079 = vmatmul.mubr.f32.vlgmr.msra.gmra.mrb[66].mxu0 %v7091_v41  ;;  %3199 = vmatmul.mubr.f32.vlgmr.msra.gmra.mrb[42].mxu1 %v7237_v51  ;;  %v2633_v41 = vmul.f32 0.2, %v6954_v31 }
 0x84e   :  { %3960 = vmatpush3.bf16.msra.mxu0 %v7032_v4  ;;  %3083 = vmatprep.mubr.f32.mxu0 %v7108_v62  ;;  %v2631_v4 = vmul.f32 0.2, %v7158_v40 }
 0x84f   :  { %3203 = vmatprep.mubr.f32.mxu1 %v7257_v63  ;;  %3962 = vmatprep.subr.bf16.mxu0 %v7069_v43  ;;  %v2634_v43 = vmul.f32 0.2, %v6987_v49  ;;  %v2657_v9 = vsel %vm2609_vm5, %v6954_v31, %v2633_v41  ;;  %v4211_v31 = vld [vmem:[%s7543_s0 + $0x48] sm:$0xff] }
 0x850   :  { %v2655_v46 = vsel %vm2607_vm2, %v7158_v40, %v2631_v4 }
 0x851   :  { %3084 = vmatmul.mubr.f32.gmra.mrb[68].mxu0 %v7141_v3  ;;  %3204 = vmatmul.mubr.f32.gmra.mrb[44].mxu1 %v7283_v57 }
 0x852   :  { %3088 = vmatprep.mubr.f32.mxu0 %v7165_v20  ;;  %3964 = vmatpush3.bf16.msra.mxu0 %v7095_v17  ;;  %v2658_v17 = vsel %vm2610_vm4, %v6987_v49, %v2634_v43  ;;  %v3393_v49 = vsel %vm3375_vm0, %v4211_v31, 0.0 }
 0x853   :  { %3208 = vmatprep.mubr.f32.mxu1 %v7303_v25  ;;  %3966 = vmatprep.subr.bf16.mxu0 %v7126_v14  ;;  %v7746_v14 = vld [vmem:[#allocation5_spill] sm:$0xff] }
 0x854   :  { %v3394_v7 = vadd.f32 %v3393_v49, %v7746_v14 }
 0x855   :  { %3089 = vmatmul.mubr.f32.gmra.mrb[70].mxu0 %v7191_v42  ;;  %3209 = vmatmul.mubr.f32.gmra.mrb[46].mxu1 %v7326_v45 }
 0x856   :  { %3093 = vmatprep.mubr.f32.mxu0 %v7211_v38  ;;  %3968 = vmatpush3.bf16.msra.mxu0 %v7145_v15  ;;  %v4212_v15 = vld [vmem:[%s7543_s0 + $0x50] sm:$0xff] }
 0x857   :  { %3213 = vmatprep.mubr.f32.mxu1 %v7346_v35  ;;  %3970 = vmatprep.subr.bf16.mxu0 %v7182_v47 }
 0x859   :  { %3094 = vmatmul.mubr.f32.gmra.mrb[72].mxu0 %v7237_v51  ;;  %3214 = vmatmul.mubr.f32.gmra.mrb[48].mxu1 %v7363_v54 }
 0x85a   :  { %3098 = vmatprep.mubr.f32.mxu0 %v7257_v63  ;;  %3218 = vmatprep.mubr.f32.mxu1 %v2654_v8 }
 0x85b   :  { %3972 = vmatpush3.bf16.msra.mxu0 %v7195_v19 }
 0x85c   :  { %3974 = vmatprep.subr.bf16.mxu0 %v7228_v11  ;;  %v7449_v11 = vld [vmem:[%s7552_s9] ss:$0 sm:$0xff] }
 0x85d   :  { %3099 = vmatmul.mubr.f32.gmra.mrb[74].mxu0 %v7283_v57  ;;  %3219 = vmatmul.mubr.f32.gmra.mrb[50].mxu1 %v2653_v10 }
 0x85e   :  { %3103 = vmatprep.mubr.f32.mxu0 %v7303_v25  ;;  %3223 = vmatprep.mubr.f32.mxu1 %v2656_v2 }
 0x85f   :  { %3976 = vmatpush3.bf16.msra.mxu0 %v7241_v24 }
 0x860   :  { %3978 = vmatprep.subr.bf16.mxu0 %v7274_v55 }
 0x861   :  { %3104 = vmatmul.mubr.f32.gmra.mrb[76].mxu0 %v7326_v45  ;;  %3224 = vmatmul.mubr.f32.gmra.mrb[52].mxu1 %v2655_v46 }
 0x862   :  { %3108 = vmatprep.mubr.f32.mxu0 %v7346_v35  ;;  %3228 = vmatprep.mubr.f32.mxu1 %v2658_v17 }
 0x863   :  { %3980 = vmatpush3.bf16.msra.mxu0 %v7287_v44 }
 0x864   :  { %3982 = vmatprep.subr.bf16.mxu0 %v7320_v53 }
 0x865   :  { %3109 = vmatmul.mubr.f32.gmra.mrb[78].mxu0 %v7363_v54  ;;  %3229 = vmatmul.mubr.f32.gmra.mrb[54].mxu1 %v2657_v9 }
 0x866   :  { %3113 = vmatprep.mubr.f32.mxu0 %v2654_v8 }
 0x867   :  { %3984 = vmatpush3.bf16.msra.mxu0 %v7330_v22 }
 0x868   :  { %3986 = vmatprep.subr.bf16.mxu0 %v7360_v1 }
 0x869   :  { %3114 = vmatmul.mubr.f32.gmra.mrb[80].mxu0 %v2653_v10 }
 0x86a   :  { %3118 = vmatprep.mubr.f32.mxu0 %v2656_v2 }
 0x86b   :  { %3988 = vmatpush3.bf16.msra.mxu0 %v7367_v33 }
 0x86d   :  { %3119 = vmatmul.mubr.f32.gmra.mrb[82].mxu0 %v2655_v46 }
 0x86e   :  { %3188 = vmatprep.mubr.f32.mxu0 %v7108_v62  ;;  %v3395_v62 = vsel %vm3375_vm0, %v4212_v15, 0.0 }
 0x871   :  { %3189 = vmatmul.mubr.f32.vlgmr.msra.gmra.mrb[84].mxu0 %v7141_v3  ;;  %v4213_v3 = vld [vmem:[%s7543_s0 + $0x58] sm:$0xff] }
 0x872   :  { %3193 = vmatprep.mubr.f32.mxu0 %v7165_v20  ;;  %v3397_v40 = vsel %vm3375_vm0, %v4213_v3, 0.0  ;;  %v3396_v20 = vadd.f32 %v3395_v62, %v3394_v7 }
 0x874   :  { %v3398_v47 = vadd.f32 %v3397_v40, %v3396_v20 }
 0x875   :  { %3194 = vmatmul.mubr.f32.gmra.mrb[86].mxu0 %v7191_v42 }
 0x876   :  { %v3399_v42 = vsel %vm3375_vm0, %v3398_v47, 0.0 }
 0x877   :  { %3400 = vadd.xlane.f32.xlu1 %v3399_v42 }
 0x8fc   :  { %v3481_v19 = vpop.f32.mrb[48].mxu0  ;;  %v3540_v38 = vpop.f32.mrb[24].mxu1 }
 0x8fd   :  { %v3482_v51 = vpop.f32.mrb[49].mxu0  ;;  %v3541_v24 = vpop.f32.mrb[25].mxu1 }
 0x8fe   :  { %v3483_v63 = vadd.f32 %v3482_v51, %v3481_v19  ;;  %v3542_v21 = vadd.f32 %v3541_v24, %v3540_v38 }
 0x900   :  { %v2861_v55 = vadd.f32 %v3483_v63, %v7449_v11  ;;  %v3484_v59 = vpop.f32.mrb[50].mxu0  ;;  %v3543_v36 = vpop.f32.mrb[26].mxu1 }
 0x901   :  { %v3485_v57 = vpop.f32.mrb[51].mxu0  ;;  %v3544_v37 = vpop.f32.mrb[27].mxu1 }
 0x902   :  { %v7452_v44 = vadd.f32 %v3542_v21, %v2861_v55  ;;  %v3486_v16 = vadd.f32 %v3485_v57, %v3484_v59  ;;  %v3545_v30 = vadd.f32 %v3544_v37, %v3543_v36 }
 0x904   :  { %v2866_v28 = vadd.f32 %v3486_v16, %v7449_v11  ;;  %v3487_v12 = vpop.f32.mrb[52].mxu0  ;;  %v3546_v25 = vpop.f32.mrb[28].mxu1 }
 0x905   :  { %v3488_v13 = vpop.f32.mrb[53].mxu0  ;;  %v3547_v50 = vpop.f32.mrb[29].mxu1 }
 0x906   :  { %v7455_v18 = vadd.f32 %v3545_v30, %v2866_v28  ;;  %v3489_v26 = vadd.f32 %v3488_v13, %v3487_v12  ;;  %v3548_v29 = vadd.f32 %v3547_v50, %v3546_v25 }
 0x908   :  { %v2871_v53 = vadd.f32 %v3489_v26, %v7449_v11  ;;  %v3490_v61 = vpop.f32.mrb[54].mxu0  ;;  %v3549_v45 = vpop.f32.mrb[30].mxu1 }
 0x909   :  { %v3491_v56 = vpop.f32.mrb[55].mxu0  ;;  %v3550_v22 = vpop.f32.mrb[31].mxu1 }
 0x90a   :  { %v7458_v23 = vadd.f32 %v3548_v29, %v2871_v53  ;;  %v3492_v52 = vadd.f32 %v3491_v56, %v3490_v61  ;;  %v3551_v0 = vadd.f32 %v3550_v22, %v3549_v45 }
 0x90c   :  { %v2876_v27 = vadd.f32 %v3492_v52, %v7449_v11  ;;  %v3493_v35 = vpop.f32.mrb[56].mxu0  ;;  %v3552_v32 = vpop.f32.mrb[32].mxu1 }
 0x90d   :  { %v3494_v48 = vpop.f32.mrb[57].mxu0  ;;  %v3553_v34 = vpop.f32.mrb[33].mxu1 }
 0x90e   :  { %v7461_v58 = vadd.f32 %v3551_v0, %v2876_v27  ;;  %v3495_v1 = vadd.f32 %v3494_v48, %v3493_v35  ;;  %v3554_v54 = vadd.f32 %v3553_v34, %v3552_v32 }
 0x910   :  { %v2881_v6 = vadd.f32 %v3495_v1, %v7449_v11  ;;  %v3496_v33 = vpop.f32.mrb[58].mxu0  ;;  %v3555_v8 = vpop.f32.mrb[34].mxu1 }
 0x911   :  { %v3497_v10 = vpop.f32.mrb[59].mxu0  ;;  %v3556_v5 = vpop.f32.mrb[35].mxu1 }
 0x912   :  { %v7464_v4 = vadd.f32 %v3554_v54, %v2881_v6  ;;  %v3498_v2 = vadd.f32 %v3497_v10, %v3496_v33  ;;  %v3557_v43 = vadd.f32 %v3556_v5, %v3555_v8 }
 0x914   :  { %v2886_v46 = vadd.f32 %v3498_v2, %v7449_v11  ;;  %v3499_v41 = vpop.f32.mrb[60].mxu0  ;;  %v3558_v17 = vpop.f32.mrb[36].mxu1 }
 0x915   :  { %v3500_v9 = vpop.f32.mrb[61].mxu0  ;;  %v3559_v31 = vpop.f32.mrb[37].mxu1 }
 0x916   :  { %v7467_v49 = vadd.f32 %v3557_v43, %v2886_v46  ;;  %v3501_v14 = vadd.f32 %v3500_v9, %v3499_v41  ;;  %v3560_v7 = vadd.f32 %v3559_v31, %v3558_v17  ;;  %v4246_v46 = vmov 1966171168  }
 0x917   :  { %v3240_v41 = vunpack.c.l.s4 %v4246_v46 }
 0x918   :  { %v2891_v15 = vadd.f32 %v3501_v14, %v7449_v11  ;;  %v3502_v62 = vpop.f32.mrb[62].mxu0  ;;  %v3561_v3 = vpop.f32.mrb[38].mxu1 }
 0x919   :  { %v3503_v40 = vpop.f32.mrb[63].mxu0  ;;  %v3562_v20 = vpop.f32.mrb[39].mxu1 }
 0x91a   :  { %v7470_v47 = vadd.f32 %v3560_v7, %v2891_v15  ;;  %v3504_v42 = vadd.f32 %v3503_v40, %v3502_v62  ;;  %v3563_v19 = vadd.f32 %v3562_v20, %v3561_v3  ;;  %v3241_v3 = vunpack.c.0.s8 %v3240_v41 }
 0x91c   :  { %v2896_v38 = vadd.f32 %v3504_v42, %v7449_v11  ;;  %v3505_v51 = vpop.f32.mrb[64].mxu0  ;;  %v3564_v24 = vpop.f32.mrb[40].mxu1 }
 0x91d   :  { %v3506_v63 = vpop.f32.mrb[65].mxu0  ;;  %v3565_v21 = vpop.f32.mrb[41].mxu1 }
 0x91e   :  { %v7473_v55 = vadd.f32 %v3563_v19, %v2896_v38  ;;  %v3507_v59 = vadd.f32 %v3506_v63, %v3505_v51  ;;  %v3566_v36 = vadd.f32 %v3565_v21, %v3564_v24  ;;  %v7493_v63 = vsub.s32 %v3241_v3, %v5172_v39 }
 0x920   :  { %v2901_v57 = vadd.f32 %v3507_v59, %v7449_v11  ;;  %v3599_v37 = vpop.f32.mrb[66].mxu0  ;;  %v3664_v16 = vpop.f32.mrb[42].mxu1 }
 0x921   :  { %v3600_v30 = vpop.f32.mrb[67].mxu0  ;;  %v3665_v28 = vpop.f32.mrb[43].mxu1 }
 0x922   :  { %v7476_v12 = vadd.f32 %v3566_v36, %v2901_v57  ;;  %v3601_v25 = vadd.f32 %v3600_v30, %v3599_v37  ;;  %v3666_v13 = vadd.f32 %v3665_v28, %v3664_v16  ;;  %v3234_v36 = vld [vmem:[%s7553_s10] sm:$0xff] }
 0x924   :  { %v7479_v50 = vadd.f32 %v3601_v25, %v7452_v44  ;;  %v3602_v26 = vpop.f32.mrb[68].mxu0  ;;  %v3667_v29 = vpop.f32.mrb[44].mxu1 }
 0x925   :  { %v3603_v53 = vpop.f32.mrb[69].mxu0  ;;  %v3668_v61 = vpop.f32.mrb[45].mxu1 }
 0x926   :  { %v3604_v45 = vadd.f32 %v3603_v53, %v3602_v26  ;;  %v3669_v56 = vadd.f32 %v3668_v61, %v3667_v29  ;;  %v3238_v26 = vcombine.high %v3234_v36, %v3234_v36 }
 0x928   :  { %v7482_v22 = vadd.f32 %v3604_v45, %v7455_v18  ;;  %v3605_v11 = vpop.f32.mrb[70].mxu0  ;;  %v3670_v52 = vpop.f32.mrb[46].mxu1 }
 0x929   :  { %v3606_v0 = vpop.f32.mrb[71].mxu0  ;;  %v3671_v27 = vpop.f32.mrb[47].mxu1 }
 0x92a   :  { %v3607_v35 = vadd.f32 %v3606_v0, %v3605_v11  ;;  %v3672_v32 = vadd.f32 %v3671_v27, %v3670_v52  ;;  %v3252_v52 = vrot.slane %v3238_v26, %v7493_v63 }
 0x92c   :  { %v3091_v48 = vadd.f32 %v3607_v35, %v7458_v23  ;;  %v3608_v34 = vpop.f32.mrb[72].mxu0  ;;  %v3673_v44 = vpop.f32.mrb[48].mxu1 }
 0x92d   :  { %v3609_v1 = vpop.f32.mrb[73].mxu0  ;;  %v3674_v54 = vpop.f32.mrb[49].mxu1 }
 0x92e   :  { %v7485_v6 = vadd.f32 %v3666_v13, %v3091_v48  ;;  %v3610_v33 = vadd.f32 %v3609_v1, %v3608_v34  ;;  %v3675_v8 = vadd.f32 %v3674_v54, %v3673_v44  ;;  %v3254_v48 = vcombine.high %v3252_v52, %v3252_v52 }
 0x930   :  { %v3096_v10 = vadd.f32 %v3610_v33, %v7461_v58  ;;  %v3611_v18 = vpop.f32.mrb[74].mxu0  ;;  %v3676_v5 = vpop.f32.mrb[50].mxu1 }
 0x931   :  { %v3612_v2 = vpop.f32.mrb[75].mxu0  ;;  %v3677_v43 = vpop.f32.mrb[51].mxu1 }
 0x932   :  { %v7488_v17 = vadd.f32 %v3669_v56, %v3096_v10  ;;  %v3613_v9 = vadd.f32 %v3612_v2, %v3611_v18  ;;  %v3678_v23 = vadd.f32 %v3677_v43, %v3676_v5  ;;  %v3282_v18 = vrot.slane %v3254_v48, %v7493_v63 }
 0x934   :  { %v3101_v31 = vadd.f32 %v3613_v9, %v7464_v4  ;;  %v3614_v14 = vpop.f32.mrb[76].mxu0  ;;  %v3679_v7 = vpop.f32.mrb[52].mxu1 }
 0x935   :  { %v3615_v15 = vpop.f32.mrb[77].mxu0  ;;  %v3680_v62 = vpop.f32.mrb[53].mxu1 }
 0x936   :  { %v3211_v40 = vadd.f32 %v3672_v32, %v3101_v31  ;;  %v3616_v20 = vadd.f32 %v3615_v15, %v3614_v14  ;;  %v3681_v58 = vadd.f32 %v3680_v62, %v3679_v7  ;;  %v3446_v31 = vld.sshfl [vmem:[%s7553_s10 + $0x8] sm:$0x1 pattern:$0x75316420]  ;;  %v3286_v7 = vcombine.high %v3282_v18, %v3282_v18 }
 0x938   :  { %v3106_v42 = vadd.f32 %v3616_v20, %v7467_v49  ;;  %v3617_v19 = vpop.f32.mrb[78].mxu0  ;;  %v3682_v38 = vpop.f32.mrb[54].mxu1  ;;  %v3245_v49 = vrot.slane %v3234_v36, %v7493_v63 }
 0x939   :  { %v3618_v51 = vpop.f32.mrb[79].mxu0  ;;  %v3683_v24 = vpop.f32.mrb[55].mxu1 }
 0x93a   :  { %v3216_v21 = vadd.f32 %v3675_v8, %v3106_v42  ;;  %v3619_v59 = vadd.f32 %v3618_v51, %v3617_v19  ;;  %v3684_v4 = vadd.f32 %v3683_v24, %v3682_v38  ;;  %v3253_v25 = vcombine.high %v3245_v49, %v3245_v49 }
 0x93b   :  { %v3261_v53 = vrot.slane %v3245_v49, %v7493_v63  ;;  %v3268_v8 = vrot.slane %v3252_v52, %v7493_v63  ;;  %v3332_v51 = vrot.slane %v3286_v7, %v5193_v60 }
 0x93c   :  { %v3111_v57 = vadd.f32 %v3619_v59, %v7470_v47  ;;  %v3620_v37 = vpop.f32.mrb[80].mxu0  ;;  %v3275_v56 = vrot.slane %v3253_v25, %v7493_v63 }
 0x93d   :  { %v3621_v16 = vpop.f32.mrb[81].mxu0  ;;  %v3283_v27 = vcombine.high %v3261_v53, %v3261_v53  ;;  %v3304_v44 = vrot.slane %v3261_v53, %v5193_v60  ;;  %v3320_v46 = vrot.slane %v3268_v8, %v5193_v60  ;;  %v3284_v41 = vcombine.high %v3268_v8, %v3268_v8  ;;  %v3401_v53 = vpop.xlane.xlu1 %3400 }
 0x93e   :  { %v3221_v30 = vadd.f32 %v3678_v23, %v3111_v57  ;;  %v3622_v28 = vadd.f32 %v3621_v16, %v3620_v37  ;;  %v3308_v10 = vrot.slane %v3275_v56, %v5193_v60  ;;  %v3324_v23 = vrot.slane %v3282_v18, %v5193_v60 }
 0x93f   :  { %v3312_v33 = vrot.slane %v3283_v27, %v5193_v60  ;;  %v3350_v3 = vmul.f32 %v3320_v46, %v3211_v40  ;;  %v3328_v20 = vrot.slane %v3284_v41, %v5193_v60 }
 0x940   :  { %v3116_v13 = vadd.f32 %v3622_v28, %v7473_v55  ;;  %v3623_v39 = vpop.f32.mrb[82].mxu0  ;;  %v3285_v55 = vcombine.high %v3275_v56, %v3275_v56  ;;  %v3351_v38 = vmul.f32 %v3324_v23, %v3216_v21 }
 0x941   :  { %v3624_v29 = vpop.f32.mrb[83].mxu0  ;;  %v3362_v24 = vsel %vm1157_vm3, %v3350_v3, 0.0  ;;  %v3352_v59 = vmul.f32 %v3328_v20, %v3221_v30  ;;  %v3403_v30 = vpop.permute.xlu0 %3402 }
 0x942   :  { %v3226_v61 = vadd.f32 %v3681_v58, %v3116_v13  ;;  %v3625_v45 = vadd.f32 %v3624_v29, %v3623_v39  ;;  %v3316_v5 = vrot.slane %v3285_v55, %v5193_v60  ;;  %v3300_v58 = vrot.slane %v3446_v31, %v7493_v63 }
 0x943   :  { %v3364_v57 = vsel %vm1157_vm3, %v3351_v38, 0.0  ;;  %v3366_v16 = vsel %vm1157_vm3, %v3352_v59, 0.0  ;;  %v3422_v55 = vstv %s3447_s11 }
 0x944   :  { %v3121_v47 = vadd.f32 %v3625_v45, %v7476_v12  ;;  %v3658_v11 = vpop.f32.mrb[84].mxu0  ;;  %v3349_v14 = vmul.f32 %v3316_v5, %v7488_v17  ;;  %v3353_v40 = vmul.f32 %v3332_v51, %v3226_v61  ;;  %v3411_v61 = vld [vmem:[%s7544_s1] sm:$0xff] }
 0x945   :  { %v3659_v0 = vpop.f32.mrb[85].mxu0  ;;  %v3414_v56 = vand.u32 2147483647, %v3411_v61 }
 0x946   :  { %v3231_v35 = vadd.f32 %v3684_v4, %v3121_v47  ;;  %v3660_v32 = vadd.f32 %v3659_v0, %v3658_v11  ;;  %v3360_v19 = vsel %vm1157_vm3, %v3349_v14, 0.0  ;;  %v3336_v4 = vrot.slane %v3300_v58, %v5193_v60  ;;  %v4214_v60 = vld [vmem:[%s7543_s0] sm:$0xff] }
 0x947   :  { %v3368_v28 = vsel %vm1157_vm3, %v3353_v40, 0.0  ;;  %v3405_v26 = vadd.f32 %v4214_v60, %v3403_v30  ;;  %4200 = vrcp.f32 %v3414_v56 }
 0x948   :  { %v3191_v34 = vadd.f32 %v3660_v32, %v7479_v50  ;;  %v3661_v1 = vpop.f32.mrb[86].mxu0  ;;  %v3348_v50 = vmul.f32 %v3312_v33, %v7485_v6  ;;  %v3354_v63 = vmul.f32 %v3336_v4, %v3231_v35  ;;  %v3418_v32 = vstv %s3417_s28 }
 0x949   :  { %v3662_v54 = vpop.f32.mrb[87].mxu0  ;;  %v3406_v29 = vmul.f32 0.5, %v3405_v26 }
 0x94a   :  { %v3663_v12 = vadd.f32 %v3662_v54, %v3661_v1  ;;  %v3346_v2 = vmul.f32 %v3304_v44, %v3191_v34  ;;  %v3358_v6 = vsel %vm1157_vm3, %v3348_v50, 0.0  ;;  %v3370_v25 = vsel %vm1157_vm3, %v3354_v63, 0.0 }
 0x94b   :  { %v3407_v45 = vsub.f32 %v3401_v53, %v3406_v29 }
 0x94c   :  { %v3196_v43 = vadd.f32 %v3663_v12, %v7482_v22  ;;  %v3355_v15 = vsel %vm1157_vm3, %v3346_v2, 0.0 }
 0x94d   :  { %v3408_v47 = vmul.f32 0.25, %v3407_v45 }
 0x94e   :  { %v3347_v9 = vmul.f32 %v3308_v10, %v3196_v43 }
 0x94f   :  { %v3410_v11 = vmul.f32 0.1, %v3408_v47 }
 0x950   :  { %v3356_v62 = vsel %vm1157_vm3, %v3347_v9, 0.0 }
 0x951   :  { %v3357_v22 = vadd.f32 %v3356_v62, %v3355_v15  ;;  %v3412_v52 = vsub.f32 %v3411_v61, %v3410_v11  ;;  %v4201_v27 = vpop.eup %4200 }
 0x953   :  { %v3359_v42 = vadd.f32 %v3358_v6, %v3357_v22  ;;  %v3413_v0 = vand.u32 2147483647, %v3412_v52 }
 0x955   :  { %v3361_v17 = vadd.f32 %v3360_v19, %v3359_v42  ;;  %v3416_v35 = vmul.f32 %v4201_v27, %v3413_v0 }
 0x957   :  { %v3363_v36 = vadd.f32 %v3362_v24, %v3361_v17  ;;  %v3419_v48 = vmul.f32 %v3418_v32, %v3416_v35 }
 0x959   :  { %v3365_v37 = vadd.f32 %v3364_v57, %v3363_v36 }
 0x95b   :  { %v3367_v49 = vadd.f32 %v3366_v16, %v3365_v37 }
 0x95d   :  { %v3369_v21 = vadd.f32 %v3368_v28, %v3367_v49 }
 0x95f   :  { %v3371_v13 = vadd.f32 %v3370_v25, %v3369_v21 }
 0x961   :  { %v3372_v39 = vsel %vm1157_vm3, %v3371_v13, 0.0 }
 0x962   :  { %3373 = vadd.xlane.f32.xlu0 %v3372_v39 }
 0x9ef   :  { %v3374_v34 = vpop.xlane.xlu0 %3373 }
 0x9f0   :  { %v3420_v44 = vadd.f32 %v3419_v48, %v3374_v34 }
 0x9f2   :  { %v3423_v1 = vadd.f32 %v3422_v55, %v3420_v44 }
 0x9f4   :  { %v3448_v54 = vmul.f32 -1.442695, %v3423_v1 }
 0x9f6   :  { %4202 = vpow2.f32 %v3448_v54 }
 0xa00   :  { %v4203_v33 = vpop.eup %4202 }
 0xa01   :  { %v3427_v8 = vadd.f32 1.0, %v4203_v33 }
 0xa03   :  { %4204 = vrcp.f32 %v3427_v8 }
 0xa0d   :  { %v4205_v12 = vpop.eup %4204 }
 0xa0e   :  { %3432 = vperm.xlu1 %4129, %v4205_v12  }
 0xa8d   :  { %v3433_v10 = vpop.permute.xlu1 %3432 }
 0xa8e   :  { %3435 = vst [vmem:[%s7555_s12] sm:$0xff] %v3433_v10 }
 0xa8f   :  { %3440 = vsyncpa [#allocation3], 1 }

</bundles_post_ra>
